<compile_context>
chip_gen: v7x
topology: tpu7x:2x2x1
jax: 0.10.0
libtpu: 0.0.40
codegen_flags: <defaults>
</compile_context>

<pallas_src>
import functools

import jax
import jax.numpy as jnp
from jax.experimental import pallas as pl
from jax.experimental.pallas import tpu as pltpu

_SUBLANE = 8
_LANE = 128
_MAX_TILE_ROWS = 8192          # 8192 x 128 f32 = 4 MiB per input per buffer
_MIN_KERNEL_ELEMS = 128 * 1024  # below this, plain XLA is faster (launch overhead)


def _default_max_tile_rows():
    """Pick the block height per chip generation.

    v7x has the fastest HBM (most sensitive to per-grid-step overhead) but only
    64 MiB of VMEM per TensorCore; v5e/v6e have 128 MiB.  8192 rows is safe and
    near-roofline everywhere; bump to 12288 when the chip looks like v7x.
    """
    try:
        vmem = pltpu.get_tpu_info().vmem_capacity_bytes
    except Exception:  # pragma: no cover - info query is best-effort
        return _MAX_TILE_ROWS
    if vmem <= 80 * 1024 * 1024:
        return 12288
    return _MAX_TILE_ROWS


def _focal_l1_kernel(pred_ref, target_ref, out_ref, acc_ref, *,
                     gamma, rows_main, tile_rows):
    c = pl.program_id(0)          # shard (TensorCore) index
    i = pl.program_id(1)          # step within the shard
    steps = pl.num_programs(1)

    @pl.when(i == 0)
    def _():
        acc_ref[...] = jnp.zeros_like(acc_ref)

    # Global block index / row offset of this step (unclamped).
    blk = c * steps + i
    row_start = blk * tile_rows

    p = pred_ref[...].astype(jnp.float32)
    t = target_ref[...].astype(jnp.float32)
    v = jnp.exp(-gamma * t) * jnp.abs(p - t)   # VPU + one EUP exp per element

    # Mask rows beyond the valid prefix: covers both the partial last block and
    # the redundant (clamped) step that appears when the block count is odd.
    row_ids = jax.lax.broadcasted_iota(jnp.int32, (tile_rows, _LANE), 0)
    v = jnp.where(row_start + row_ids < rows_main, v, 0.0)

    # Fold (tile_rows, 128) -> (8, 128): one vector add per data vreg, keeping
    # the accumulator a single 4 KiB tile (no full-block acc read+write).
    folds = tile_rows // _SUBLANE
    acc_ref[...] += jnp.sum(v.reshape(folds, _SUBLANE, _LANE), axis=0)

    @pl.when(i == steps - 1)
    def _():
        # Single cross-lane reduce + scalar SMEM store per shard.
        out_ref[0, 0] = jnp.sum(acc_ref[...])


def _focal_l1_jnp_sum(p, t, gamma):
    p = p.astype(jnp.float32)
    t = t.astype(jnp.float32)
    return jnp.sum(jnp.exp(-gamma * t) * jnp.abs(p - t))


def focal_l1_loss(pred, target, gamma=2.0, *,
                  max_tile_rows=None, min_kernel_elems=_MIN_KERNEL_ELEMS):
    assert pred.shape == target.shape, (pred.shape, target.shape)
    gamma = float(gamma)
    n = pred.size

    p_flat = pred.reshape(-1)
    t_flat = target.reshape(-1)

    if max_tile_rows is None:
        max_tile_rows = _default_max_tile_rows()
    assert max_tile_rows % 32 == 0, max_tile_rows

    n_tiles = n // (_SUBLANE * _LANE)     # whole (8, 128) tiles
    rows_main = n_tiles * _SUBLANE        # rows covered by the kernel
    use_kernel = (n >= max(min_kernel_elems, 1)) and (rows_main >= 32)

    if not use_kernel:
        # Small inputs: launch + grid overhead dominates; fused XLA is optimal.
        return _focal_l1_jnp_sum(p_flat, t_flat, gamma) / jnp.float32(n)

    n_main = rows_main * _LANE
    # Block rows: multiple of 32 sublanes (clean tiling for f32/bf16/int8),
    # never taller than the streamed array.
    tile_rows = min(max_tile_rows, (rows_main // 32) * 32)
    n_blocks = (rows_main + tile_rows - 1) // tile_rows
    num_shards = 2 if n_blocks >= 2 else 1
    steps = (n_blocks + num_shards - 1) // num_shards

    p2 = p_flat[:n_main].reshape(rows_main, _LANE)
    t2 = t_flat[:n_main].reshape(rows_main, _LANE)

    kernel = functools.partial(_focal_l1_kernel, gamma=gamma,
                               rows_main=rows_main, tile_rows=tile_rows)

    def _in_map(c, i):
        # Contiguous range of blocks per shard; clamp the (at most one)
        # out-of-range step of an odd block count to the last valid block.
        # That step repeats the previous block index (DMA skipped) and is fully
        # row-masked in the kernel.
        return (jnp.minimum(c * steps + i, n_blocks - 1), 0)

    itemsize = p2.dtype.itemsize
    block_in_bytes = tile_rows * _LANE * itemsize
    block_f32_bytes = tile_rows * _LANE * 4
    # 2 inputs x 2 pipeline buffers + room for in-kernel f32 intermediates.
    vmem_limit = min(2 * 2 * block_in_bytes + 4 * block_f32_bytes + (4 << 20),
                     100 << 20)

    partials = pl.pallas_call(
        kernel,
        out_shape=jax.ShapeDtypeStruct((num_shards, 1), jnp.float32),
        grid_spec=pltpu.PrefetchScalarGridSpec(
            num_scalar_prefetch=0,
            grid=(num_shards, steps),
            in_specs=[
                pl.BlockSpec((tile_rows, _LANE), _in_map),
                pl.BlockSpec((tile_rows, _LANE), _in_map),
            ],
            out_specs=pl.BlockSpec(
                (1, 1), lambda c, i: (c, 0), memory_space=pltpu.SMEM
            ),
            scratch_shapes=[pltpu.VMEM((_SUBLANE, _LANE), jnp.float32)],
        ),
        compiler_params=pltpu.CompilerParams(
            dimension_semantics=("parallel", "arbitrary"),
            vmem_limit_bytes=int(vmem_limit),
        ),
        cost_estimate=pl.CostEstimate(
            flops=6 * n_main,
            transcendentals=n_main,
            bytes_accessed=2 * itemsize * n_main + 4 * num_shards,
        ),
    )(p2, t2)

    main_sum = jnp.sum(partials)
    # Ragged tail: fewer than 1024 elements, exact, negligible.
    tail_sum = _focal_l1_jnp_sum(p_flat[n_main:], t_flat[n_main:], gamma)
    return (main_sum + tail_sum) / jnp.float32(n)


def focal_l1_loss_ref(pred, target, gamma=2.0):
    pred = pred.astype(jnp.float32)
    target = target.astype(jnp.float32)
    return jnp.mean(jnp.exp(-gamma * target) * jnp.abs(pred - target))


def _check(name, got, want, rtol=1e-4, atol=1e-6):
    assert jnp.allclose(got, want, rtol=rtol, atol=atol), (name, got, want)


if __name__ == "__main__":
    key = jax.random.PRNGKey(0)
    ks = jax.random.split(key, 8)

    # 1) Primary small NCHW case matching the PyTorch module's typical usage.
    #    (Small path: fused XLA, no pallas_call.)
    pred = jax.random.normal(ks[0], (2, 4, 16, 16), dtype=jnp.float32)
    target = jax.random.normal(ks[1], (2, 4, 16, 16), dtype=jnp.float32)
    loss = focal_l1_loss(pred, target, gamma=2.0)
    jax.block_until_ready(loss)
    _check("small", loss, focal_l1_loss_ref(pred, target, gamma=2.0))

    # 2) Default config through the Pallas kernel (single block, single shard).
    pred_b = jax.random.normal(ks[2], (8, 8, 64, 64), dtype=jnp.float32)
    target_b = jax.random.normal(ks[3], (8, 8, 64, 64), dtype=jnp.float32)
    loss_b = focal_l1_loss(pred_b, target_b, gamma=2.0)
    jax.block_until_ready(loss_b)
    _check("default-kernel", loss_b, focal_l1_loss_ref(pred_b, target_b, gamma=2.0))

    # 3) Forced small-block config: 2 shards, partial last block, ragged tail.
    pred_c = jax.random.normal(ks[4], (2, 3, 37, 129), dtype=jnp.float32)
    target_c = jax.random.normal(ks[5], (2, 3, 37, 129), dtype=jnp.float32)
    loss_c = focal_l1_loss(pred_c, target_c, gamma=2.0,
                           max_tile_rows=256, min_kernel_elems=0)
    jax.block_until_ready(loss_c)
    _check("two-shard", loss_c, focal_l1_loss_ref(pred_c, target_c, gamma=2.0))

    # 4) Odd block count: clamped + fully-masked redundant step on shard 1.
    pred_d = jax.random.normal(ks[6], (4, 3, 53, 64), dtype=jnp.float32)
    target_d = jax.random.normal(ks[7], (4, 3, 53, 64), dtype=jnp.float32)
    loss_d = focal_l1_loss(pred_d, target_d, gamma=2.0,
                           max_tile_rows=128, min_kernel_elems=0)
    jax.block_until_ready(loss_d)
    _check("odd-blocks", loss_d, focal_l1_loss_ref(pred_d, target_d, gamma=2.0))

    print("KERNEL_OK")
</pallas_src>

<mosaic_0001>
module attributes {stable_mosaic.version = 11 : i64} {
  func.func @_focal_l1_kernel(%arg0: i32, %arg1: i32, %arg2: memref<2048x128xf32, #tpu.memory_space<vmem>>, %arg3: memref<2048x128xf32, #tpu.memory_space<vmem>>, %arg4: memref<1x1xf32, #tpu.memory_space<smem>>, %arg5: memref<8x128xf32, #tpu.memory_space<vmem>>) attributes {dimension_semantics = [#tpu.dimension_semantics<parallel>, #tpu.dimension_semantics<arbitrary>], iteration_bounds = array<i64: 1, 1>, scalar_prefetch = 0 : i64, scratch_operands = 1 : i64, tpu.core_type = #tpu.core_type<tc>, window_params = [{transform_indices = @transform_0, window_bounds = array<i64: 2048, 128>}, {transform_indices = @transform_1, window_bounds = array<i64: 2048, 128>}, {transform_indices = @transform_2, window_bounds = array<i64: 1, 1>}]} {
    %c0_i32 = arith.constant 0 : i32
    %0 = arith.cmpi eq, %arg1, %c0_i32 : i32
    %1 = arith.extui %0 : i1 to i32
    %c0_i32_0 = arith.constant 0 : i32
    %2 = arith.cmpi ne, %1, %c0_i32_0 : i32
    scf.if %2 {
      %cst_13 = arith.constant 0.000000e+00 : f32
      %29 = vector.broadcast %cst_13 : f32 to vector<8x128xf32>
      %c0_14 = arith.constant 0 : index
      %c0_15 = arith.constant 0 : index
      %30 = vector.load %arg5[%c0_14, %c0_15] : memref<8x128xf32, #tpu.memory_space<vmem>>, vector<8x128xf32>
      tpu.vector_store %arg5[%c0_14, %c0_15], %29 {strides = array<i32>} : memref<8x128xf32, #tpu.memory_space<vmem>>, vector<8x128xf32>,
    } else {
    }
    %c1_i32 = arith.constant 1 : i32
    %3 = arith.muli %arg0, %c1_i32 : i32
    %4 = arith.addi %3, %arg1 : i32
    %c2048_i32 = arith.constant 2048 : i32
    %5 = arith.muli %4, %c2048_i32 : i32
    %c0 = arith.constant 0 : index
    %c0_1 = arith.constant 0 : index
    %6 = vector.load %arg2[%c0, %c0_1] : memref<2048x128xf32, #tpu.memory_space<vmem>>, vector<2048x128xf32>
    %c0_2 = arith.constant 0 : index
    %c0_3 = arith.constant 0 : index
    %7 = vector.load %arg3[%c0_2, %c0_3] : memref<2048x128xf32, #tpu.memory_space<vmem>>, vector<2048x128xf32>
    %cst = arith.constant -2.000000e+00 : f32
    %8 = vector.broadcast %cst : f32 to vector<2048x128xf32>
    %9 = arith.mulf %8, %7 : vector<2048x128xf32>
    %10 = math.exp %9 : vector<2048x128xf32>
    %11 = arith.subf %6, %7 : vector<2048x128xf32>
    %12 = math.absf %11 : vector<2048x128xf32>
    %13 = arith.mulf %10, %12 : vector<2048x128xf32>
    %14 = tpu.iota {dimensions = array<i32: 0>} : vector<2048x128xi32>
    %15 = vector.broadcast %5 : i32 to vector<2048x128xi32>
    %16 = arith.addi %15, %14 : vector<2048x128xi32>
    %c2048_i32_4 = arith.constant 2048 : i32
    %17 = vector.broadcast %c2048_i32_4 : i32 to vector<2048x128xi32>
    %18 = arith.cmpi slt, %16, %17 : vector<2048x128xi32>
    %cst_5 = arith.constant 0.000000e+00 : f32
    %19 = vector.broadcast %cst_5 : f32 to vector<2048x128xf32>
    %20 = arith.select %18, %13, %19 : vector<2048x128xi1>, vector<2048x128xf32>
    %c0_6 = arith.constant 0 : index
    %c0_7 = arith.constant 0 : index
    %21 = vector.load %arg5[%c0_6, %c0_7] : memref<8x128xf32, #tpu.memory_space<vmem>>, vector<8x128xf32>
    %22 = vector.shape_cast %20 : vector<2048x128xf32> to vector<256x8x128xf32>
    %cst_8 = arith.constant dense<0.000000e+00> : vector<8x128xf32>
    %23 = vector.multi_reduction <add>, %22, %cst_8 [0] : vector<256x8x128xf32> to vector<8x128xf32>
    %24 = arith.addf %21, %23 : vector<8x128xf32>
    %c0_9 = arith.constant 0 : index
    %c0_10 = arith.constant 0 : index
    %25 = vector.load %arg5[%c0_9, %c0_10] : memref<8x128xf32, #tpu.memory_space<vmem>>, vector<8x128xf32>
    tpu.vector_store %arg5[%c0_9, %c0_10], %24 {strides = array<i32>} : memref<8x128xf32, #tpu.memory_space<vmem>>, vector<8x128xf32>,
    %c0_i32_11 = arith.constant 0 : i32
    %26 = arith.cmpi eq, %arg1, %c0_i32_11 : i32
    %27 = arith.extui %26 : i1 to i32
    %c0_i32_12 = arith.constant 0 : i32
    %28 = arith.cmpi ne, %27, %c0_i32_12 : i32
    scf.if %28 {
      %c0_13 = arith.constant 0 : index
      %c0_14 = arith.constant 0 : index
      %29 = vector.load %arg5[%c0_13, %c0_14] : memref<8x128xf32, #tpu.memory_space<vmem>>, vector<8x128xf32>
      %30 = vector.shape_cast %29 : vector<8x128xf32> to vector<1x8x128xf32>
      %cst_15 = arith.constant dense<0.000000e+00> : vector<1xf32>
      %31 = vector.multi_reduction <add>, %30, %cst_15 [1, 2] : vector<1x8x128xf32> to vector<1xf32>
      %32 = vector.shape_cast %31 : vector<1xf32> to vector<1x1x1xf32>
      %33 = vector.extract %32[0, 0, 0] : f32 from vector<1x1x1xf32>
      %c0_16 = arith.constant 0 : index
      %c0_17 = arith.constant 0 : index
      %34 = memref.load %arg4[%c0_16, %c0_17] : memref<1x1xf32, #tpu.memory_space<smem>>
      memref.store %33, %arg4[%c0_16, %c0_17] : memref<1x1xf32, #tpu.memory_space<smem>>
    } else {
    }
    return
  }
  func.func @transform_0(%arg0: i32, %arg1: i32) -> (i32, i32) {
    %c1_i32 = arith.constant 1 : i32
    %0 = arith.muli %arg0, %c1_i32 : i32
    %1 = arith.addi %0, %arg1 : i32
    %c0_i32 = arith.constant 0 : i32
    %2 = arith.minsi %1, %c0_i32 : i32
    %c0_i32_0 = arith.constant 0 : i32
    %c0_i32_1 = arith.constant 0 : i32
    return %2, %c0_i32_0 : i32, i32
  }
  func.func @transform_1(%arg0: i32, %arg1: i32) -> (i32, i32) {
    %c1_i32 = arith.constant 1 : i32
    %0 = arith.muli %arg0, %c1_i32 : i32
    %1 = arith.addi %0, %arg1 : i32
    %c0_i32 = arith.constant 0 : i32
    %2 = arith.minsi %1, %c0_i32 : i32
    %c0_i32_0 = arith.constant 0 : i32
    %c0_i32_1 = arith.constant 0 : i32
    return %2, %c0_i32_0 : i32, i32
  }
  func.func @transform_2(%arg0: i32, %arg1: i32) -> (i32, i32) {
    %c0_i32 = arith.constant 0 : i32
    %c0_i32_0 = arith.constant 0 : i32
    return %arg0, %c0_i32 : i32, i32
  }
}

</mosaic_0001>

<bundles_post_ra>
// kernel: tpu_custom_call.1
= control target key start
LH: loop header
LB: loop body
LE: loop exit
PB: predicated region body
PF: predicated region fallthrough
CT: control target
= control target key end

     0   :  { %7 = vsyncpa [#allocation4], 0  ;;  %s5076_s0 = inlined_call_operand.hbm [shape: f32[2048,128], index: 0, kind: input, shape index: {}]   ;;  %s5077_s1 = inlined_call_operand.hbm [shape: f32[2048,128], index: 1, kind: input, shape index: {}]   ;;  %s5078_s2 = inlined_call_operand.hbm [shape: f32[1,1], index: 2, kind: output, shape index: {}]  }
   0x1   :  { %8 = vsyncpa [#allocation7], 0 }
   0x2   :  { %9 = vsyncpa [#allocation5], 0  ;;  %s4012_s9 = smov [#allocation3]   ;;  %s3952_s13 = scalar_lea.hbm %s5076_s0, 32768 }
   0x3   :  { %s21_s10 = sshll.u32 %s4012_s9, 4  ;;  %p3953_p0 = scmp.ne.s32.totalorder %s5076_s0, %s3952_s13  ;;  %s22_s10 = int_to_ptr.vmem [resolvable:$true] %s21_s10 }
   0x4   :  { %p3956_p1 = scmp.lt.u32.totalorder %s3952_s13, %s5076_s0 }
   0x6   :  { %p3958_p2 = pnand %p3956_p1, %p3953_p0 }
   0x8   :  { %3961 = shalt.err (!%p3958_p2)
}
   0x9   :  { %s3962_s18 = scalar_lea.vmem %s22_s10, 32768  ;;  %p3967_p4 = scmp.lt.s32.totalorder %s22_s10, %s22_s10 }
   0xa   :  { %p3963_p3 = scmp.ne.s32.totalorder %s22_s10, %s3962_s18  ;;  %p3968_p5 = scmp.lt.s32.totalorder %s3962_s18, %s3962_s18 }
   0xc   :  { %p3969_p6 = por %p3968_p5, %p3967_p4 }
   0xe   :  { %p3970_p7 = pnand %p3969_p6, %p3963_p3 }
  0x10   :  { %3973 = shalt.err (!%p3970_p7)
}
  0x11   :  { %s4013_s19 = smov 128   ;;  %s4014_s20 = smov 8  }
  0x12   :  { %27 = dma.hbm_to_vmem [thread:$0]  %s5076_s0, 32768, %s22_s10, [#allocation4], %s4013_s19, %s4013_s19, %s4014_s20  }
  0x13   :  { %s4015_s23 = smov [#allocation6]   ;;  %s3974_s27 = scalar_lea.hbm %s5077_s1, 32768 }
  0x14   :  { %s39_s24 = sshll.u32 %s4015_s23, 4  ;;  %p3975_p8 = scmp.ne.s32.totalorder %s5077_s1, %s3974_s27  ;;  %s40_s24 = int_to_ptr.vmem [resolvable:$true] %s39_s24 }
  0x15   :  { %p3978_p9 = scmp.lt.u32.totalorder %s3974_s27, %s5077_s1 }
  0x17   :  { %p3980_p10 = pnand %p3978_p9, %p3975_p8 }
  0x19   :  { %3983 = shalt.err (!%p3980_p10)
}
  0x1a   :  { %s3984_s4 = scalar_lea.vmem %s40_s24, 32768  ;;  %p3989_p12 = scmp.lt.s32.totalorder %s40_s24, %s40_s24 }
  0x1b   :  { %p3985_p11 = scmp.ne.s32.totalorder %s40_s24, %s3984_s4  ;;  %p3990_p13 = scmp.lt.s32.totalorder %s3984_s4, %s3984_s4 }
  0x1d   :  { %p3991_p0 = por %p3990_p13, %p3989_p12 }
  0x1f   :  { %p3992_p1 = pnand %p3991_p0, %p3985_p11 }
  0x21   :  { %3995 = shalt.err (!%p3992_p1)
}
  0x22   :  { %45 = dma.hbm_to_vmem [thread:$0]  %s5077_s1, 32768, %s40_s24, [#allocation7], %s4013_s19, %s4013_s19, %s4014_s20  }
  0x23   :  { %4006 = dma.done.wait [#allocation4], 32768  }
  0x24   :  { %4007 = vsyncadd [#allocation4], 4294934528 }
  0x25   :  { %4008 = dma.done.wait [#allocation7], 32768  }
  0x26   :  { %4009 = vsyncadd [#allocation7], 4294934528  ;;  %v323_v0 = vld [vmem:[#allocation6] sm:$0xff]  ;;  %v324_v1 = vld [vmem:[#allocation6 + $0x8] sm:$0xff]  ;;  %s3996_s8 = scalar_lea.hbm %s5078_s2, 16 }
  0x27   :  { %v325_v2 = vld [vmem:[#allocation6 + $0x10] sm:$0xff]  ;;  %v579_v3 = vmul.f32 -2.0, %v323_v0  ;;  %v580_v4 = vmul.f32 -2.0, %v324_v1  ;;  %v326_v5 = vld [vmem:[#allocation6 + $0x18] sm:$0xff]  ;;  %v4056_v7 = vld [vmem:[#allocation6 + $0x20] sm:$0xff]  ;;  %p3997_p2 = scmp.ne.s32.totalorder %s5078_s2, %s3996_s8  ;;  %p4000_p3 = scmp.lt.u32.totalorder %s3996_s8, %s5078_s2 }
  0x28   :  { %v581_v6 = vmul.f32 -2.0, %v325_v2  ;;  %v582_v9 = vmul.f32 -2.0, %v326_v5  ;;  %v4058_v11 = vld [vmem:[#allocation6 + $0x28] sm:$0xff]  ;;  %v583_v12 = vmul.f32 -2.0, %v4056_v7  ;;  %v4061_v14 = vld [vmem:[#allocation6 + $0x30] sm:$0xff]  ;;  %v4064_v17 = vld [vmem:[#allocation6 + $0x38] sm:$0xff] }
  0x29   :  { %v835_v8 = vmul.f32 1.442695, %v579_v3  ;;  %v837_v10 = vmul.f32 1.442695, %v580_v4  ;;  %v584_v15 = vmul.f32 -2.0, %v4058_v11  ;;  %v67_v18 = vld [vmem:[#allocation3] sm:$0xff]  ;;  %p4002_p4 = pnand %p4000_p3, %p3997_p2 }
  0x2a   :  { %v839_v13 = vmul.f32 1.442695, %v581_v6  ;;  %v841_v16 = vmul.f32 1.442695, %v582_v9  ;;  %v68_v19 = vld [vmem:[#allocation3 + $0x8] sm:$0xff]  ;;  %v585_v20 = vmul.f32 -2.0, %v4061_v14  ;;  %v1347_v27 = vsub.f32 %v67_v18, %v323_v0 }
  0x2b   :  { %3440 = vpow2.f32 %v835_v8  ;;  %v843_v21 = vmul.f32 1.442695, %v583_v12  ;;  %v4067_v22 = vld [vmem:[#allocation6 + $0x40] sm:$0xff]  ;;  %v69_v23 = vld [vmem:[#allocation3 + $0x10] sm:$0xff]  ;;  %v586_v24 = vmul.f32 -2.0, %v4064_v17  ;;  %v4070_v26 = vld [vmem:[#allocation6 + $0x48] sm:$0xff]  ;;  %v1348_v28 = vsub.f32 %v68_v19, %v324_v1 }
  0x2c   :  { %3442 = vpow2.f32 %v837_v10  ;;  %v845_v25 = vmul.f32 1.442695, %v584_v15  ;;  %v70_v29 = vld [vmem:[#allocation3 + $0x18] sm:$0xff]  ;;  %v587_v30 = vmul.f32 -2.0, %v4067_v22  ;;  %v847_v31 = vmul.f32 1.442695, %v585_v20 }
  0x2d   :  { %3444 = vpow2.f32 %v839_v13  ;;  %v4073_v32 = vld [vmem:[#allocation6 + $0x50] sm:$0xff]  ;;  %v1349_v33 = vsub.f32 %v69_v23, %v325_v2  ;;  %v71_v34 = vld [vmem:[#allocation3 + $0x20] sm:$0xff]  ;;  %v588_v35 = vmul.f32 -2.0, %v4070_v26  ;;  %v849_v36 = vmul.f32 1.442695, %v586_v24  ;;  %v4076_v38 = vld [vmem:[#allocation6 + $0x58] sm:$0xff] }
  0x2e   :  { %3446 = vpow2.f32 %v841_v16  ;;  %v1350_v39 = vsub.f32 %v70_v29, %v326_v5  ;;  %v1603_v40 = vand.u32 2147483647, %v1347_v27  ;;  %v1604_v41 = vand.u32 2147483647, %v1348_v28  ;;  %v72_v43 = vld [vmem:[#allocation3 + $0x28] sm:$0xff]  ;;  %v4079_v46 = vld [vmem:[#allocation6 + $0x60] sm:$0xff] }
  0x2f   :  { %3448 = vpow2.f32 %v843_v21  ;;  %v589_v44 = vmul.f32 -2.0, %v4073_v32  ;;  %v851_v45 = vmul.f32 1.442695, %v587_v30  ;;  %v1351_v47 = vsub.f32 %v71_v34, %v4056_v7  ;;  %v73_v50 = vld [vmem:[#allocation3 + $0x30] sm:$0xff]  ;;  %v4083_v53 = vld [vmem:[#allocation6 + $0x68] sm:$0xff]  ;;  %v74_v59 = vld [vmem:[#allocation3 + $0x38] sm:$0xff] }
  0x30   :  { %3450 = vpow2.f32 %v845_v25  ;;  %v1605_v48 = vand.u32 2147483647, %v1349_v33  ;;  %v590_v51 = vmul.f32 -2.0, %v4076_v38  ;;  %v853_v52 = vmul.f32 1.442695, %v588_v35  ;;  %v4087_v62 = vld [vmem:[#allocation6 + $0x70] sm:$0xff] }
  0x31   :  { %3452 = vpow2.f32 %v847_v31  ;;  %v1352_v54 = vsub.f32 %v72_v43, %v4058_v11  ;;  %v1606_v55 = vand.u32 2147483647, %v1350_v39  ;;  %v591_v60 = vmul.f32 -2.0, %v4079_v46  ;;  %v75_v3 = vld [vmem:[#allocation3 + $0x40] sm:$0xff]  ;;  %v4091_v6 = vld [vmem:[#allocation6 + $0x78] sm:$0xff]  ;;  %v76_v12 = vld [vmem:[#allocation3 + $0x48] sm:$0xff] }
  0x32   :  { %3454 = vpow2.f32 %v849_v36  ;;  %v855_v61 = vmul.f32 1.442695, %v589_v44  ;;  %v1353_v63 = vsub.f32 %v73_v50, %v4061_v14  ;;  %v1607_v0 = vand.u32 2147483647, %v1351_v47  ;;  %v4095_v15 = vld [vmem:[#allocation6 + $0x80] sm:$0xff]  ;;  %v77_v23 = vld [vmem:[#allocation3 + $0x50] sm:$0xff] }
  0x33   :  { %3456 = vpow2.f32 %v851_v45  ;;  %v592_v4 = vmul.f32 -2.0, %v4083_v53  ;;  %v857_v5 = vmul.f32 1.442695, %v590_v51  ;;  %v1354_v7 = vsub.f32 %v74_v59, %v4064_v17  ;;  %v4099_v25 = vld [vmem:[#allocation6 + $0x88] sm:$0xff]  ;;  %v78_v33 = vld [vmem:[#allocation3 + $0x58] sm:$0xff]  ;;  %v4103_v35 = vld [vmem:[#allocation6 + $0x90] sm:$0xff] }
  0x34   :  { %3458 = vpow2.f32 %v853_v52  ;;  %v1608_v8 = vand.u32 2147483647, %v1352_v54  ;;  %v593_v13 = vmul.f32 -2.0, %v4087_v62  ;;  %v859_v14 = vmul.f32 1.442695, %v591_v60  ;;  %v4107_v44 = vld [vmem:[#allocation6 + $0x98] sm:$0xff] }
  0x35   :  { %v3441_v37 = vpop.eup %3440  ;;  %3460 = vpow2.f32 %v855_v61  ;;  %v1355_v16 = vsub.f32 %v75_v3, %v4067_v22  ;;  %v1609_v18 = vand.u32 2147483647, %v1353_v63  ;;  %v594_v17 = vmul.f32 -2.0, %v4091_v6  ;;  %v80_v51 = vld [vmem:[#allocation3 + $0x68] sm:$0xff]  ;;  %v4111_v54 = vld [vmem:[#allocation6 + $0xa0] sm:$0xff]  ;;  %v81_v60 = vld [vmem:[#allocation3 + $0x70] sm:$0xff] }
  0x36   :  { %v3443_v42 = vpop.eup %3442  ;;  %v1859_v56 = vmul.f32 %v3441_v37, %v1603_v40  ;;  %3462 = vpow2.f32 %v857_v5  ;;  %v861_v24 = vmul.f32 1.442695, %v592_v4  ;;  %v1356_v27 = vsub.f32 %v76_v12, %v4070_v26  ;;  %v4115_v63 = vld [vmem:[#allocation6 + $0xa8] sm:$0xff]  ;;  %v82_v5 = vld [vmem:[#allocation3 + $0x78] sm:$0xff] }
  0x37   :  { %v3445_v49 = vpop.eup %3444  ;;  %v1860_v57 = vmul.f32 %v3443_v42, %v1604_v41  ;;  %v1610_v28 = vand.u32 2147483647, %v1354_v7  ;;  %v595_v22 = vmul.f32 -2.0, %v4095_v15  ;;  %3464 = vpow2.f32 %v859_v14  ;;  %v79_v42 = vld [vmem:[#allocation3 + $0x60] sm:$0xff] }
  0x38   :  { %v3447_v58 = vpop.eup %3446  ;;  %v1861_v1 = vmul.f32 %v3445_v49, %v1605_v48  ;;  %v863_v34 = vmul.f32 1.442695, %v593_v13  ;;  %v1357_v36 = vsub.f32 %v77_v23, %v4073_v32  ;;  %v1611_v37 = vand.u32 2147483647, %v1355_v16  ;;  %v83_v14 = vld [vmem:[#allocation3 + $0x80] sm:$0xff] }
  0x39   :  { %v3449_v2 = vpop.eup %3448  ;;  %v1862_v9 = vmul.f32 %v3447_v58, %v1606_v55  ;;  %v3142_v10 = vadd.f32 %v1860_v57, %v1859_v56  ;;  %v596_v26 = vmul.f32 -2.0, %v4099_v25  ;;  %3466 = vpow2.f32 %v861_v24  ;;  %v84_v24 = vld [vmem:[#allocation3 + $0x88] sm:$0xff] }
  0x3a   :  { %v3451_v11 = vpop.eup %3450  ;;  %v1863_v19 = vmul.f32 %v3449_v2, %v1607_v0  ;;  %v865_v43 = vmul.f32 1.442695, %v594_v17  ;;  %v1358_v45 = vsub.f32 %v78_v33, %v4076_v38  ;;  %v1612_v47 = vand.u32 2147483647, %v1356_v27 }
  0x3b   :  { %v3143_v20 = vadd.f32 %v3142_v10, %v1861_v1  ;;  %v3453_v21 = vpop.eup %3452  ;;  %v1864_v29 = vmul.f32 %v3451_v11, %v1608_v8  ;;  %v597_v32 = vmul.f32 -2.0, %v4103_v35  ;;  %3468 = vpow2.f32 %v863_v34  ;;  %v4119_v8 = vld [vmem:[#allocation6 + $0xb0] sm:$0xff] }
  0x3c   :  { %v3455_v31 = vpop.eup %3454  ;;  %v1865_v39 = vmul.f32 %v3453_v21, %v1609_v18  ;;  %v867_v52 = vmul.f32 1.442695, %v595_v22  ;;  %v1359_v55 = vsub.f32 %v79_v42, %v4079_v46  ;;  %v1613_v56 = vand.u32 2147483647, %v1357_v36  ;;  %v4123_v18 = vld [vmem:[#allocation6 + $0xb8] sm:$0xff]  ;;  %v85_v34 = vld [vmem:[#allocation3 + $0x90] sm:$0xff] }
  0x3d   :  { %v3144_v30 = vadd.f32 %v3143_v20, %v1862_v9  ;;  %v3457_v41 = vpop.eup %3456  ;;  %v1866_v48 = vmul.f32 %v3455_v31, %v1610_v28  ;;  %v598_v38 = vmul.f32 -2.0, %v4107_v44  ;;  %3470 = vpow2.f32 %v865_v43  ;;  %v4127_v28 = vld [vmem:[#allocation6 + $0xc0] sm:$0xff]  ;;  %v86_v43 = vld [vmem:[#allocation3 + $0x98] sm:$0xff] }
  0x3e   :  { %v3459_v50 = vpop.eup %3458  ;;  %v1867_v57 = vmul.f32 %v3457_v41, %v1611_v37  ;;  %v869_v61 = vmul.f32 1.442695, %v596_v26  ;;  %v1360_v0 = vsub.f32 %v80_v51, %v4083_v53  ;;  %v1614_v1 = vand.u32 2147483647, %v1358_v45  ;;  %v4131_v37 = vld [vmem:[#allocation6 + $0xc8] sm:$0xff] }
  0x3f   :  { %v3145_v40 = vadd.f32 %v3144_v30, %v1863_v19  ;;  %v3461_v59 = vpop.eup %3460  ;;  %v1868_v2 = vmul.f32 %v3459_v50, %v1612_v47  ;;  %v599_v46 = vmul.f32 -2.0, %v4111_v54  ;;  %3472 = vpow2.f32 %v867_v52  ;;  %v4135_v47 = vld [vmem:[#allocation6 + $0xd0] sm:$0xff]  ;;  %v87_v52 = vld [vmem:[#allocation3 + $0xa0] sm:$0xff] }
  0x40   :  { %v3463_v4 = vpop.eup %3462  ;;  %v871_v7 = vmul.f32 1.442695, %v597_v32  ;;  %v1361_v9 = vsub.f32 %v81_v60, %v4087_v62  ;;  %v1615_v10 = vand.u32 2147483647, %v1359_v55  ;;  %v1869_v11 = vmul.f32 %v3461_v59, %v1613_v56  ;;  %v4139_v56 = vld [vmem:[#allocation6 + $0xd8] sm:$0xff] }
  0x41   :  { %v3146_v49 = vadd.f32 %v3145_v40, %v1864_v29  ;;  %v3465_v13 = vpop.eup %3464  ;;  %v600_v53 = vmul.f32 -2.0, %v4115_v63  ;;  %3474 = vpow2.f32 %v869_v61  ;;  %v873_v16 = vmul.f32 1.442695, %v598_v38  ;;  %v88_v61 = vld [vmem:[#allocation3 + $0xa8] sm:$0xff] }
  0x42   :  { %v1362_v19 = vsub.f32 %v82_v5, %v4091_v6  ;;  %v1616_v20 = vand.u32 2147483647, %v1360_v0  ;;  %v1870_v21 = vmul.f32 %v3463_v4, %v1614_v1  ;;  %v601_v62 = vmul.f32 -2.0, %v4119_v8  ;;  %v4143_v1 = vld [vmem:[#allocation6 + $0xe0] sm:$0xff] }
  0x43   :  { %v3147_v58 = vadd.f32 %v3146_v49, %v1865_v39  ;;  %v3467_v17 = vpop.eup %3466  ;;  %3476 = vpow2.f32 %v871_v7  ;;  %v875_v27 = vmul.f32 1.442695, %v599_v46  ;;  %v1363_v29 = vsub.f32 %v83_v14, %v4095_v15  ;;  %v89_v7 = vld [vmem:[#allocation3 + $0xb0] sm:$0xff] }
  0x44   :  { %v1617_v30 = vand.u32 2147483647, %v1361_v9  ;;  %v1871_v31 = vmul.f32 %v3465_v13, %v1615_v10  ;;  %v602_v6 = vmul.f32 -2.0, %v4123_v18  ;;  %3478 = vpow2.f32 %v873_v16  ;;  %v4147_v10 = vld [vmem:[#allocation6 + $0xe8] sm:$0xff]  ;;  %v90_v16 = vld [vmem:[#allocation3 + $0xb8] sm:$0xff] }
  0x45   :  { %v3148_v3 = vadd.f32 %v3147_v58, %v1866_v48  ;;  %v3469_v22 = vpop.eup %3468  ;;  %v877_v36 = vmul.f32 1.442695, %v600_v53  ;;  %v1364_v39 = vsub.f32 %v84_v24, %v4099_v25  ;;  %v1618_v40 = vand.u32 2147483647, %v1362_v19 }
  0x46   :  { %v1872_v41 = vmul.f32 %v3467_v17, %v1616_v20  ;;  %v603_v15 = vmul.f32 -2.0, %v4127_v28  ;;  %3480 = vpow2.f32 %v875_v27  ;;  %v879_v45 = vmul.f32 1.442695, %v601_v62  ;;  %v4151_v20 = vld [vmem:[#allocation6 + $0xf0] sm:$0xff]  ;;  %v91_v27 = vld [vmem:[#allocation3 + $0xc0] sm:$0xff] }
  0x47   :  { %v3149_v12 = vadd.f32 %v3148_v3, %v1867_v57  ;;  %v3471_v26 = vpop.eup %3470  ;;  %v1365_v48 = vsub.f32 %v85_v34, %v4103_v35  ;;  %v1619_v49 = vand.u32 2147483647, %v1363_v29  ;;  %v1873_v50 = vmul.f32 %v3469_v22, %v1617_v30  ;;  %v4155_v30 = vld [vmem:[#allocation6 + $0xf8] sm:$0xff] }
  0x48   :  { %v604_v25 = vmul.f32 -2.0, %v4131_v37  ;;  %3482 = vpow2.f32 %v877_v36  ;;  %v881_v55 = vmul.f32 1.442695, %v602_v6  ;;  %v1366_v57 = vsub.f32 %v86_v43, %v4107_v44  ;;  %v92_v36 = vld [vmem:[#allocation3 + $0xc8] sm:$0xff] }
  0x49   :  { %v3150_v23 = vadd.f32 %v3149_v12, %v1868_v2  ;;  %v3473_v32 = vpop.eup %3472  ;;  %v1620_v58 = vand.u32 2147483647, %v1364_v39  ;;  %v1874_v59 = vmul.f32 %v3471_v26, %v1618_v40  ;;  %v605_v35 = vmul.f32 -2.0, %v4135_v47  ;;  %v4159_v40 = vld [vmem:[#allocation6 + $0x100] sm:$0xff] }
  0x4a   :  { %3484 = vpow2.f32 %v879_v45  ;;  %v883_v0 = vmul.f32 1.442695, %v603_v15  ;;  %v1367_v2 = vsub.f32 %v87_v52, %v4111_v54  ;;  %v1621_v3 = vand.u32 2147483647, %v1365_v48  ;;  %v93_v45 = vld [vmem:[#allocation3 + $0xd0] sm:$0xff] }
  0x4b   :  { %v3151_v33 = vadd.f32 %v3150_v23, %v1869_v11  ;;  %v3475_v38 = vpop.eup %3474  ;;  %v1875_v4 = vmul.f32 %v3473_v32, %v1619_v49  ;;  %v606_v44 = vmul.f32 -2.0, %v4139_v56  ;;  %3486 = vpow2.f32 %v881_v55  ;;  %v4163_v49 = vld [vmem:[#allocation6 + $0x108] sm:$0xff]  ;;  %v94_v55 = vld [vmem:[#allocation3 + $0xd8] sm:$0xff] }
  0x4c   :  { %v885_v9 = vmul.f32 1.442695, %v604_v25  ;;  %v1368_v11 = vsub.f32 %v88_v61, %v4115_v63  ;;  %v1622_v12 = vand.u32 2147483647, %v1366_v57  ;;  %v1876_v13 = vmul.f32 %v3475_v38, %v1620_v58  ;;  %v4167_v58 = vld [vmem:[#allocation6 + $0x110] sm:$0xff] }
  0x4d   :  { %v3152_v42 = vadd.f32 %v3151_v33, %v1870_v21  ;;  %v3477_v46 = vpop.eup %3476  ;;  %v607_v54 = vmul.f32 -2.0, %v4143_v1  ;;  %3488 = vpow2.f32 %v883_v0  ;;  %v887_v19 = vmul.f32 1.442695, %v605_v35  ;;  %v95_v0 = vld [vmem:[#allocation3 + $0xe0] sm:$0xff] }
  0x4e   :  { %v3479_v53 = vpop.eup %3478  ;;  %v1369_v21 = vsub.f32 %v89_v7, %v4119_v8  ;;  %v1623_v23 = vand.u32 2147483647, %v1367_v2  ;;  %v1877_v17 = vmul.f32 %v3477_v46, %v1621_v3  ;;  %v608_v63 = vmul.f32 -2.0, %v4147_v10  ;;  %v4171_v3 = vld [vmem:[#allocation6 + $0x118] sm:$0xff] }
  0x4f   :  { %v3153_v51 = vadd.f32 %v3152_v42, %v1871_v31  ;;  %3490 = vpow2.f32 %v885_v9  ;;  %v889_v29 = vmul.f32 1.442695, %v606_v44  ;;  %v1370_v31 = vsub.f32 %v90_v16, %v4123_v18  ;;  %v96_v9 = vld [vmem:[#allocation3 + $0xe8] sm:$0xff] }
  0x50   :  { %v3481_v62 = vpop.eup %3480  ;;  %v1624_v33 = vand.u32 2147483647, %v1368_v11  ;;  %v1878_v22 = vmul.f32 %v3479_v53, %v1622_v12  ;;  %v609_v8 = vmul.f32 -2.0, %v4151_v20  ;;  %3492 = vpow2.f32 %v887_v19  ;;  %v4175_v12 = vld [vmem:[#allocation6 + $0x120] sm:$0xff]  ;;  %v97_v19 = vld [vmem:[#allocation3 + $0xf0] sm:$0xff] }
  0x51   :  { %v3154_v60 = vadd.f32 %v3153_v51, %v1872_v41  ;;  %v891_v39 = vmul.f32 1.442695, %v607_v54  ;;  %v1371_v41 = vsub.f32 %v91_v27, %v4127_v28  ;;  %v1625_v42 = vand.u32 2147483647, %v1369_v21 }
  0x52   :  { %v3483_v6 = vpop.eup %3482  ;;  %v1879_v26 = vmul.f32 %v3481_v62, %v1623_v23  ;;  %v610_v18 = vmul.f32 -2.0, %v4155_v30  ;;  %3494 = vpow2.f32 %v889_v29  ;;  %v893_v48 = vmul.f32 1.442695, %v608_v63  ;;  %v4179_v23 = vld [vmem:[#allocation6 + $0x128] sm:$0xff]  ;;  %v98_v29 = vld [vmem:[#allocation3 + $0xf8] sm:$0xff] }
  0x53   :  { %v3155_v5 = vadd.f32 %v3154_v60, %v1873_v50  ;;  %v1372_v50 = vsub.f32 %v92_v36, %v4131_v37  ;;  %v1626_v51 = vand.u32 2147483647, %v1370_v31  ;;  %v1880_v32 = vmul.f32 %v3483_v6, %v1624_v33  ;;  %v4183_v33 = vld [vmem:[#allocation6 + $0x130] sm:$0xff] }
  0x54   :  { %v3485_v15 = vpop.eup %3484  ;;  %v611_v28 = vmul.f32 -2.0, %v4159_v40  ;;  %3496 = vpow2.f32 %v891_v39  ;;  %v895_v57 = vmul.f32 1.442695, %v609_v8  ;;  %v1627_v60 = vand.u32 2147483647, %v1371_v41  ;;  %v99_v39 = vld [vmem:[#allocation3 + $0x100] sm:$0xff] }
  0x55   :  { %v3156_v14 = vadd.f32 %v3155_v5, %v1874_v59  ;;  %v3487_v25 = vpop.eup %3486  ;;  %v1373_v59 = vsub.f32 %v93_v45, %v4135_v47  ;;  %v1881_v38 = vmul.f32 %v3485_v15, %v1625_v42  ;;  %v612_v37 = vmul.f32 -2.0, %v4163_v49  ;;  %v4187_v42 = vld [vmem:[#allocation6 + $0x138] sm:$0xff] }
  0x56   :  { %3498 = vpow2.f32 %v893_v48  ;;  %v897_v2 = vmul.f32 1.442695, %v610_v18  ;;  %v1628_v5 = vand.u32 2147483647, %v1372_v50  ;;  %v1882_v46 = vmul.f32 %v3487_v25, %v1626_v51  ;;  %v100_v48 = vld [vmem:[#allocation3 + $0x108] sm:$0xff]  ;;  %v4191_v51 = vld [vmem:[#allocation6 + $0x140] sm:$0xff] }
  0x57   :  { %v3157_v24 = vadd.f32 %v3156_v14, %v1875_v4  ;;  %v3489_v35 = vpop.eup %3488  ;;  %v1374_v4 = vsub.f32 %v94_v55, %v4139_v56  ;;  %v613_v47 = vmul.f32 -2.0, %v4167_v58  ;;  %3500 = vpow2.f32 %v895_v57  ;;  %v101_v57 = vld [vmem:[#allocation3 + $0x110] sm:$0xff] }
  0x58   :  { %v899_v11 = vmul.f32 1.442695, %v611_v28  ;;  %v1629_v14 = vand.u32 2147483647, %v1373_v59  ;;  %v1883_v53 = vmul.f32 %v3489_v35, %v1627_v60  ;;  %v614_v56 = vmul.f32 -2.0, %v4171_v3  ;;  %v4195_v60 = vld [vmem:[#allocation6 + $0x148] sm:$0xff] }
  0x59   :  { %v3158_v34 = vadd.f32 %v3157_v24, %v1876_v13  ;;  %v3491_v44 = vpop.eup %3490  ;;  %v1375_v13 = vsub.f32 %v95_v0, %v4143_v1  ;;  %3502 = vpow2.f32 %v897_v2  ;;  %v901_v21 = vmul.f32 1.442695, %v612_v37  ;;  %v102_v2 = vld [vmem:[#allocation3 + $0x118] sm:$0xff] }
  0x5a   :  { %v3493_v54 = vpop.eup %3492  ;;  %v1630_v24 = vand.u32 2147483647, %v1374_v4  ;;  %v1884_v62 = vmul.f32 %v3491_v44, %v1628_v5  ;;  %v615_v1 = vmul.f32 -2.0, %v4175_v12  ;;  %3504 = vpow2.f32 %v899_v11  ;;  %v4199_v5 = vld [vmem:[#allocation6 + $0x150] sm:$0xff]  ;;  %v103_v11 = vld [vmem:[#allocation3 + $0x120] sm:$0xff] }
  0x5b   :  { %v3159_v43 = vadd.f32 %v3158_v34, %v1877_v17  ;;  %v1376_v17 = vsub.f32 %v96_v9, %v4147_v10  ;;  %v903_v31 = vmul.f32 1.442695, %v613_v47  ;;  %v1631_v34 = vand.u32 2147483647, %v1375_v13 }
  0x5c   :  { %v3495_v63 = vpop.eup %3494  ;;  %v1885_v6 = vmul.f32 %v3493_v54, %v1629_v14  ;;  %v616_v10 = vmul.f32 -2.0, %v4179_v23  ;;  %3506 = vpow2.f32 %v901_v21  ;;  %v905_v41 = vmul.f32 1.442695, %v614_v56  ;;  %v4203_v14 = vld [vmem:[#allocation6 + $0x158] sm:$0xff]  ;;  %v104_v21 = vld [vmem:[#allocation3 + $0x128] sm:$0xff] }
  0x5d   :  { %v3160_v52 = vadd.f32 %v3159_v43, %v1878_v22  ;;  %v1377_v22 = vsub.f32 %v97_v19, %v4151_v20  ;;  %v1632_v43 = vand.u32 2147483647, %v1376_v17  ;;  %v1886_v15 = vmul.f32 %v3495_v63, %v1630_v24  ;;  %v4207_v24 = vld [vmem:[#allocation6 + $0x160] sm:$0xff] }
  0x5e   :  { %v3497_v8 = vpop.eup %3496  ;;  %v617_v20 = vmul.f32 -2.0, %v4183_v33  ;;  %3508 = vpow2.f32 %v903_v31  ;;  %v907_v50 = vmul.f32 1.442695, %v615_v1  ;;  %v909_v59 = vmul.f32 1.442695, %v616_v10  ;;  %v105_v31 = vld [vmem:[#allocation3 + $0x130] sm:$0xff] }
  0x5f   :  { %v3161_v61 = vadd.f32 %v3160_v52, %v1879_v26  ;;  %v1378_v26 = vsub.f32 %v98_v29, %v4155_v30  ;;  %v1633_v52 = vand.u32 2147483647, %v1377_v22  ;;  %v1887_v25 = vmul.f32 %v3497_v8, %v1631_v34  ;;  %v4211_v34 = vld [vmem:[#allocation6 + $0x168] sm:$0xff] }
  0x60   :  { %v3499_v18 = vpop.eup %3498  ;;  %v618_v30 = vmul.f32 -2.0, %v4187_v42  ;;  %3510 = vpow2.f32 %v905_v41  ;;  %v911_v4 = vmul.f32 1.442695, %v617_v20  ;;  %v106_v41 = vld [vmem:[#allocation3 + $0x138] sm:$0xff] }
  0x61   :  { %v3162_v7 = vadd.f32 %v3161_v61, %v1880_v32  ;;  %v1379_v32 = vsub.f32 %v99_v39, %v4159_v40  ;;  %v3501_v28 = vpop.eup %3500  ;;  %v1634_v61 = vand.u32 2147483647, %v1378_v26  ;;  %v1888_v35 = vmul.f32 %v3499_v18, %v1632_v43  ;;  %v4215_v43 = vld [vmem:[#allocation6 + $0x170] sm:$0xff] }
  0x62   :  { %v619_v40 = vmul.f32 -2.0, %v4191_v51  ;;  %3512 = vpow2.f32 %v907_v50  ;;  %v1889_v44 = vmul.f32 %v3501_v28, %v1633_v52  ;;  %v913_v13 = vmul.f32 1.442695, %v618_v30  ;;  %v107_v50 = vld [vmem:[#allocation3 + $0x140] sm:$0xff]  ;;  %v4219_v52 = vld [vmem:[#allocation6 + $0x178] sm:$0xff] }
  0x63   :  { %v3163_v16 = vadd.f32 %v3162_v7, %v1881_v38  ;;  %v1380_v38 = vsub.f32 %v100_v48, %v4163_v49  ;;  %v3503_v37 = vpop.eup %3502  ;;  %v1635_v7 = vand.u32 2147483647, %v1379_v32  ;;  %v620_v49 = vmul.f32 -2.0, %v4195_v60 }
  0x64   :  { %v3505_v47 = vpop.eup %3504  ;;  %3514 = vpow2.f32 %v909_v59  ;;  %v1890_v54 = vmul.f32 %v3503_v37, %v1634_v61  ;;  %v915_v17 = vmul.f32 1.442695, %v619_v40  ;;  %v108_v59 = vld [vmem:[#allocation3 + $0x148] sm:$0xff]  ;;  %v4223_v61 = vld [vmem:[#allocation6 + $0x180] sm:$0xff] }
  0x65   :  { %v3164_v27 = vadd.f32 %v3163_v16, %v1882_v46  ;;  %v1381_v46 = vsub.f32 %v101_v57, %v4167_v58  ;;  %v1636_v16 = vand.u32 2147483647, %v1380_v38  ;;  %v621_v58 = vmul.f32 -2.0, %v4199_v5 }
  0x66   :  { %v3507_v56 = vpop.eup %3506  ;;  %3516 = vpow2.f32 %v911_v4  ;;  %v1891_v63 = vmul.f32 %v3505_v47, %v1635_v7  ;;  %v917_v22 = vmul.f32 1.442695, %v620_v49  ;;  %v109_v4 = vld [vmem:[#allocation3 + $0x150] sm:$0xff]  ;;  %v4227_v7 = vld [vmem:[#allocation6 + $0x188] sm:$0xff] }
  0x67   :  { %v3165_v36 = vadd.f32 %v3164_v27, %v1883_v53  ;;  %v1382_v53 = vsub.f32 %v102_v2, %v4171_v3  ;;  %v1637_v27 = vand.u32 2147483647, %v1381_v46  ;;  %v622_v3 = vmul.f32 -2.0, %v4203_v14 }
  0x68   :  { %v3509_v1 = vpop.eup %3508  ;;  %3518 = vpow2.f32 %v913_v13  ;;  %v1892_v8 = vmul.f32 %v3507_v56, %v1636_v16  ;;  %v919_v26 = vmul.f32 1.442695, %v621_v58  ;;  %v110_v13 = vld [vmem:[#allocation3 + $0x158] sm:$0xff]  ;;  %v4231_v16 = vld [vmem:[#allocation6 + $0x190] sm:$0xff] }
  0x69   :  { %v3166_v45 = vadd.f32 %v3165_v36, %v1884_v62  ;;  %v1383_v62 = vsub.f32 %v103_v11, %v4175_v12  ;;  %v1638_v36 = vand.u32 2147483647, %v1382_v53  ;;  %v623_v12 = vmul.f32 -2.0, %v4207_v24 }
  0x6a   :  { %v3511_v10 = vpop.eup %3510  ;;  %3520 = vpow2.f32 %v915_v17  ;;  %v1893_v18 = vmul.f32 %v3509_v1, %v1637_v27  ;;  %v921_v32 = vmul.f32 1.442695, %v622_v3  ;;  %v111_v17 = vld [vmem:[#allocation3 + $0x160] sm:$0xff]  ;;  %v4235_v27 = vld [vmem:[#allocation6 + $0x198] sm:$0xff] }
  0x6b   :  { %v3167_v55 = vadd.f32 %v3166_v45, %v1885_v6  ;;  %v1384_v6 = vsub.f32 %v104_v21, %v4179_v23  ;;  %v1639_v45 = vand.u32 2147483647, %v1383_v62  ;;  %v624_v23 = vmul.f32 -2.0, %v4211_v34 }
  0x6c   :  { %v3513_v20 = vpop.eup %3512  ;;  %3522 = vpow2.f32 %v917_v22  ;;  %v1894_v28 = vmul.f32 %v3511_v10, %v1638_v36  ;;  %v923_v38 = vmul.f32 1.442695, %v623_v12  ;;  %v112_v22 = vld [vmem:[#allocation3 + $0x168] sm:$0xff]  ;;  %v4239_v36 = vld [vmem:[#allocation6 + $0x1a0] sm:$0xff] }
  0x6d   :  { %v3168_v0 = vadd.f32 %v3167_v55, %v1886_v15  ;;  %v1385_v15 = vsub.f32 %v105_v31, %v4183_v33  ;;  %v1640_v55 = vand.u32 2147483647, %v1384_v6  ;;  %v625_v33 = vmul.f32 -2.0, %v4215_v43 }
  0x6e   :  { %v3515_v30 = vpop.eup %3514  ;;  %3524 = vpow2.f32 %v919_v26  ;;  %v1895_v37 = vmul.f32 %v3513_v20, %v1639_v45  ;;  %v925_v46 = vmul.f32 1.442695, %v624_v23  ;;  %v113_v26 = vld [vmem:[#allocation3 + $0x170] sm:$0xff]  ;;  %v4243_v45 = vld [vmem:[#allocation6 + $0x1a8] sm:$0xff] }
  0x6f   :  { %v3169_v9 = vadd.f32 %v3168_v0, %v1887_v25  ;;  %v1386_v25 = vsub.f32 %v106_v41, %v4187_v42  ;;  %v1641_v0 = vand.u32 2147483647, %v1385_v15  ;;  %v626_v42 = vmul.f32 -2.0, %v4219_v52 }
  0x70   :  { %v3517_v40 = vpop.eup %3516  ;;  %3526 = vpow2.f32 %v921_v32  ;;  %v1896_v47 = vmul.f32 %v3515_v30, %v1640_v55  ;;  %v927_v53 = vmul.f32 1.442695, %v625_v33  ;;  %v114_v32 = vld [vmem:[#allocation3 + $0x178] sm:$0xff]  ;;  %v4247_v55 = vld [vmem:[#allocation6 + $0x1b0] sm:$0xff] }
  0x71   :  { %v3170_v19 = vadd.f32 %v3169_v9, %v1888_v35  ;;  %v1387_v35 = vsub.f32 %v107_v50, %v4191_v51  ;;  %v1642_v9 = vand.u32 2147483647, %v1386_v25  ;;  %v627_v51 = vmul.f32 -2.0, %v4223_v61 }
  0x72   :  { %v3519_v49 = vpop.eup %3518  ;;  %3528 = vpow2.f32 %v923_v38  ;;  %v1897_v56 = vmul.f32 %v3517_v40, %v1641_v0  ;;  %v929_v62 = vmul.f32 1.442695, %v626_v42  ;;  %v115_v38 = vld [vmem:[#allocation3 + $0x180] sm:$0xff]  ;;  %v4251_v0 = vld [vmem:[#allocation6 + $0x1b8] sm:$0xff] }
  0x73   :  { %v3171_v29 = vadd.f32 %v3170_v19, %v1889_v44  ;;  %v1388_v44 = vsub.f32 %v108_v59, %v4195_v60  ;;  %v1643_v19 = vand.u32 2147483647, %v1387_v35  ;;  %v628_v60 = vmul.f32 -2.0, %v4227_v7 }
  0x74   :  { %v3521_v58 = vpop.eup %3520  ;;  %3530 = vpow2.f32 %v925_v46  ;;  %v1898_v1 = vmul.f32 %v3519_v49, %v1642_v9  ;;  %v931_v6 = vmul.f32 1.442695, %v627_v51  ;;  %v116_v46 = vld [vmem:[#allocation3 + $0x188] sm:$0xff]  ;;  %v4255_v9 = vld [vmem:[#allocation6 + $0x1c0] sm:$0xff] }
  0x75   :  { %v3172_v39 = vadd.f32 %v3171_v29, %v1890_v54  ;;  %v1389_v54 = vsub.f32 %v109_v4, %v4199_v5  ;;  %v1644_v29 = vand.u32 2147483647, %v1388_v44  ;;  %v629_v5 = vmul.f32 -2.0, %v4231_v16 }
  0x76   :  { %v3523_v3 = vpop.eup %3522  ;;  %3532 = vpow2.f32 %v927_v53  ;;  %v1899_v10 = vmul.f32 %v3521_v58, %v1643_v19  ;;  %v933_v15 = vmul.f32 1.442695, %v628_v60  ;;  %v117_v53 = vld [vmem:[#allocation3 + $0x190] sm:$0xff]  ;;  %v4259_v19 = vld [vmem:[#allocation6 + $0x1c8] sm:$0xff] }
  0x77   :  { %v3173_v48 = vadd.f32 %v3172_v39, %v1891_v63  ;;  %v1390_v63 = vsub.f32 %v110_v13, %v4203_v14  ;;  %v1645_v39 = vand.u32 2147483647, %v1389_v54  ;;  %v630_v14 = vmul.f32 -2.0, %v4235_v27 }
  0x78   :  { %v3525_v12 = vpop.eup %3524  ;;  %3534 = vpow2.f32 %v929_v62  ;;  %v1900_v20 = vmul.f32 %v3523_v3, %v1644_v29  ;;  %v935_v25 = vmul.f32 1.442695, %v629_v5  ;;  %v118_v62 = vld [vmem:[#allocation3 + $0x198] sm:$0xff]  ;;  %v4263_v29 = vld [vmem:[#allocation6 + $0x1d0] sm:$0xff] }
  0x79   :  { %v3174_v57 = vadd.f32 %v3173_v48, %v1892_v8  ;;  %v1391_v8 = vsub.f32 %v111_v17, %v4207_v24  ;;  %v1646_v48 = vand.u32 2147483647, %v1390_v63  ;;  %v631_v24 = vmul.f32 -2.0, %v4239_v36 }
  0x7a   :  { %v3527_v23 = vpop.eup %3526  ;;  %3536 = vpow2.f32 %v931_v6  ;;  %v1901_v30 = vmul.f32 %v3525_v12, %v1645_v39  ;;  %v937_v35 = vmul.f32 1.442695, %v630_v14  ;;  %v119_v6 = vld [vmem:[#allocation3 + $0x1a0] sm:$0xff]  ;;  %v4267_v39 = vld [vmem:[#allocation6 + $0x1d8] sm:$0xff] }
  0x7b   :  { %v3175_v2 = vadd.f32 %v3174_v57, %v1893_v18  ;;  %v1392_v18 = vsub.f32 %v112_v22, %v4211_v34  ;;  %v1647_v57 = vand.u32 2147483647, %v1391_v8  ;;  %v632_v34 = vmul.f32 -2.0, %v4243_v45 }
  0x7c   :  { %v3529_v33 = vpop.eup %3528  ;;  %3538 = vpow2.f32 %v933_v15  ;;  %v1902_v40 = vmul.f32 %v3527_v23, %v1646_v48  ;;  %v939_v44 = vmul.f32 1.442695, %v631_v24  ;;  %v120_v15 = vld [vmem:[#allocation3 + $0x1a8] sm:$0xff]  ;;  %v4271_v48 = vld [vmem:[#allocation6 + $0x1e0] sm:$0xff] }
  0x7d   :  { %v3176_v11 = vadd.f32 %v3175_v2, %v1894_v28  ;;  %v1393_v28 = vsub.f32 %v113_v26, %v4215_v43  ;;  %v1648_v2 = vand.u32 2147483647, %v1392_v18  ;;  %v633_v43 = vmul.f32 -2.0, %v4247_v55 }
  0x7e   :  { %v3531_v42 = vpop.eup %3530  ;;  %3540 = vpow2.f32 %v935_v25  ;;  %v1903_v49 = vmul.f32 %v3529_v33, %v1647_v57  ;;  %v941_v54 = vmul.f32 1.442695, %v632_v34  ;;  %v121_v25 = vld [vmem:[#allocation3 + $0x1b0] sm:$0xff]  ;;  %v4275_v57 = vld [vmem:[#allocation6 + $0x1e8] sm:$0xff] }
  0x7f   :  { %v3177_v21 = vadd.f32 %v3176_v11, %v1895_v37  ;;  %v1394_v37 = vsub.f32 %v114_v32, %v4219_v52  ;;  %v1649_v11 = vand.u32 2147483647, %v1393_v28  ;;  %v634_v52 = vmul.f32 -2.0, %v4251_v0 }
  0x80   :  { %v3533_v51 = vpop.eup %3532  ;;  %3542 = vpow2.f32 %v937_v35  ;;  %v1904_v58 = vmul.f32 %v3531_v42, %v1648_v2  ;;  %v943_v63 = vmul.f32 1.442695, %v633_v43  ;;  %v122_v35 = vld [vmem:[#allocation3 + $0x1b8] sm:$0xff]  ;;  %v4279_v2 = vld [vmem:[#allocation6 + $0x1f0] sm:$0xff] }
  0x81   :  { %v3178_v31 = vadd.f32 %v3177_v21, %v1896_v47  ;;  %v1395_v47 = vsub.f32 %v115_v38, %v4223_v61  ;;  %v1650_v21 = vand.u32 2147483647, %v1394_v37  ;;  %v635_v61 = vmul.f32 -2.0, %v4255_v9 }
  0x82   :  { %v3535_v60 = vpop.eup %3534  ;;  %3544 = vpow2.f32 %v939_v44  ;;  %v1905_v3 = vmul.f32 %v3533_v51, %v1649_v11  ;;  %v945_v8 = vmul.f32 1.442695, %v634_v52  ;;  %v123_v44 = vld [vmem:[#allocation3 + $0x1c0] sm:$0xff]  ;;  %v4283_v11 = vld [vmem:[#allocation6 + $0x1f8] sm:$0xff] }
  0x83   :  { %v3179_v41 = vadd.f32 %v3178_v31, %v1897_v56  ;;  %v1396_v56 = vsub.f32 %v116_v46, %v4227_v7  ;;  %v1651_v31 = vand.u32 2147483647, %v1395_v47  ;;  %v636_v7 = vmul.f32 -2.0, %v4259_v19 }
  0x84   :  { %v3537_v5 = vpop.eup %3536  ;;  %3546 = vpow2.f32 %v941_v54  ;;  %v1906_v12 = vmul.f32 %v3535_v60, %v1650_v21  ;;  %v947_v18 = vmul.f32 1.442695, %v635_v61  ;;  %v124_v54 = vld [vmem:[#allocation3 + $0x1c8] sm:$0xff]  ;;  %v4287_v21 = vld [vmem:[#allocation6 + $0x200] sm:$0xff] }
  0x85   :  { %v3180_v50 = vadd.f32 %v3179_v41, %v1898_v1  ;;  %v1397_v1 = vsub.f32 %v117_v53, %v4231_v16  ;;  %v1652_v41 = vand.u32 2147483647, %v1396_v56  ;;  %v637_v16 = vmul.f32 -2.0, %v4263_v29 }
  0x86   :  { %v3539_v14 = vpop.eup %3538  ;;  %3548 = vpow2.f32 %v943_v63  ;;  %v1907_v23 = vmul.f32 %v3537_v5, %v1651_v31  ;;  %v949_v28 = vmul.f32 1.442695, %v636_v7  ;;  %v125_v63 = vld [vmem:[#allocation3 + $0x1d0] sm:$0xff]  ;;  %v4291_v31 = vld [vmem:[#allocation6 + $0x208] sm:$0xff] }
  0x87   :  { %v3181_v59 = vadd.f32 %v3180_v50, %v1899_v10  ;;  %v1398_v10 = vsub.f32 %v118_v62, %v4235_v27  ;;  %v1653_v50 = vand.u32 2147483647, %v1397_v1  ;;  %v638_v27 = vmul.f32 -2.0, %v4267_v39 }
  0x88   :  { %v3541_v24 = vpop.eup %3540  ;;  %3550 = vpow2.f32 %v945_v8  ;;  %v1908_v33 = vmul.f32 %v3539_v14, %v1652_v41  ;;  %v951_v37 = vmul.f32 1.442695, %v637_v16  ;;  %v126_v8 = vld [vmem:[#allocation3 + $0x1d8] sm:$0xff]  ;;  %v4295_v41 = vld [vmem:[#allocation6 + $0x210] sm:$0xff] }
  0x89   :  { %v3182_v4 = vadd.f32 %v3181_v59, %v1900_v20  ;;  %v1399_v20 = vsub.f32 %v119_v6, %v4239_v36  ;;  %v1654_v59 = vand.u32 2147483647, %v1398_v10  ;;  %v639_v36 = vmul.f32 -2.0, %v4271_v48 }
  0x8a   :  { %v3543_v34 = vpop.eup %3542  ;;  %3552 = vpow2.f32 %v947_v18  ;;  %v1909_v42 = vmul.f32 %v3541_v24, %v1653_v50  ;;  %v953_v47 = vmul.f32 1.442695, %v638_v27  ;;  %v127_v18 = vld [vmem:[#allocation3 + $0x1e0] sm:$0xff]  ;;  %v4299_v50 = vld [vmem:[#allocation6 + $0x218] sm:$0xff] }
  0x8b   :  { %v3183_v13 = vadd.f32 %v3182_v4, %v1901_v30  ;;  %v1400_v30 = vsub.f32 %v120_v15, %v4243_v45  ;;  %v1655_v4 = vand.u32 2147483647, %v1399_v20  ;;  %v640_v45 = vmul.f32 -2.0, %v4275_v57 }
  0x8c   :  { %v3545_v43 = vpop.eup %3544  ;;  %3554 = vpow2.f32 %v949_v28  ;;  %v1910_v51 = vmul.f32 %v3543_v34, %v1654_v59  ;;  %v955_v56 = vmul.f32 1.442695, %v639_v36  ;;  %v128_v28 = vld [vmem:[#allocation3 + $0x1e8] sm:$0xff]  ;;  %v4303_v59 = vld [vmem:[#allocation6 + $0x220] sm:$0xff] }
  0x8d   :  { %v3184_v17 = vadd.f32 %v3183_v13, %v1902_v40  ;;  %v1401_v40 = vsub.f32 %v121_v25, %v4247_v55  ;;  %v1656_v13 = vand.u32 2147483647, %v1400_v30  ;;  %v641_v55 = vmul.f32 -2.0, %v4279_v2 }
  0x8e   :  { %v3547_v52 = vpop.eup %3546  ;;  %3556 = vpow2.f32 %v951_v37  ;;  %v1911_v60 = vmul.f32 %v3545_v43, %v1655_v4  ;;  %v957_v1 = vmul.f32 1.442695, %v640_v45  ;;  %v129_v37 = vld [vmem:[#allocation3 + $0x1f0] sm:$0xff]  ;;  %v4307_v4 = vld [vmem:[#allocation6 + $0x228] sm:$0xff] }
  0x8f   :  { %v3185_v22 = vadd.f32 %v3184_v17, %v1903_v49  ;;  %v1402_v49 = vsub.f32 %v122_v35, %v4251_v0  ;;  %v1657_v17 = vand.u32 2147483647, %v1401_v40  ;;  %v642_v0 = vmul.f32 -2.0, %v4283_v11 }
  0x90   :  { %v3549_v61 = vpop.eup %3548  ;;  %3558 = vpow2.f32 %v953_v47  ;;  %v1912_v5 = vmul.f32 %v3547_v52, %v1656_v13  ;;  %v959_v10 = vmul.f32 1.442695, %v641_v55  ;;  %v130_v47 = vld [vmem:[#allocation3 + $0x1f8] sm:$0xff]  ;;  %v4311_v13 = vld [vmem:[#allocation6 + $0x230] sm:$0xff] }
  0x91   :  { %v3186_v26 = vadd.f32 %v3185_v22, %v1904_v58  ;;  %v1403_v58 = vsub.f32 %v123_v44, %v4255_v9  ;;  %v1658_v22 = vand.u32 2147483647, %v1402_v49  ;;  %v643_v9 = vmul.f32 -2.0, %v4287_v21 }
  0x92   :  { %v3551_v7 = vpop.eup %3550  ;;  %3560 = vpow2.f32 %v955_v56  ;;  %v1913_v14 = vmul.f32 %v3549_v61, %v1657_v17  ;;  %v961_v20 = vmul.f32 1.442695, %v642_v0  ;;  %v131_v56 = vld [vmem:[#allocation3 + $0x200] sm:$0xff]  ;;  %v4315_v17 = vld [vmem:[#allocation6 + $0x238] sm:$0xff] }
  0x93   :  { %v3187_v32 = vadd.f32 %v3186_v26, %v1905_v3  ;;  %v1404_v3 = vsub.f32 %v124_v54, %v4259_v19  ;;  %v1659_v26 = vand.u32 2147483647, %v1403_v58  ;;  %v644_v19 = vmul.f32 -2.0, %v4291_v31 }
  0x94   :  { %v3553_v16 = vpop.eup %3552  ;;  %3562 = vpow2.f32 %v957_v1  ;;  %v1914_v24 = vmul.f32 %v3551_v7, %v1658_v22  ;;  %v963_v30 = vmul.f32 1.442695, %v643_v9  ;;  %v132_v1 = vld [vmem:[#allocation3 + $0x208] sm:$0xff]  ;;  %v4319_v22 = vld [vmem:[#allocation6 + $0x240] sm:$0xff] }
  0x95   :  { %v3188_v38 = vadd.f32 %v3187_v32, %v1906_v12  ;;  %v1405_v12 = vsub.f32 %v125_v63, %v4263_v29  ;;  %v1660_v32 = vand.u32 2147483647, %v1404_v3  ;;  %v645_v29 = vmul.f32 -2.0, %v4295_v41 }
  0x96   :  { %v3555_v27 = vpop.eup %3554  ;;  %3564 = vpow2.f32 %v959_v10  ;;  %v1915_v34 = vmul.f32 %v3553_v16, %v1659_v26  ;;  %v965_v40 = vmul.f32 1.442695, %v644_v19  ;;  %v133_v10 = vld [vmem:[#allocation3 + $0x210] sm:$0xff]  ;;  %v4323_v26 = vld [vmem:[#allocation6 + $0x248] sm:$0xff] }
  0x97   :  { %v3189_v46 = vadd.f32 %v3188_v38, %v1907_v23  ;;  %v1406_v23 = vsub.f32 %v126_v8, %v4267_v39  ;;  %v1661_v38 = vand.u32 2147483647, %v1405_v12  ;;  %v646_v39 = vmul.f32 -2.0, %v4299_v50 }
  0x98   :  { %v3557_v36 = vpop.eup %3556  ;;  %3566 = vpow2.f32 %v961_v20  ;;  %v1916_v43 = vmul.f32 %v3555_v27, %v1660_v32  ;;  %v967_v49 = vmul.f32 1.442695, %v645_v29  ;;  %v134_v20 = vld [vmem:[#allocation3 + $0x218] sm:$0xff]  ;;  %v4327_v32 = vld [vmem:[#allocation6 + $0x250] sm:$0xff] }
  0x99   :  { %v3190_v53 = vadd.f32 %v3189_v46, %v1908_v33  ;;  %v1407_v33 = vsub.f32 %v127_v18, %v4271_v48  ;;  %v1662_v46 = vand.u32 2147483647, %v1406_v23  ;;  %v647_v48 = vmul.f32 -2.0, %v4303_v59 }
  0x9a   :  { %v3559_v45 = vpop.eup %3558  ;;  %3568 = vpow2.f32 %v963_v30  ;;  %v1917_v52 = vmul.f32 %v3557_v36, %v1661_v38  ;;  %v969_v58 = vmul.f32 1.442695, %v646_v39  ;;  %v135_v30 = vld [vmem:[#allocation3 + $0x220] sm:$0xff]  ;;  %v4331_v38 = vld [vmem:[#allocation6 + $0x258] sm:$0xff] }
  0x9b   :  { %v3191_v62 = vadd.f32 %v3190_v53, %v1909_v42  ;;  %v1408_v42 = vsub.f32 %v128_v28, %v4275_v57  ;;  %v1663_v53 = vand.u32 2147483647, %v1407_v33  ;;  %v648_v57 = vmul.f32 -2.0, %v4307_v4 }
  0x9c   :  { %v3561_v55 = vpop.eup %3560  ;;  %3570 = vpow2.f32 %v965_v40  ;;  %v1918_v61 = vmul.f32 %v3559_v45, %v1662_v46  ;;  %v971_v3 = vmul.f32 1.442695, %v647_v48  ;;  %v136_v40 = vld [vmem:[#allocation3 + $0x228] sm:$0xff]  ;;  %v4335_v46 = vld [vmem:[#allocation6 + $0x260] sm:$0xff] }
  0x9d   :  { %v3192_v6 = vadd.f32 %v3191_v62, %v1910_v51  ;;  %v1409_v51 = vsub.f32 %v129_v37, %v4279_v2  ;;  %v1664_v62 = vand.u32 2147483647, %v1408_v42  ;;  %v649_v2 = vmul.f32 -2.0, %v4311_v13 }
  0x9e   :  { %v3563_v0 = vpop.eup %3562  ;;  %3572 = vpow2.f32 %v967_v49  ;;  %v1919_v7 = vmul.f32 %v3561_v55, %v1663_v53  ;;  %v973_v12 = vmul.f32 1.442695, %v648_v57  ;;  %v137_v49 = vld [vmem:[#allocation3 + $0x230] sm:$0xff]  ;;  %v4339_v53 = vld [vmem:[#allocation6 + $0x268] sm:$0xff] }
  0x9f   :  { %v3193_v15 = vadd.f32 %v3192_v6, %v1911_v60  ;;  %v1410_v60 = vsub.f32 %v130_v47, %v4283_v11  ;;  %v1665_v6 = vand.u32 2147483647, %v1409_v51  ;;  %v650_v11 = vmul.f32 -2.0, %v4315_v17 }
  0xa0   :  { %v3565_v9 = vpop.eup %3564  ;;  %3574 = vpow2.f32 %v969_v58  ;;  %v1920_v16 = vmul.f32 %v3563_v0, %v1664_v62  ;;  %v975_v23 = vmul.f32 1.442695, %v649_v2  ;;  %v138_v58 = vld [vmem:[#allocation3 + $0x238] sm:$0xff]  ;;  %v4343_v62 = vld [vmem:[#allocation6 + $0x270] sm:$0xff] }
  0xa1   :  { %v3194_v25 = vadd.f32 %v3193_v15, %v1912_v5  ;;  %v1411_v5 = vsub.f32 %v131_v56, %v4287_v21  ;;  %v1666_v15 = vand.u32 2147483647, %v1410_v60  ;;  %v651_v21 = vmul.f32 -2.0, %v4319_v22 }
  0xa2   :  { %v3567_v19 = vpop.eup %3566  ;;  %3576 = vpow2.f32 %v971_v3  ;;  %v1921_v27 = vmul.f32 %v3565_v9, %v1665_v6  ;;  %v977_v33 = vmul.f32 1.442695, %v650_v11  ;;  %v139_v3 = vld [vmem:[#allocation3 + $0x240] sm:$0xff]  ;;  %v4347_v6 = vld [vmem:[#allocation6 + $0x278] sm:$0xff] }
  0xa3   :  { %v3195_v35 = vadd.f32 %v3194_v25, %v1913_v14  ;;  %v1412_v14 = vsub.f32 %v132_v1, %v4291_v31  ;;  %v1667_v25 = vand.u32 2147483647, %v1411_v5  ;;  %v652_v31 = vmul.f32 -2.0, %v4323_v26 }
  0xa4   :  { %v3569_v29 = vpop.eup %3568  ;;  %3578 = vpow2.f32 %v973_v12  ;;  %v1922_v36 = vmul.f32 %v3567_v19, %v1666_v15  ;;  %v979_v42 = vmul.f32 1.442695, %v651_v21  ;;  %v140_v12 = vld [vmem:[#allocation3 + $0x248] sm:$0xff]  ;;  %v4351_v15 = vld [vmem:[#allocation6 + $0x280] sm:$0xff] }
  0xa5   :  { %v3196_v44 = vadd.f32 %v3195_v35, %v1914_v24  ;;  %v1413_v24 = vsub.f32 %v133_v10, %v4295_v41  ;;  %v1668_v35 = vand.u32 2147483647, %v1412_v14  ;;  %v653_v41 = vmul.f32 -2.0, %v4327_v32 }
  0xa6   :  { %v3571_v39 = vpop.eup %3570  ;;  %3580 = vpow2.f32 %v975_v23  ;;  %v1923_v45 = vmul.f32 %v3569_v29, %v1667_v25  ;;  %v981_v51 = vmul.f32 1.442695, %v652_v31  ;;  %v141_v23 = vld [vmem:[#allocation3 + $0x250] sm:$0xff]  ;;  %v4355_v25 = vld [vmem:[#allocation6 + $0x288] sm:$0xff] }
  0xa7   :  { %v3197_v54 = vadd.f32 %v3196_v44, %v1915_v34  ;;  %v1414_v34 = vsub.f32 %v134_v20, %v4299_v50  ;;  %v1669_v44 = vand.u32 2147483647, %v1413_v24  ;;  %v654_v50 = vmul.f32 -2.0, %v4331_v38 }
  0xa8   :  { %v3573_v48 = vpop.eup %3572  ;;  %3582 = vpow2.f32 %v977_v33  ;;  %v1924_v55 = vmul.f32 %v3571_v39, %v1668_v35  ;;  %v983_v60 = vmul.f32 1.442695, %v653_v41  ;;  %v142_v33 = vld [vmem:[#allocation3 + $0x258] sm:$0xff]  ;;  %v4359_v35 = vld [vmem:[#allocation6 + $0x290] sm:$0xff] }
  0xa9   :  { %v3198_v63 = vadd.f32 %v3197_v54, %v1916_v43  ;;  %v1415_v43 = vsub.f32 %v135_v30, %v4303_v59  ;;  %v1670_v54 = vand.u32 2147483647, %v1414_v34  ;;  %v655_v59 = vmul.f32 -2.0, %v4335_v46 }
  0xaa   :  { %v3575_v57 = vpop.eup %3574  ;;  %3584 = vpow2.f32 %v979_v42  ;;  %v1925_v0 = vmul.f32 %v3573_v48, %v1669_v44  ;;  %v985_v5 = vmul.f32 1.442695, %v654_v50  ;;  %v143_v42 = vld [vmem:[#allocation3 + $0x260] sm:$0xff]  ;;  %v4363_v44 = vld [vmem:[#allocation6 + $0x298] sm:$0xff] }
  0xab   :  { %v3199_v8 = vadd.f32 %v3198_v63, %v1917_v52  ;;  %v1416_v52 = vsub.f32 %v136_v40, %v4307_v4  ;;  %v1671_v63 = vand.u32 2147483647, %v1415_v43  ;;  %v656_v4 = vmul.f32 -2.0, %v4339_v53 }
  0xac   :  { %v3577_v2 = vpop.eup %3576  ;;  %3586 = vpow2.f32 %v981_v51  ;;  %v1926_v9 = vmul.f32 %v3575_v57, %v1670_v54  ;;  %v987_v14 = vmul.f32 1.442695, %v655_v59  ;;  %v144_v51 = vld [vmem:[#allocation3 + $0x268] sm:$0xff]  ;;  %v4367_v54 = vld [vmem:[#allocation6 + $0x2a0] sm:$0xff] }
  0xad   :  { %v3200_v18 = vadd.f32 %v3199_v8, %v1918_v61  ;;  %v1417_v61 = vsub.f32 %v137_v49, %v4311_v13  ;;  %v1672_v8 = vand.u32 2147483647, %v1416_v52  ;;  %v657_v13 = vmul.f32 -2.0, %v4343_v62 }
  0xae   :  { %v3579_v11 = vpop.eup %3578  ;;  %3588 = vpow2.f32 %v983_v60  ;;  %v1927_v19 = vmul.f32 %v3577_v2, %v1671_v63  ;;  %v989_v24 = vmul.f32 1.442695, %v656_v4  ;;  %v145_v60 = vld [vmem:[#allocation3 + $0x270] sm:$0xff]  ;;  %v4371_v63 = vld [vmem:[#allocation6 + $0x2a8] sm:$0xff] }
  0xaf   :  { %v3201_v28 = vadd.f32 %v3200_v18, %v1919_v7  ;;  %v1418_v7 = vsub.f32 %v138_v58, %v4315_v17  ;;  %v1673_v18 = vand.u32 2147483647, %v1417_v61  ;;  %v658_v17 = vmul.f32 -2.0, %v4347_v6 }
  0xb0   :  { %v3581_v21 = vpop.eup %3580  ;;  %3590 = vpow2.f32 %v985_v5  ;;  %v1928_v29 = vmul.f32 %v3579_v11, %v1672_v8  ;;  %v991_v34 = vmul.f32 1.442695, %v657_v13  ;;  %v146_v5 = vld [vmem:[#allocation3 + $0x278] sm:$0xff]  ;;  %v4375_v8 = vld [vmem:[#allocation6 + $0x2b0] sm:$0xff] }
  0xb1   :  { %v3202_v37 = vadd.f32 %v3201_v28, %v1920_v16  ;;  %v1419_v16 = vsub.f32 %v139_v3, %v4319_v22  ;;  %v1674_v28 = vand.u32 2147483647, %v1418_v7  ;;  %v659_v22 = vmul.f32 -2.0, %v4351_v15 }
  0xb2   :  { %v3583_v31 = vpop.eup %3582  ;;  %3592 = vpow2.f32 %v987_v14  ;;  %v1929_v39 = vmul.f32 %v3581_v21, %v1673_v18  ;;  %v993_v43 = vmul.f32 1.442695, %v658_v17  ;;  %v147_v14 = vld [vmem:[#allocation3 + $0x280] sm:$0xff]  ;;  %v4379_v18 = vld [vmem:[#allocation6 + $0x2b8] sm:$0xff] }
  0xb3   :  { %v3203_v47 = vadd.f32 %v3202_v37, %v1921_v27  ;;  %v1420_v27 = vsub.f32 %v140_v12, %v4323_v26  ;;  %v1675_v37 = vand.u32 2147483647, %v1419_v16  ;;  %v660_v26 = vmul.f32 -2.0, %v4355_v25 }
  0xb4   :  { %v3585_v41 = vpop.eup %3584  ;;  %3594 = vpow2.f32 %v989_v24  ;;  %v1930_v48 = vmul.f32 %v3583_v31, %v1674_v28  ;;  %v995_v52 = vmul.f32 1.442695, %v659_v22  ;;  %v148_v24 = vld [vmem:[#allocation3 + $0x288] sm:$0xff]  ;;  %v4383_v28 = vld [vmem:[#allocation6 + $0x2c0] sm:$0xff] }
  0xb5   :  { %v3204_v56 = vadd.f32 %v3203_v47, %v1922_v36  ;;  %v1421_v36 = vsub.f32 %v141_v23, %v4327_v32  ;;  %v1676_v47 = vand.u32 2147483647, %v1420_v27  ;;  %v661_v32 = vmul.f32 -2.0, %v4359_v35 }
  0xb6   :  { %v3587_v50 = vpop.eup %3586  ;;  %3596 = vpow2.f32 %v991_v34  ;;  %v1931_v57 = vmul.f32 %v3585_v41, %v1675_v37  ;;  %v997_v61 = vmul.f32 1.442695, %v660_v26  ;;  %v149_v34 = vld [vmem:[#allocation3 + $0x290] sm:$0xff]  ;;  %v4387_v37 = vld [vmem:[#allocation6 + $0x2c8] sm:$0xff] }
  0xb7   :  { %v3205_v1 = vadd.f32 %v3204_v56, %v1923_v45  ;;  %v1422_v45 = vsub.f32 %v142_v33, %v4331_v38  ;;  %v1677_v56 = vand.u32 2147483647, %v1421_v36  ;;  %v662_v38 = vmul.f32 -2.0, %v4363_v44 }
  0xb8   :  { %v3589_v59 = vpop.eup %3588  ;;  %3598 = vpow2.f32 %v993_v43  ;;  %v1932_v2 = vmul.f32 %v3587_v50, %v1676_v47  ;;  %v999_v7 = vmul.f32 1.442695, %v661_v32  ;;  %v150_v43 = vld [vmem:[#allocation3 + $0x298] sm:$0xff]  ;;  %v4391_v47 = vld [vmem:[#allocation6 + $0x2d0] sm:$0xff] }
  0xb9   :  { %v3206_v10 = vadd.f32 %v3205_v1, %v1924_v55  ;;  %v1423_v55 = vsub.f32 %v143_v42, %v4335_v46  ;;  %v1678_v1 = vand.u32 2147483647, %v1422_v45  ;;  %v663_v46 = vmul.f32 -2.0, %v4367_v54 }
  0xba   :  { %v3591_v4 = vpop.eup %3590  ;;  %3600 = vpow2.f32 %v995_v52  ;;  %v1933_v11 = vmul.f32 %v3589_v59, %v1677_v56  ;;  %v1001_v16 = vmul.f32 1.442695, %v662_v38  ;;  %v151_v52 = vld [vmem:[#allocation3 + $0x2a0] sm:$0xff]  ;;  %v4395_v56 = vld [vmem:[#allocation6 + $0x2d8] sm:$0xff] }
  0xbb   :  { %v3207_v20 = vadd.f32 %v3206_v10, %v1925_v0  ;;  %v1424_v0 = vsub.f32 %v144_v51, %v4339_v53  ;;  %v1679_v10 = vand.u32 2147483647, %v1423_v55  ;;  %v664_v53 = vmul.f32 -2.0, %v4371_v63 }
  0xbc   :  { %v3593_v13 = vpop.eup %3592  ;;  %3602 = vpow2.f32 %v997_v61  ;;  %v1934_v21 = vmul.f32 %v3591_v4, %v1678_v1  ;;  %v1003_v27 = vmul.f32 1.442695, %v663_v46  ;;  %v152_v61 = vld [vmem:[#allocation3 + $0x2a8] sm:$0xff]  ;;  %v4399_v1 = vld [vmem:[#allocation6 + $0x2e0] sm:$0xff] }
  0xbd   :  { %v3208_v30 = vadd.f32 %v3207_v20, %v1926_v9  ;;  %v1425_v9 = vsub.f32 %v145_v60, %v4343_v62  ;;  %v1680_v20 = vand.u32 2147483647, %v1424_v0  ;;  %v665_v62 = vmul.f32 -2.0, %v4375_v8 }
  0xbe   :  { %v3595_v17 = vpop.eup %3594  ;;  %3604 = vpow2.f32 %v999_v7  ;;  %v1935_v31 = vmul.f32 %v3593_v13, %v1679_v10  ;;  %v1005_v36 = vmul.f32 1.442695, %v664_v53  ;;  %v153_v7 = vld [vmem:[#allocation3 + $0x2b0] sm:$0xff]  ;;  %v4403_v10 = vld [vmem:[#allocation6 + $0x2e8] sm:$0xff] }
  0xbf   :  { %v3209_v40 = vadd.f32 %v3208_v30, %v1927_v19  ;;  %v1426_v19 = vsub.f32 %v146_v5, %v4347_v6  ;;  %v1681_v30 = vand.u32 2147483647, %v1425_v9  ;;  %v666_v6 = vmul.f32 -2.0, %v4379_v18 }
  0xc0   :  { %v3597_v22 = vpop.eup %3596  ;;  %3606 = vpow2.f32 %v1001_v16  ;;  %v1936_v41 = vmul.f32 %v3595_v17, %v1680_v20  ;;  %v1007_v45 = vmul.f32 1.442695, %v665_v62  ;;  %v154_v16 = vld [vmem:[#allocation3 + $0x2b8] sm:$0xff]  ;;  %v4407_v20 = vld [vmem:[#allocation6 + $0x2f0] sm:$0xff] }
  0xc1   :  { %v3210_v49 = vadd.f32 %v3209_v40, %v1928_v29  ;;  %v1427_v29 = vsub.f32 %v147_v14, %v4351_v15  ;;  %v1682_v40 = vand.u32 2147483647, %v1426_v19  ;;  %v667_v15 = vmul.f32 -2.0, %v4383_v28 }
  0xc2   :  { %v3599_v26 = vpop.eup %3598  ;;  %3608 = vpow2.f32 %v1003_v27  ;;  %v1937_v50 = vmul.f32 %v3597_v22, %v1681_v30  ;;  %v1009_v55 = vmul.f32 1.442695, %v666_v6  ;;  %v155_v27 = vld [vmem:[#allocation3 + $0x2c0] sm:$0xff]  ;;  %v4411_v30 = vld [vmem:[#allocation6 + $0x2f8] sm:$0xff] }
  0xc3   :  { %v3211_v58 = vadd.f32 %v3210_v49, %v1929_v39  ;;  %v1428_v39 = vsub.f32 %v148_v24, %v4355_v25  ;;  %v1683_v49 = vand.u32 2147483647, %v1427_v29  ;;  %v668_v25 = vmul.f32 -2.0, %v4387_v37 }
  0xc4   :  { %v3601_v32 = vpop.eup %3600  ;;  %3610 = vpow2.f32 %v1005_v36  ;;  %v1938_v59 = vmul.f32 %v3599_v26, %v1682_v40  ;;  %v1011_v0 = vmul.f32 1.442695, %v667_v15  ;;  %v156_v36 = vld [vmem:[#allocation3 + $0x2c8] sm:$0xff]  ;;  %v4415_v40 = vld [vmem:[#allocation6 + $0x300] sm:$0xff] }
  0xc5   :  { %v3212_v3 = vadd.f32 %v3211_v58, %v1930_v48  ;;  %v1429_v48 = vsub.f32 %v149_v34, %v4359_v35  ;;  %v1684_v58 = vand.u32 2147483647, %v1428_v39  ;;  %v669_v35 = vmul.f32 -2.0, %v4391_v47 }
  0xc6   :  { %v3603_v38 = vpop.eup %3602  ;;  %3612 = vpow2.f32 %v1007_v45  ;;  %v1939_v4 = vmul.f32 %v3601_v32, %v1683_v49  ;;  %v1013_v9 = vmul.f32 1.442695, %v668_v25  ;;  %v157_v45 = vld [vmem:[#allocation3 + $0x2d0] sm:$0xff]  ;;  %v4419_v49 = vld [vmem:[#allocation6 + $0x308] sm:$0xff] }
  0xc7   :  { %v3213_v12 = vadd.f32 %v3212_v3, %v1931_v57  ;;  %v1430_v57 = vsub.f32 %v150_v43, %v4363_v44  ;;  %v1685_v3 = vand.u32 2147483647, %v1429_v48  ;;  %v670_v44 = vmul.f32 -2.0, %v4395_v56 }
  0xc8   :  { %v3605_v46 = vpop.eup %3604  ;;  %3614 = vpow2.f32 %v1009_v55  ;;  %v1940_v13 = vmul.f32 %v3603_v38, %v1684_v58  ;;  %v1015_v19 = vmul.f32 1.442695, %v669_v35  ;;  %v158_v55 = vld [vmem:[#allocation3 + $0x2d8] sm:$0xff]  ;;  %v4423_v58 = vld [vmem:[#allocation6 + $0x310] sm:$0xff] }
  0xc9   :  { %v3214_v23 = vadd.f32 %v3213_v12, %v1932_v2  ;;  %v1431_v2 = vsub.f32 %v151_v52, %v4367_v54  ;;  %v1686_v12 = vand.u32 2147483647, %v1430_v57  ;;  %v671_v54 = vmul.f32 -2.0, %v4399_v1 }
  0xca   :  { %v3607_v53 = vpop.eup %3606  ;;  %3616 = vpow2.f32 %v1011_v0  ;;  %v1941_v17 = vmul.f32 %v3605_v46, %v1685_v3  ;;  %v1017_v29 = vmul.f32 1.442695, %v670_v44  ;;  %v159_v0 = vld [vmem:[#allocation3 + $0x2e0] sm:$0xff]  ;;  %v4427_v3 = vld [vmem:[#allocation6 + $0x318] sm:$0xff] }
  0xcb   :  { %v3215_v33 = vadd.f32 %v3214_v23, %v1933_v11  ;;  %v1432_v11 = vsub.f32 %v152_v61, %v4371_v63  ;;  %v1687_v23 = vand.u32 2147483647, %v1431_v2  ;;  %v672_v63 = vmul.f32 -2.0, %v4403_v10 }
  0xcc   :  { %v3609_v62 = vpop.eup %3608  ;;  %3618 = vpow2.f32 %v1013_v9  ;;  %v1942_v22 = vmul.f32 %v3607_v53, %v1686_v12  ;;  %v1019_v39 = vmul.f32 1.442695, %v671_v54  ;;  %v160_v9 = vld [vmem:[#allocation3 + $0x2e8] sm:$0xff]  ;;  %v4431_v12 = vld [vmem:[#allocation6 + $0x320] sm:$0xff] }
  0xcd   :  { %v3216_v42 = vadd.f32 %v3215_v33, %v1934_v21  ;;  %v1433_v21 = vsub.f32 %v153_v7, %v4375_v8  ;;  %v1688_v33 = vand.u32 2147483647, %v1432_v11  ;;  %v673_v8 = vmul.f32 -2.0, %v4407_v20 }
  0xce   :  { %v3611_v6 = vpop.eup %3610  ;;  %3620 = vpow2.f32 %v1015_v19  ;;  %v1943_v26 = vmul.f32 %v3609_v62, %v1687_v23  ;;  %v1021_v48 = vmul.f32 1.442695, %v672_v63  ;;  %v161_v19 = vld [vmem:[#allocation3 + $0x2f0] sm:$0xff]  ;;  %v4435_v23 = vld [vmem:[#allocation6 + $0x328] sm:$0xff] }
  0xcf   :  { %v3217_v51 = vadd.f32 %v3216_v42, %v1935_v31  ;;  %v1434_v31 = vsub.f32 %v154_v16, %v4379_v18  ;;  %v1689_v42 = vand.u32 2147483647, %v1433_v21  ;;  %v674_v18 = vmul.f32 -2.0, %v4411_v30 }
  0xd0   :  { %v3613_v15 = vpop.eup %3612  ;;  %3622 = vpow2.f32 %v1017_v29  ;;  %v1944_v32 = vmul.f32 %v3611_v6, %v1688_v33  ;;  %v1023_v57 = vmul.f32 1.442695, %v673_v8  ;;  %v162_v29 = vld [vmem:[#allocation3 + $0x2f8] sm:$0xff]  ;;  %v4439_v33 = vld [vmem:[#allocation6 + $0x330] sm:$0xff] }
  0xd1   :  { %v3218_v60 = vadd.f32 %v3217_v51, %v1936_v41  ;;  %v1435_v41 = vsub.f32 %v155_v27, %v4383_v28  ;;  %v1690_v51 = vand.u32 2147483647, %v1434_v31  ;;  %v675_v28 = vmul.f32 -2.0, %v4415_v40 }
  0xd2   :  { %v3615_v25 = vpop.eup %3614  ;;  %3624 = vpow2.f32 %v1019_v39  ;;  %v1945_v38 = vmul.f32 %v3613_v15, %v1689_v42  ;;  %v1025_v2 = vmul.f32 1.442695, %v674_v18  ;;  %v163_v39 = vld [vmem:[#allocation3 + $0x300] sm:$0xff]  ;;  %v4443_v42 = vld [vmem:[#allocation6 + $0x338] sm:$0xff] }
  0xd3   :  { %v3219_v5 = vadd.f32 %v3218_v60, %v1937_v50  ;;  %v1436_v50 = vsub.f32 %v156_v36, %v4387_v37  ;;  %v1691_v60 = vand.u32 2147483647, %v1435_v41  ;;  %v676_v37 = vmul.f32 -2.0, %v4419_v49 }
  0xd4   :  { %v3617_v35 = vpop.eup %3616  ;;  %3626 = vpow2.f32 %v1021_v48  ;;  %v1946_v46 = vmul.f32 %v3615_v25, %v1690_v51  ;;  %v1027_v11 = vmul.f32 1.442695, %v675_v28  ;;  %v164_v48 = vld [vmem:[#allocation3 + $0x308] sm:$0xff]  ;;  %v4447_v51 = vld [vmem:[#allocation6 + $0x340] sm:$0xff] }
  0xd5   :  { %v3220_v14 = vadd.f32 %v3219_v5, %v1938_v59  ;;  %v1437_v59 = vsub.f32 %v157_v45, %v4391_v47  ;;  %v1692_v5 = vand.u32 2147483647, %v1436_v50  ;;  %v677_v47 = vmul.f32 -2.0, %v4423_v58 }
  0xd6   :  { %v3619_v44 = vpop.eup %3618  ;;  %3628 = vpow2.f32 %v1023_v57  ;;  %v1947_v53 = vmul.f32 %v3617_v35, %v1691_v60  ;;  %v1029_v21 = vmul.f32 1.442695, %v676_v37  ;;  %v165_v57 = vld [vmem:[#allocation3 + $0x310] sm:$0xff]  ;;  %v4451_v60 = vld [vmem:[#allocation6 + $0x348] sm:$0xff] }
  0xd7   :  { %v3221_v24 = vadd.f32 %v3220_v14, %v1939_v4  ;;  %v1438_v4 = vsub.f32 %v158_v55, %v4395_v56  ;;  %v1693_v14 = vand.u32 2147483647, %v1437_v59  ;;  %v678_v56 = vmul.f32 -2.0, %v4427_v3 }
  0xd8   :  { %v3621_v54 = vpop.eup %3620  ;;  %3630 = vpow2.f32 %v1025_v2  ;;  %v1948_v62 = vmul.f32 %v3619_v44, %v1692_v5  ;;  %v1031_v31 = vmul.f32 1.442695, %v677_v47  ;;  %v166_v2 = vld [vmem:[#allocation3 + $0x318] sm:$0xff]  ;;  %v4455_v5 = vld [vmem:[#allocation6 + $0x350] sm:$0xff] }
  0xd9   :  { %v3222_v34 = vadd.f32 %v3221_v24, %v1940_v13  ;;  %v1439_v13 = vsub.f32 %v159_v0, %v4399_v1  ;;  %v1694_v24 = vand.u32 2147483647, %v1438_v4  ;;  %v679_v1 = vmul.f32 -2.0, %v4431_v12 }
  0xda   :  { %v3623_v63 = vpop.eup %3622  ;;  %3632 = vpow2.f32 %v1027_v11  ;;  %v1949_v6 = vmul.f32 %v3621_v54, %v1693_v14  ;;  %v1033_v41 = vmul.f32 1.442695, %v678_v56  ;;  %v167_v11 = vld [vmem:[#allocation3 + $0x320] sm:$0xff]  ;;  %v4459_v14 = vld [vmem:[#allocation6 + $0x358] sm:$0xff] }
  0xdb   :  { %v3223_v43 = vadd.f32 %v3222_v34, %v1941_v17  ;;  %v1440_v17 = vsub.f32 %v160_v9, %v4403_v10  ;;  %v1695_v34 = vand.u32 2147483647, %v1439_v13  ;;  %v680_v10 = vmul.f32 -2.0, %v4435_v23 }
  0xdc   :  { %v3625_v8 = vpop.eup %3624  ;;  %3634 = vpow2.f32 %v1029_v21  ;;  %v1950_v15 = vmul.f32 %v3623_v63, %v1694_v24  ;;  %v1035_v50 = vmul.f32 1.442695, %v679_v1  ;;  %v168_v21 = vld [vmem:[#allocation3 + $0x328] sm:$0xff]  ;;  %v4463_v24 = vld [vmem:[#allocation6 + $0x360] sm:$0xff] }
  0xdd   :  { %v3224_v52 = vadd.f32 %v3223_v43, %v1942_v22  ;;  %v1441_v22 = vsub.f32 %v161_v19, %v4407_v20  ;;  %v1696_v43 = vand.u32 2147483647, %v1440_v17  ;;  %v681_v20 = vmul.f32 -2.0, %v4439_v33 }
  0xde   :  { %v3627_v18 = vpop.eup %3626  ;;  %3636 = vpow2.f32 %v1031_v31  ;;  %v1951_v25 = vmul.f32 %v3625_v8, %v1695_v34  ;;  %v1037_v59 = vmul.f32 1.442695, %v680_v10  ;;  %v169_v31 = vld [vmem:[#allocation3 + $0x330] sm:$0xff]  ;;  %v4467_v34 = vld [vmem:[#allocation6 + $0x368] sm:$0xff] }
  0xdf   :  { %v3225_v61 = vadd.f32 %v3224_v52, %v1943_v26  ;;  %v1442_v26 = vsub.f32 %v162_v29, %v4411_v30  ;;  %v1697_v52 = vand.u32 2147483647, %v1441_v22  ;;  %v682_v30 = vmul.f32 -2.0, %v4443_v42 }
  0xe0   :  { %v3629_v28 = vpop.eup %3628  ;;  %3638 = vpow2.f32 %v1033_v41  ;;  %v1952_v35 = vmul.f32 %v3627_v18, %v1696_v43  ;;  %v1039_v4 = vmul.f32 1.442695, %v681_v20  ;;  %v170_v41 = vld [vmem:[#allocation3 + $0x338] sm:$0xff]  ;;  %v4471_v43 = vld [vmem:[#allocation6 + $0x370] sm:$0xff] }
  0xe1   :  { %v3226_v7 = vadd.f32 %v3225_v61, %v1944_v32  ;;  %v1443_v32 = vsub.f32 %v163_v39, %v4415_v40  ;;  %v1698_v61 = vand.u32 2147483647, %v1442_v26  ;;  %v683_v40 = vmul.f32 -2.0, %v4447_v51 }
  0xe2   :  { %v3631_v37 = vpop.eup %3630  ;;  %3640 = vpow2.f32 %v1035_v50  ;;  %v1953_v44 = vmul.f32 %v3629_v28, %v1697_v52  ;;  %v1041_v13 = vmul.f32 1.442695, %v682_v30  ;;  %v171_v50 = vld [vmem:[#allocation3 + $0x340] sm:$0xff]  ;;  %v4475_v52 = vld [vmem:[#allocation6 + $0x378] sm:$0xff] }
  0xe3   :  { %v3227_v16 = vadd.f32 %v3226_v7, %v1945_v38  ;;  %v1444_v38 = vsub.f32 %v164_v48, %v4419_v49  ;;  %v1699_v7 = vand.u32 2147483647, %v1443_v32  ;;  %v684_v49 = vmul.f32 -2.0, %v4451_v60 }
  0xe4   :  { %v3633_v47 = vpop.eup %3632  ;;  %3642 = vpow2.f32 %v1037_v59  ;;  %v1954_v54 = vmul.f32 %v3631_v37, %v1698_v61  ;;  %v1043_v17 = vmul.f32 1.442695, %v683_v40  ;;  %v172_v59 = vld [vmem:[#allocation3 + $0x348] sm:$0xff]  ;;  %v4479_v61 = vld [vmem:[#allocation6 + $0x380] sm:$0xff] }
  0xe5   :  { %v3228_v27 = vadd.f32 %v3227_v16, %v1946_v46  ;;  %v1445_v46 = vsub.f32 %v165_v57, %v4423_v58  ;;  %v1700_v16 = vand.u32 2147483647, %v1444_v38  ;;  %v685_v58 = vmul.f32 -2.0, %v4455_v5 }
  0xe6   :  { %v3635_v56 = vpop.eup %3634  ;;  %3644 = vpow2.f32 %v1039_v4  ;;  %v1955_v63 = vmul.f32 %v3633_v47, %v1699_v7  ;;  %v1045_v22 = vmul.f32 1.442695, %v684_v49  ;;  %v173_v4 = vld [vmem:[#allocation3 + $0x350] sm:$0xff]  ;;  %v4483_v7 = vld [vmem:[#allocation6 + $0x388] sm:$0xff] }
  0xe7   :  { %v3229_v36 = vadd.f32 %v3228_v27, %v1947_v53  ;;  %v1446_v53 = vsub.f32 %v166_v2, %v4427_v3  ;;  %v1701_v27 = vand.u32 2147483647, %v1445_v46  ;;  %v686_v3 = vmul.f32 -2.0, %v4459_v14 }
  0xe8   :  { %v3637_v1 = vpop.eup %3636  ;;  %3646 = vpow2.f32 %v1041_v13  ;;  %v1956_v8 = vmul.f32 %v3635_v56, %v1700_v16  ;;  %v1047_v26 = vmul.f32 1.442695, %v685_v58  ;;  %v174_v13 = vld [vmem:[#allocation3 + $0x358] sm:$0xff]  ;;  %v4487_v16 = vld [vmem:[#allocation6 + $0x390] sm:$0xff] }
  0xe9   :  { %v3230_v45 = vadd.f32 %v3229_v36, %v1948_v62  ;;  %v1447_v62 = vsub.f32 %v167_v11, %v4431_v12  ;;  %v1702_v36 = vand.u32 2147483647, %v1446_v53  ;;  %v687_v12 = vmul.f32 -2.0, %v4463_v24 }
  0xea   :  { %v3639_v10 = vpop.eup %3638  ;;  %3648 = vpow2.f32 %v1043_v17  ;;  %v1957_v18 = vmul.f32 %v3637_v1, %v1701_v27  ;;  %v1049_v32 = vmul.f32 1.442695, %v686_v3  ;;  %v175_v17 = vld [vmem:[#allocation3 + $0x360] sm:$0xff]  ;;  %v4491_v27 = vld [vmem:[#allocation6 + $0x398] sm:$0xff] }
  0xeb   :  { %v3231_v55 = vadd.f32 %v3230_v45, %v1949_v6  ;;  %v1448_v6 = vsub.f32 %v168_v21, %v4435_v23  ;;  %v1703_v45 = vand.u32 2147483647, %v1447_v62  ;;  %v688_v23 = vmul.f32 -2.0, %v4467_v34 }
  0xec   :  { %v3641_v20 = vpop.eup %3640  ;;  %3650 = vpow2.f32 %v1045_v22  ;;  %v1958_v28 = vmul.f32 %v3639_v10, %v1702_v36  ;;  %v1051_v38 = vmul.f32 1.442695, %v687_v12  ;;  %v176_v22 = vld [vmem:[#allocation3 + $0x368] sm:$0xff]  ;;  %v4495_v36 = vld [vmem:[#allocation6 + $0x3a0] sm:$0xff] }
  0xed   :  { %v3232_v0 = vadd.f32 %v3231_v55, %v1950_v15  ;;  %v1449_v15 = vsub.f32 %v169_v31, %v4439_v33  ;;  %v1704_v55 = vand.u32 2147483647, %v1448_v6  ;;  %v689_v33 = vmul.f32 -2.0, %v4471_v43 }
  0xee   :  { %v3643_v30 = vpop.eup %3642  ;;  %3652 = vpow2.f32 %v1047_v26  ;;  %v1959_v37 = vmul.f32 %v3641_v20, %v1703_v45  ;;  %v1053_v46 = vmul.f32 1.442695, %v688_v23  ;;  %v177_v26 = vld [vmem:[#allocation3 + $0x370] sm:$0xff]  ;;  %v4499_v45 = vld [vmem:[#allocation6 + $0x3a8] sm:$0xff] }
  0xef   :  { %v3233_v9 = vadd.f32 %v3232_v0, %v1951_v25  ;;  %v1450_v25 = vsub.f32 %v170_v41, %v4443_v42  ;;  %v1705_v0 = vand.u32 2147483647, %v1449_v15  ;;  %v690_v42 = vmul.f32 -2.0, %v4475_v52 }
  0xf0   :  { %v3645_v40 = vpop.eup %3644  ;;  %3654 = vpow2.f32 %v1049_v32  ;;  %v1960_v47 = vmul.f32 %v3643_v30, %v1704_v55  ;;  %v1055_v53 = vmul.f32 1.442695, %v689_v33  ;;  %v178_v32 = vld [vmem:[#allocation3 + $0x378] sm:$0xff]  ;;  %v4503_v55 = vld [vmem:[#allocation6 + $0x3b0] sm:$0xff] }
  0xf1   :  { %v3234_v19 = vadd.f32 %v3233_v9, %v1952_v35  ;;  %v1451_v35 = vsub.f32 %v171_v50, %v4447_v51  ;;  %v1706_v9 = vand.u32 2147483647, %v1450_v25  ;;  %v691_v51 = vmul.f32 -2.0, %v4479_v61 }
  0xf2   :  { %v3647_v49 = vpop.eup %3646  ;;  %3656 = vpow2.f32 %v1051_v38  ;;  %v1961_v56 = vmul.f32 %v3645_v40, %v1705_v0  ;;  %v1057_v62 = vmul.f32 1.442695, %v690_v42  ;;  %v179_v38 = vld [vmem:[#allocation3 + $0x380] sm:$0xff]  ;;  %v4507_v0 = vld [vmem:[#allocation6 + $0x3b8] sm:$0xff] }
  0xf3   :  { %v3235_v29 = vadd.f32 %v3234_v19, %v1953_v44  ;;  %v1452_v44 = vsub.f32 %v172_v59, %v4451_v60  ;;  %v1707_v19 = vand.u32 2147483647, %v1451_v35  ;;  %v692_v60 = vmul.f32 -2.0, %v4483_v7 }
  0xf4   :  { %v3649_v58 = vpop.eup %3648  ;;  %3658 = vpow2.f32 %v1053_v46  ;;  %v1962_v1 = vmul.f32 %v3647_v49, %v1706_v9  ;;  %v1059_v6 = vmul.f32 1.442695, %v691_v51  ;;  %v180_v46 = vld [vmem:[#allocation3 + $0x388] sm:$0xff]  ;;  %v4511_v9 = vld [vmem:[#allocation6 + $0x3c0] sm:$0xff] }
  0xf5   :  { %v3236_v39 = vadd.f32 %v3235_v29, %v1954_v54  ;;  %v1453_v54 = vsub.f32 %v173_v4, %v4455_v5  ;;  %v1708_v29 = vand.u32 2147483647, %v1452_v44  ;;  %v693_v5 = vmul.f32 -2.0, %v4487_v16 }
  0xf6   :  { %v3651_v3 = vpop.eup %3650  ;;  %3660 = vpow2.f32 %v1055_v53  ;;  %v1963_v10 = vmul.f32 %v3649_v58, %v1707_v19  ;;  %v1061_v15 = vmul.f32 1.442695, %v692_v60  ;;  %v181_v53 = vld [vmem:[#allocation3 + $0x390] sm:$0xff]  ;;  %v4515_v19 = vld [vmem:[#allocation6 + $0x3c8] sm:$0xff] }
  0xf7   :  { %v3237_v48 = vadd.f32 %v3236_v39, %v1955_v63  ;;  %v1454_v63 = vsub.f32 %v174_v13, %v4459_v14  ;;  %v1709_v39 = vand.u32 2147483647, %v1453_v54  ;;  %v694_v14 = vmul.f32 -2.0, %v4491_v27 }
  0xf8   :  { %v3653_v12 = vpop.eup %3652  ;;  %3662 = vpow2.f32 %v1057_v62  ;;  %v1964_v20 = vmul.f32 %v3651_v3, %v1708_v29  ;;  %v1063_v25 = vmul.f32 1.442695, %v693_v5  ;;  %v182_v62 = vld [vmem:[#allocation3 + $0x398] sm:$0xff]  ;;  %v4519_v29 = vld [vmem:[#allocation6 + $0x3d0] sm:$0xff] }
  0xf9   :  { %v3238_v57 = vadd.f32 %v3237_v48, %v1956_v8  ;;  %v1455_v8 = vsub.f32 %v175_v17, %v4463_v24  ;;  %v1710_v48 = vand.u32 2147483647, %v1454_v63  ;;  %v695_v24 = vmul.f32 -2.0, %v4495_v36 }
  0xfa   :  { %v3655_v23 = vpop.eup %3654  ;;  %3664 = vpow2.f32 %v1059_v6  ;;  %v1965_v30 = vmul.f32 %v3653_v12, %v1709_v39  ;;  %v1065_v35 = vmul.f32 1.442695, %v694_v14  ;;  %v183_v6 = vld [vmem:[#allocation3 + $0x3a0] sm:$0xff]  ;;  %v4523_v39 = vld [vmem:[#allocation6 + $0x3d8] sm:$0xff] }
  0xfb   :  { %v3239_v2 = vadd.f32 %v3238_v57, %v1957_v18  ;;  %v1456_v18 = vsub.f32 %v176_v22, %v4467_v34  ;;  %v1711_v57 = vand.u32 2147483647, %v1455_v8  ;;  %v696_v34 = vmul.f32 -2.0, %v4499_v45 }
  0xfc   :  { %v3657_v33 = vpop.eup %3656  ;;  %3666 = vpow2.f32 %v1061_v15  ;;  %v1966_v40 = vmul.f32 %v3655_v23, %v1710_v48  ;;  %v1067_v44 = vmul.f32 1.442695, %v695_v24  ;;  %v184_v15 = vld [vmem:[#allocation3 + $0x3a8] sm:$0xff]  ;;  %v4527_v48 = vld [vmem:[#allocation6 + $0x3e0] sm:$0xff] }
  0xfd   :  { %v3240_v11 = vadd.f32 %v3239_v2, %v1958_v28  ;;  %v1457_v28 = vsub.f32 %v177_v26, %v4471_v43  ;;  %v1712_v2 = vand.u32 2147483647, %v1456_v18  ;;  %v697_v43 = vmul.f32 -2.0, %v4503_v55 }
  0xfe   :  { %v3659_v42 = vpop.eup %3658  ;;  %3668 = vpow2.f32 %v1063_v25  ;;  %v1967_v49 = vmul.f32 %v3657_v33, %v1711_v57  ;;  %v1069_v54 = vmul.f32 1.442695, %v696_v34  ;;  %v185_v25 = vld [vmem:[#allocation3 + $0x3b0] sm:$0xff]  ;;  %v4531_v57 = vld [vmem:[#allocation6 + $0x3e8] sm:$0xff] }
  0xff   :  { %v3241_v21 = vadd.f32 %v3240_v11, %v1959_v37  ;;  %v1458_v37 = vsub.f32 %v178_v32, %v4475_v52  ;;  %v1713_v11 = vand.u32 2147483647, %v1457_v28  ;;  %v698_v52 = vmul.f32 -2.0, %v4507_v0 }
 0x100   :  { %v3661_v51 = vpop.eup %3660  ;;  %3670 = vpow2.f32 %v1065_v35  ;;  %v1968_v58 = vmul.f32 %v3659_v42, %v1712_v2  ;;  %v1071_v63 = vmul.f32 1.442695, %v697_v43  ;;  %v186_v35 = vld [vmem:[#allocation3 + $0x3b8] sm:$0xff]  ;;  %v4535_v2 = vld [vmem:[#allocation6 + $0x3f0] sm:$0xff] }
 0x101   :  { %v3242_v31 = vadd.f32 %v3241_v21, %v1960_v47  ;;  %v1459_v47 = vsub.f32 %v179_v38, %v4479_v61  ;;  %v1714_v21 = vand.u32 2147483647, %v1458_v37  ;;  %v699_v61 = vmul.f32 -2.0, %v4511_v9 }
 0x102   :  { %v3663_v60 = vpop.eup %3662  ;;  %3672 = vpow2.f32 %v1067_v44  ;;  %v1969_v3 = vmul.f32 %v3661_v51, %v1713_v11  ;;  %v1073_v8 = vmul.f32 1.442695, %v698_v52  ;;  %v187_v44 = vld [vmem:[#allocation3 + $0x3c0] sm:$0xff]  ;;  %v4539_v11 = vld [vmem:[#allocation6 + $0x3f8] sm:$0xff] }
 0x103   :  { %v3243_v41 = vadd.f32 %v3242_v31, %v1961_v56  ;;  %v1460_v56 = vsub.f32 %v180_v46, %v4483_v7  ;;  %v1715_v31 = vand.u32 2147483647, %v1459_v47  ;;  %v700_v7 = vmul.f32 -2.0, %v4515_v19 }
 0x104   :  { %v3665_v5 = vpop.eup %3664  ;;  %3674 = vpow2.f32 %v1069_v54  ;;  %v1970_v12 = vmul.f32 %v3663_v60, %v1714_v21  ;;  %v1075_v18 = vmul.f32 1.442695, %v699_v61  ;;  %v188_v54 = vld [vmem:[#allocation3 + $0x3c8] sm:$0xff]  ;;  %v4543_v21 = vld [vmem:[#allocation6 + $0x400] sm:$0xff] }
 0x105   :  { %v3244_v50 = vadd.f32 %v3243_v41, %v1962_v1  ;;  %v1461_v1 = vsub.f32 %v181_v53, %v4487_v16  ;;  %v1716_v41 = vand.u32 2147483647, %v1460_v56  ;;  %v701_v16 = vmul.f32 -2.0, %v4519_v29 }
 0x106   :  { %v3667_v14 = vpop.eup %3666  ;;  %3676 = vpow2.f32 %v1071_v63  ;;  %v1971_v23 = vmul.f32 %v3665_v5, %v1715_v31  ;;  %v1077_v28 = vmul.f32 1.442695, %v700_v7  ;;  %v189_v63 = vld [vmem:[#allocation3 + $0x3d0] sm:$0xff]  ;;  %v4547_v31 = vld [vmem:[#allocation6 + $0x408] sm:$0xff] }
 0x107   :  { %v3245_v59 = vadd.f32 %v3244_v50, %v1963_v10  ;;  %v1462_v10 = vsub.f32 %v182_v62, %v4491_v27  ;;  %v1717_v50 = vand.u32 2147483647, %v1461_v1  ;;  %v702_v27 = vmul.f32 -2.0, %v4523_v39 }
 0x108   :  { %v3669_v24 = vpop.eup %3668  ;;  %3678 = vpow2.f32 %v1073_v8  ;;  %v1972_v33 = vmul.f32 %v3667_v14, %v1716_v41  ;;  %v1079_v37 = vmul.f32 1.442695, %v701_v16  ;;  %v190_v8 = vld [vmem:[#allocation3 + $0x3d8] sm:$0xff]  ;;  %v4551_v41 = vld [vmem:[#allocation6 + $0x410] sm:$0xff] }
 0x109   :  { %v3246_v4 = vadd.f32 %v3245_v59, %v1964_v20  ;;  %v1463_v20 = vsub.f32 %v183_v6, %v4495_v36  ;;  %v1718_v59 = vand.u32 2147483647, %v1462_v10  ;;  %v703_v36 = vmul.f32 -2.0, %v4527_v48 }
 0x10a   :  { %v3671_v34 = vpop.eup %3670  ;;  %3680 = vpow2.f32 %v1075_v18  ;;  %v1973_v42 = vmul.f32 %v3669_v24, %v1717_v50  ;;  %v1081_v47 = vmul.f32 1.442695, %v702_v27  ;;  %v191_v18 = vld [vmem:[#allocation3 + $0x3e0] sm:$0xff]  ;;  %v4555_v50 = vld [vmem:[#allocation6 + $0x418] sm:$0xff] }
 0x10b   :  { %v3247_v13 = vadd.f32 %v3246_v4, %v1965_v30  ;;  %v1464_v30 = vsub.f32 %v184_v15, %v4499_v45  ;;  %v1719_v4 = vand.u32 2147483647, %v1463_v20  ;;  %v704_v45 = vmul.f32 -2.0, %v4531_v57 }
 0x10c   :  { %v3673_v43 = vpop.eup %3672  ;;  %3682 = vpow2.f32 %v1077_v28  ;;  %v1974_v51 = vmul.f32 %v3671_v34, %v1718_v59  ;;  %v1083_v56 = vmul.f32 1.442695, %v703_v36  ;;  %v192_v28 = vld [vmem:[#allocation3 + $0x3e8] sm:$0xff]  ;;  %v4559_v59 = vld [vmem:[#allocation6 + $0x420] sm:$0xff] }
 0x10d   :  { %v3248_v17 = vadd.f32 %v3247_v13, %v1966_v40  ;;  %v1465_v40 = vsub.f32 %v185_v25, %v4503_v55  ;;  %v1720_v13 = vand.u32 2147483647, %v1464_v30  ;;  %v705_v55 = vmul.f32 -2.0, %v4535_v2 }
 0x10e   :  { %v3675_v52 = vpop.eup %3674  ;;  %3684 = vpow2.f32 %v1079_v37  ;;  %v1975_v60 = vmul.f32 %v3673_v43, %v1719_v4  ;;  %v1085_v1 = vmul.f32 1.442695, %v704_v45  ;;  %v193_v37 = vld [vmem:[#allocation3 + $0x3f0] sm:$0xff]  ;;  %v4563_v4 = vld [vmem:[#allocation6 + $0x428] sm:$0xff] }
 0x10f   :  { %v3249_v22 = vadd.f32 %v3248_v17, %v1967_v49  ;;  %v1466_v49 = vsub.f32 %v186_v35, %v4507_v0  ;;  %v1721_v17 = vand.u32 2147483647, %v1465_v40  ;;  %v706_v0 = vmul.f32 -2.0, %v4539_v11 }
 0x110   :  { %v3677_v61 = vpop.eup %3676  ;;  %3686 = vpow2.f32 %v1081_v47  ;;  %v1976_v5 = vmul.f32 %v3675_v52, %v1720_v13  ;;  %v1087_v10 = vmul.f32 1.442695, %v705_v55  ;;  %v194_v47 = vld [vmem:[#allocation3 + $0x3f8] sm:$0xff]  ;;  %v4567_v13 = vld [vmem:[#allocation6 + $0x430] sm:$0xff] }
 0x111   :  { %v3250_v26 = vadd.f32 %v3249_v22, %v1968_v58  ;;  %v1467_v58 = vsub.f32 %v187_v44, %v4511_v9  ;;  %v1722_v22 = vand.u32 2147483647, %v1466_v49  ;;  %v707_v9 = vmul.f32 -2.0, %v4543_v21 }
 0x112   :  { %v3679_v7 = vpop.eup %3678  ;;  %3688 = vpow2.f32 %v1083_v56  ;;  %v1977_v14 = vmul.f32 %v3677_v61, %v1721_v17  ;;  %v1089_v20 = vmul.f32 1.442695, %v706_v0  ;;  %v195_v56 = vld [vmem:[#allocation3 + $0x400] sm:$0xff]  ;;  %v4571_v17 = vld [vmem:[#allocation6 + $0x438] sm:$0xff] }
 0x113   :  { %v3251_v32 = vadd.f32 %v3250_v26, %v1969_v3  ;;  %v1468_v3 = vsub.f32 %v188_v54, %v4515_v19  ;;  %v1723_v26 = vand.u32 2147483647, %v1467_v58  ;;  %v708_v19 = vmul.f32 -2.0, %v4547_v31 }
 0x114   :  { %v3681_v16 = vpop.eup %3680  ;;  %3690 = vpow2.f32 %v1085_v1  ;;  %v1978_v24 = vmul.f32 %v3679_v7, %v1722_v22  ;;  %v1091_v30 = vmul.f32 1.442695, %v707_v9  ;;  %v196_v1 = vld [vmem:[#allocation3 + $0x408] sm:$0xff]  ;;  %v4575_v22 = vld [vmem:[#allocation6 + $0x440] sm:$0xff] }
 0x115   :  { %v3252_v38 = vadd.f32 %v3251_v32, %v1970_v12  ;;  %v1469_v12 = vsub.f32 %v189_v63, %v4519_v29  ;;  %v1724_v32 = vand.u32 2147483647, %v1468_v3  ;;  %v709_v29 = vmul.f32 -2.0, %v4551_v41 }
 0x116   :  { %v3683_v27 = vpop.eup %3682  ;;  %3692 = vpow2.f32 %v1087_v10  ;;  %v1979_v34 = vmul.f32 %v3681_v16, %v1723_v26  ;;  %v1093_v40 = vmul.f32 1.442695, %v708_v19  ;;  %v197_v10 = vld [vmem:[#allocation3 + $0x410] sm:$0xff]  ;;  %v4579_v26 = vld [vmem:[#allocation6 + $0x448] sm:$0xff] }
 0x117   :  { %v3253_v46 = vadd.f32 %v3252_v38, %v1971_v23  ;;  %v1470_v23 = vsub.f32 %v190_v8, %v4523_v39  ;;  %v1725_v38 = vand.u32 2147483647, %v1469_v12  ;;  %v710_v39 = vmul.f32 -2.0, %v4555_v50 }
 0x118   :  { %v3685_v36 = vpop.eup %3684  ;;  %3694 = vpow2.f32 %v1089_v20  ;;  %v1980_v43 = vmul.f32 %v3683_v27, %v1724_v32  ;;  %v1095_v49 = vmul.f32 1.442695, %v709_v29  ;;  %v198_v20 = vld [vmem:[#allocation3 + $0x418] sm:$0xff]  ;;  %v4583_v32 = vld [vmem:[#allocation6 + $0x450] sm:$0xff] }
 0x119   :  { %v3254_v53 = vadd.f32 %v3253_v46, %v1972_v33  ;;  %v1471_v33 = vsub.f32 %v191_v18, %v4527_v48  ;;  %v1726_v46 = vand.u32 2147483647, %v1470_v23  ;;  %v711_v48 = vmul.f32 -2.0, %v4559_v59 }
 0x11a   :  { %v3687_v45 = vpop.eup %3686  ;;  %3696 = vpow2.f32 %v1091_v30  ;;  %v1981_v52 = vmul.f32 %v3685_v36, %v1725_v38  ;;  %v1097_v58 = vmul.f32 1.442695, %v710_v39  ;;  %v199_v30 = vld [vmem:[#allocation3 + $0x420] sm:$0xff]  ;;  %v4587_v38 = vld [vmem:[#allocation6 + $0x458] sm:$0xff] }
 0x11b   :  { %v3255_v62 = vadd.f32 %v3254_v53, %v1973_v42  ;;  %v1472_v42 = vsub.f32 %v192_v28, %v4531_v57  ;;  %v1727_v53 = vand.u32 2147483647, %v1471_v33  ;;  %v712_v57 = vmul.f32 -2.0, %v4563_v4 }
 0x11c   :  { %v3689_v55 = vpop.eup %3688  ;;  %3698 = vpow2.f32 %v1093_v40  ;;  %v1982_v61 = vmul.f32 %v3687_v45, %v1726_v46  ;;  %v1099_v3 = vmul.f32 1.442695, %v711_v48  ;;  %v200_v40 = vld [vmem:[#allocation3 + $0x428] sm:$0xff]  ;;  %v4591_v46 = vld [vmem:[#allocation6 + $0x460] sm:$0xff] }
 0x11d   :  { %v3256_v6 = vadd.f32 %v3255_v62, %v1974_v51  ;;  %v1473_v51 = vsub.f32 %v193_v37, %v4535_v2  ;;  %v1728_v62 = vand.u32 2147483647, %v1472_v42  ;;  %v713_v2 = vmul.f32 -2.0, %v4567_v13 }
 0x11e   :  { %v3691_v0 = vpop.eup %3690  ;;  %3700 = vpow2.f32 %v1095_v49  ;;  %v1983_v7 = vmul.f32 %v3689_v55, %v1727_v53  ;;  %v1101_v12 = vmul.f32 1.442695, %v712_v57  ;;  %v201_v49 = vld [vmem:[#allocation3 + $0x430] sm:$0xff]  ;;  %v4595_v53 = vld [vmem:[#allocation6 + $0x468] sm:$0xff] }
 0x11f   :  { %v3257_v15 = vadd.f32 %v3256_v6, %v1975_v60  ;;  %v1474_v60 = vsub.f32 %v194_v47, %v4539_v11  ;;  %v1729_v6 = vand.u32 2147483647, %v1473_v51  ;;  %v714_v11 = vmul.f32 -2.0, %v4571_v17 }
 0x120   :  { %v3693_v9 = vpop.eup %3692  ;;  %3702 = vpow2.f32 %v1097_v58  ;;  %v1984_v16 = vmul.f32 %v3691_v0, %v1728_v62  ;;  %v1103_v23 = vmul.f32 1.442695, %v713_v2  ;;  %v202_v58 = vld [vmem:[#allocation3 + $0x438] sm:$0xff]  ;;  %v4599_v62 = vld [vmem:[#allocation6 + $0x470] sm:$0xff] }
 0x121   :  { %v3258_v25 = vadd.f32 %v3257_v15, %v1976_v5  ;;  %v1475_v5 = vsub.f32 %v195_v56, %v4543_v21  ;;  %v1730_v15 = vand.u32 2147483647, %v1474_v60  ;;  %v715_v21 = vmul.f32 -2.0, %v4575_v22 }
 0x122   :  { %v3695_v19 = vpop.eup %3694  ;;  %3704 = vpow2.f32 %v1099_v3  ;;  %v1985_v27 = vmul.f32 %v3693_v9, %v1729_v6  ;;  %v1105_v33 = vmul.f32 1.442695, %v714_v11  ;;  %v203_v3 = vld [vmem:[#allocation3 + $0x440] sm:$0xff]  ;;  %v4603_v6 = vld [vmem:[#allocation6 + $0x478] sm:$0xff] }
 0x123   :  { %v3259_v35 = vadd.f32 %v3258_v25, %v1977_v14  ;;  %v1476_v14 = vsub.f32 %v196_v1, %v4547_v31  ;;  %v1731_v25 = vand.u32 2147483647, %v1475_v5  ;;  %v716_v31 = vmul.f32 -2.0, %v4579_v26 }
 0x124   :  { %v3697_v29 = vpop.eup %3696  ;;  %3706 = vpow2.f32 %v1101_v12  ;;  %v1986_v36 = vmul.f32 %v3695_v19, %v1730_v15  ;;  %v1107_v42 = vmul.f32 1.442695, %v715_v21  ;;  %v204_v12 = vld [vmem:[#allocation3 + $0x448] sm:$0xff]  ;;  %v4607_v15 = vld [vmem:[#allocation6 + $0x480] sm:$0xff] }
 0x125   :  { %v3260_v44 = vadd.f32 %v3259_v35, %v1978_v24  ;;  %v1477_v24 = vsub.f32 %v197_v10, %v4551_v41  ;;  %v1732_v35 = vand.u32 2147483647, %v1476_v14  ;;  %v717_v41 = vmul.f32 -2.0, %v4583_v32 }
 0x126   :  { %v3699_v39 = vpop.eup %3698  ;;  %3708 = vpow2.f32 %v1103_v23  ;;  %v1987_v45 = vmul.f32 %v3697_v29, %v1731_v25  ;;  %v1109_v51 = vmul.f32 1.442695, %v716_v31  ;;  %v205_v23 = vld [vmem:[#allocation3 + $0x450] sm:$0xff]  ;;  %v4611_v25 = vld [vmem:[#allocation6 + $0x488] sm:$0xff] }
 0x127   :  { %v3261_v54 = vadd.f32 %v3260_v44, %v1979_v34  ;;  %v1478_v34 = vsub.f32 %v198_v20, %v4555_v50  ;;  %v1733_v44 = vand.u32 2147483647, %v1477_v24  ;;  %v718_v50 = vmul.f32 -2.0, %v4587_v38 }
 0x128   :  { %v3701_v48 = vpop.eup %3700  ;;  %3710 = vpow2.f32 %v1105_v33  ;;  %v1988_v55 = vmul.f32 %v3699_v39, %v1732_v35  ;;  %v1111_v60 = vmul.f32 1.442695, %v717_v41  ;;  %v206_v33 = vld [vmem:[#allocation3 + $0x458] sm:$0xff]  ;;  %v4615_v35 = vld [vmem:[#allocation6 + $0x490] sm:$0xff] }
 0x129   :  { %v3262_v63 = vadd.f32 %v3261_v54, %v1980_v43  ;;  %v1479_v43 = vsub.f32 %v199_v30, %v4559_v59  ;;  %v1734_v54 = vand.u32 2147483647, %v1478_v34  ;;  %v719_v59 = vmul.f32 -2.0, %v4591_v46 }
 0x12a   :  { %v3703_v57 = vpop.eup %3702  ;;  %3712 = vpow2.f32 %v1107_v42  ;;  %v1989_v0 = vmul.f32 %v3701_v48, %v1733_v44  ;;  %v1113_v5 = vmul.f32 1.442695, %v718_v50  ;;  %v207_v42 = vld [vmem:[#allocation3 + $0x460] sm:$0xff]  ;;  %v4619_v44 = vld [vmem:[#allocation6 + $0x498] sm:$0xff] }
 0x12b   :  { %v3263_v8 = vadd.f32 %v3262_v63, %v1981_v52  ;;  %v1480_v52 = vsub.f32 %v200_v40, %v4563_v4  ;;  %v1735_v63 = vand.u32 2147483647, %v1479_v43  ;;  %v720_v4 = vmul.f32 -2.0, %v4595_v53 }
 0x12c   :  { %v3705_v2 = vpop.eup %3704  ;;  %3714 = vpow2.f32 %v1109_v51  ;;  %v1990_v9 = vmul.f32 %v3703_v57, %v1734_v54  ;;  %v1115_v14 = vmul.f32 1.442695, %v719_v59  ;;  %v208_v51 = vld [vmem:[#allocation3 + $0x468] sm:$0xff]  ;;  %v4623_v54 = vld [vmem:[#allocation6 + $0x4a0] sm:$0xff] }
 0x12d   :  { %v3264_v18 = vadd.f32 %v3263_v8, %v1982_v61  ;;  %v1481_v61 = vsub.f32 %v201_v49, %v4567_v13  ;;  %v1736_v8 = vand.u32 2147483647, %v1480_v52  ;;  %v721_v13 = vmul.f32 -2.0, %v4599_v62 }
 0x12e   :  { %v3707_v11 = vpop.eup %3706  ;;  %3716 = vpow2.f32 %v1111_v60  ;;  %v1991_v19 = vmul.f32 %v3705_v2, %v1735_v63  ;;  %v1117_v24 = vmul.f32 1.442695, %v720_v4  ;;  %v209_v60 = vld [vmem:[#allocation3 + $0x470] sm:$0xff]  ;;  %v4627_v63 = vld [vmem:[#allocation6 + $0x4a8] sm:$0xff] }
 0x12f   :  { %v3265_v28 = vadd.f32 %v3264_v18, %v1983_v7  ;;  %v1482_v7 = vsub.f32 %v202_v58, %v4571_v17  ;;  %v1737_v18 = vand.u32 2147483647, %v1481_v61  ;;  %v722_v17 = vmul.f32 -2.0, %v4603_v6 }
 0x130   :  { %v3709_v21 = vpop.eup %3708  ;;  %3718 = vpow2.f32 %v1113_v5  ;;  %v1992_v29 = vmul.f32 %v3707_v11, %v1736_v8  ;;  %v1119_v34 = vmul.f32 1.442695, %v721_v13  ;;  %v210_v5 = vld [vmem:[#allocation3 + $0x478] sm:$0xff]  ;;  %v4631_v8 = vld [vmem:[#allocation6 + $0x4b0] sm:$0xff] }
 0x131   :  { %v3266_v37 = vadd.f32 %v3265_v28, %v1984_v16  ;;  %v1483_v16 = vsub.f32 %v203_v3, %v4575_v22  ;;  %v1738_v28 = vand.u32 2147483647, %v1482_v7  ;;  %v723_v22 = vmul.f32 -2.0, %v4607_v15 }
 0x132   :  { %v3711_v31 = vpop.eup %3710  ;;  %3720 = vpow2.f32 %v1115_v14  ;;  %v1993_v39 = vmul.f32 %v3709_v21, %v1737_v18  ;;  %v1121_v43 = vmul.f32 1.442695, %v722_v17  ;;  %v211_v14 = vld [vmem:[#allocation3 + $0x480] sm:$0xff]  ;;  %v4635_v18 = vld [vmem:[#allocation6 + $0x4b8] sm:$0xff] }
 0x133   :  { %v3267_v47 = vadd.f32 %v3266_v37, %v1985_v27  ;;  %v1484_v27 = vsub.f32 %v204_v12, %v4579_v26  ;;  %v1739_v37 = vand.u32 2147483647, %v1483_v16  ;;  %v724_v26 = vmul.f32 -2.0, %v4611_v25 }
 0x134   :  { %v3713_v41 = vpop.eup %3712  ;;  %3722 = vpow2.f32 %v1117_v24  ;;  %v1994_v48 = vmul.f32 %v3711_v31, %v1738_v28  ;;  %v1123_v52 = vmul.f32 1.442695, %v723_v22  ;;  %v212_v24 = vld [vmem:[#allocation3 + $0x488] sm:$0xff]  ;;  %v4639_v28 = vld [vmem:[#allocation6 + $0x4c0] sm:$0xff] }
 0x135   :  { %v3268_v56 = vadd.f32 %v3267_v47, %v1986_v36  ;;  %v1485_v36 = vsub.f32 %v205_v23, %v4583_v32  ;;  %v1740_v47 = vand.u32 2147483647, %v1484_v27  ;;  %v725_v32 = vmul.f32 -2.0, %v4615_v35 }
 0x136   :  { %v3715_v50 = vpop.eup %3714  ;;  %3724 = vpow2.f32 %v1119_v34  ;;  %v1995_v57 = vmul.f32 %v3713_v41, %v1739_v37  ;;  %v1125_v61 = vmul.f32 1.442695, %v724_v26  ;;  %v213_v34 = vld [vmem:[#allocation3 + $0x490] sm:$0xff]  ;;  %v4643_v37 = vld [vmem:[#allocation6 + $0x4c8] sm:$0xff] }
 0x137   :  { %v3269_v1 = vadd.f32 %v3268_v56, %v1987_v45  ;;  %v1486_v45 = vsub.f32 %v206_v33, %v4587_v38  ;;  %v1741_v56 = vand.u32 2147483647, %v1485_v36  ;;  %v726_v38 = vmul.f32 -2.0, %v4619_v44 }
 0x138   :  { %v3717_v59 = vpop.eup %3716  ;;  %3726 = vpow2.f32 %v1121_v43  ;;  %v1996_v2 = vmul.f32 %v3715_v50, %v1740_v47  ;;  %v1127_v7 = vmul.f32 1.442695, %v725_v32  ;;  %v214_v43 = vld [vmem:[#allocation3 + $0x498] sm:$0xff]  ;;  %v4647_v47 = vld [vmem:[#allocation6 + $0x4d0] sm:$0xff] }
 0x139   :  { %v3270_v10 = vadd.f32 %v3269_v1, %v1988_v55  ;;  %v1487_v55 = vsub.f32 %v207_v42, %v4591_v46  ;;  %v1742_v1 = vand.u32 2147483647, %v1486_v45  ;;  %v727_v46 = vmul.f32 -2.0, %v4623_v54 }
 0x13a   :  { %v3719_v4 = vpop.eup %3718  ;;  %3728 = vpow2.f32 %v1123_v52  ;;  %v1997_v11 = vmul.f32 %v3717_v59, %v1741_v56  ;;  %v1129_v16 = vmul.f32 1.442695, %v726_v38  ;;  %v215_v52 = vld [vmem:[#allocation3 + $0x4a0] sm:$0xff]  ;;  %v4651_v56 = vld [vmem:[#allocation6 + $0x4d8] sm:$0xff] }
 0x13b   :  { %v3271_v20 = vadd.f32 %v3270_v10, %v1989_v0  ;;  %v1488_v0 = vsub.f32 %v208_v51, %v4595_v53  ;;  %v1743_v10 = vand.u32 2147483647, %v1487_v55  ;;  %v728_v53 = vmul.f32 -2.0, %v4627_v63 }
 0x13c   :  { %v3721_v13 = vpop.eup %3720  ;;  %3730 = vpow2.f32 %v1125_v61  ;;  %v1998_v21 = vmul.f32 %v3719_v4, %v1742_v1  ;;  %v1131_v27 = vmul.f32 1.442695, %v727_v46  ;;  %v216_v61 = vld [vmem:[#allocation3 + $0x4a8] sm:$0xff]  ;;  %v4655_v1 = vld [vmem:[#allocation6 + $0x4e0] sm:$0xff] }
 0x13d   :  { %v3272_v30 = vadd.f32 %v3271_v20, %v1990_v9  ;;  %v1489_v9 = vsub.f32 %v209_v60, %v4599_v62  ;;  %v1744_v20 = vand.u32 2147483647, %v1488_v0  ;;  %v729_v62 = vmul.f32 -2.0, %v4631_v8 }
 0x13e   :  { %v3723_v17 = vpop.eup %3722  ;;  %3732 = vpow2.f32 %v1127_v7  ;;  %v1999_v31 = vmul.f32 %v3721_v13, %v1743_v10  ;;  %v1133_v36 = vmul.f32 1.442695, %v728_v53  ;;  %v217_v7 = vld [vmem:[#allocation3 + $0x4b0] sm:$0xff]  ;;  %v4659_v10 = vld [vmem:[#allocation6 + $0x4e8] sm:$0xff] }
 0x13f   :  { %v3273_v40 = vadd.f32 %v3272_v30, %v1991_v19  ;;  %v1490_v19 = vsub.f32 %v210_v5, %v4603_v6  ;;  %v1745_v30 = vand.u32 2147483647, %v1489_v9  ;;  %v730_v6 = vmul.f32 -2.0, %v4635_v18 }
 0x140   :  { %v3725_v22 = vpop.eup %3724  ;;  %3734 = vpow2.f32 %v1129_v16  ;;  %v2000_v41 = vmul.f32 %v3723_v17, %v1744_v20  ;;  %v1135_v45 = vmul.f32 1.442695, %v729_v62  ;;  %v218_v16 = vld [vmem:[#allocation3 + $0x4b8] sm:$0xff]  ;;  %v4663_v20 = vld [vmem:[#allocation6 + $0x4f0] sm:$0xff] }
 0x141   :  { %v3274_v49 = vadd.f32 %v3273_v40, %v1992_v29  ;;  %v1491_v29 = vsub.f32 %v211_v14, %v4607_v15  ;;  %v1746_v40 = vand.u32 2147483647, %v1490_v19  ;;  %v731_v15 = vmul.f32 -2.0, %v4639_v28 }
 0x142   :  { %v3727_v26 = vpop.eup %3726  ;;  %3736 = vpow2.f32 %v1131_v27  ;;  %v2001_v50 = vmul.f32 %v3725_v22, %v1745_v30  ;;  %v1137_v55 = vmul.f32 1.442695, %v730_v6  ;;  %v219_v27 = vld [vmem:[#allocation3 + $0x4c0] sm:$0xff]  ;;  %v4667_v30 = vld [vmem:[#allocation6 + $0x4f8] sm:$0xff] }
 0x143   :  { %v3275_v58 = vadd.f32 %v3274_v49, %v1993_v39  ;;  %v1492_v39 = vsub.f32 %v212_v24, %v4611_v25  ;;  %v1747_v49 = vand.u32 2147483647, %v1491_v29  ;;  %v732_v25 = vmul.f32 -2.0, %v4643_v37 }
 0x144   :  { %v3729_v32 = vpop.eup %3728  ;;  %3738 = vpow2.f32 %v1133_v36  ;;  %v2002_v59 = vmul.f32 %v3727_v26, %v1746_v40  ;;  %v1139_v0 = vmul.f32 1.442695, %v731_v15  ;;  %v220_v36 = vld [vmem:[#allocation3 + $0x4c8] sm:$0xff]  ;;  %v4671_v40 = vld [vmem:[#allocation6 + $0x500] sm:$0xff] }
 0x145   :  { %v3276_v3 = vadd.f32 %v3275_v58, %v1994_v48  ;;  %v1493_v48 = vsub.f32 %v213_v34, %v4615_v35  ;;  %v1748_v58 = vand.u32 2147483647, %v1492_v39  ;;  %v733_v35 = vmul.f32 -2.0, %v4647_v47 }
 0x146   :  { %v3731_v38 = vpop.eup %3730  ;;  %3740 = vpow2.f32 %v1135_v45  ;;  %v2003_v4 = vmul.f32 %v3729_v32, %v1747_v49  ;;  %v1141_v9 = vmul.f32 1.442695, %v732_v25  ;;  %v221_v45 = vld [vmem:[#allocation3 + $0x4d0] sm:$0xff]  ;;  %v4675_v49 = vld [vmem:[#allocation6 + $0x508] sm:$0xff] }
 0x147   :  { %v3277_v12 = vadd.f32 %v3276_v3, %v1995_v57  ;;  %v1494_v57 = vsub.f32 %v214_v43, %v4619_v44  ;;  %v1749_v3 = vand.u32 2147483647, %v1493_v48  ;;  %v734_v44 = vmul.f32 -2.0, %v4651_v56 }
 0x148   :  { %v3733_v46 = vpop.eup %3732  ;;  %3742 = vpow2.f32 %v1137_v55  ;;  %v2004_v13 = vmul.f32 %v3731_v38, %v1748_v58  ;;  %v1143_v19 = vmul.f32 1.442695, %v733_v35  ;;  %v222_v55 = vld [vmem:[#allocation3 + $0x4d8] sm:$0xff]  ;;  %v4679_v58 = vld [vmem:[#allocation6 + $0x510] sm:$0xff] }
 0x149   :  { %v3278_v23 = vadd.f32 %v3277_v12, %v1996_v2  ;;  %v1495_v2 = vsub.f32 %v215_v52, %v4623_v54  ;;  %v1750_v12 = vand.u32 2147483647, %v1494_v57  ;;  %v735_v54 = vmul.f32 -2.0, %v4655_v1 }
 0x14a   :  { %v3735_v53 = vpop.eup %3734  ;;  %3744 = vpow2.f32 %v1139_v0  ;;  %v2005_v17 = vmul.f32 %v3733_v46, %v1749_v3  ;;  %v1145_v29 = vmul.f32 1.442695, %v734_v44  ;;  %v223_v0 = vld [vmem:[#allocation3 + $0x4e0] sm:$0xff]  ;;  %v4683_v3 = vld [vmem:[#allocation6 + $0x518] sm:$0xff] }
 0x14b   :  { %v3279_v33 = vadd.f32 %v3278_v23, %v1997_v11  ;;  %v1496_v11 = vsub.f32 %v216_v61, %v4627_v63  ;;  %v1751_v23 = vand.u32 2147483647, %v1495_v2  ;;  %v736_v63 = vmul.f32 -2.0, %v4659_v10 }
 0x14c   :  { %v3737_v62 = vpop.eup %3736  ;;  %3746 = vpow2.f32 %v1141_v9  ;;  %v2006_v22 = vmul.f32 %v3735_v53, %v1750_v12  ;;  %v1147_v39 = vmul.f32 1.442695, %v735_v54  ;;  %v224_v9 = vld [vmem:[#allocation3 + $0x4e8] sm:$0xff]  ;;  %v4687_v12 = vld [vmem:[#allocation6 + $0x520] sm:$0xff] }
 0x14d   :  { %v3280_v42 = vadd.f32 %v3279_v33, %v1998_v21  ;;  %v1497_v21 = vsub.f32 %v217_v7, %v4631_v8  ;;  %v1752_v33 = vand.u32 2147483647, %v1496_v11  ;;  %v737_v8 = vmul.f32 -2.0, %v4663_v20 }
 0x14e   :  { %v3739_v6 = vpop.eup %3738  ;;  %3748 = vpow2.f32 %v1143_v19  ;;  %v2007_v26 = vmul.f32 %v3737_v62, %v1751_v23  ;;  %v1149_v48 = vmul.f32 1.442695, %v736_v63  ;;  %v225_v19 = vld [vmem:[#allocation3 + $0x4f0] sm:$0xff]  ;;  %v4691_v23 = vld [vmem:[#allocation6 + $0x528] sm:$0xff] }
 0x14f   :  { %v3281_v51 = vadd.f32 %v3280_v42, %v1999_v31  ;;  %v1498_v31 = vsub.f32 %v218_v16, %v4635_v18  ;;  %v1753_v42 = vand.u32 2147483647, %v1497_v21  ;;  %v738_v18 = vmul.f32 -2.0, %v4667_v30 }
 0x150   :  { %v3741_v15 = vpop.eup %3740  ;;  %3750 = vpow2.f32 %v1145_v29  ;;  %v2008_v32 = vmul.f32 %v3739_v6, %v1752_v33  ;;  %v1151_v57 = vmul.f32 1.442695, %v737_v8  ;;  %v226_v29 = vld [vmem:[#allocation3 + $0x4f8] sm:$0xff]  ;;  %v4695_v33 = vld [vmem:[#allocation6 + $0x530] sm:$0xff] }
 0x151   :  { %v3282_v60 = vadd.f32 %v3281_v51, %v2000_v41  ;;  %v1499_v41 = vsub.f32 %v219_v27, %v4639_v28  ;;  %v1754_v51 = vand.u32 2147483647, %v1498_v31  ;;  %v739_v28 = vmul.f32 -2.0, %v4671_v40 }
 0x152   :  { %v3743_v25 = vpop.eup %3742  ;;  %3752 = vpow2.f32 %v1147_v39  ;;  %v2009_v38 = vmul.f32 %v3741_v15, %v1753_v42  ;;  %v1153_v2 = vmul.f32 1.442695, %v738_v18  ;;  %v227_v39 = vld [vmem:[#allocation3 + $0x500] sm:$0xff]  ;;  %v4699_v42 = vld [vmem:[#allocation6 + $0x538] sm:$0xff] }
 0x153   :  { %v3283_v5 = vadd.f32 %v3282_v60, %v2001_v50  ;;  %v1500_v50 = vsub.f32 %v220_v36, %v4643_v37  ;;  %v1755_v60 = vand.u32 2147483647, %v1499_v41  ;;  %v740_v37 = vmul.f32 -2.0, %v4675_v49 }
 0x154   :  { %v3745_v35 = vpop.eup %3744  ;;  %3754 = vpow2.f32 %v1149_v48  ;;  %v2010_v46 = vmul.f32 %v3743_v25, %v1754_v51  ;;  %v1155_v11 = vmul.f32 1.442695, %v739_v28  ;;  %v228_v48 = vld [vmem:[#allocation3 + $0x508] sm:$0xff]  ;;  %v4703_v51 = vld [vmem:[#allocation6 + $0x540] sm:$0xff] }
 0x155   :  { %v3284_v14 = vadd.f32 %v3283_v5, %v2002_v59  ;;  %v1501_v59 = vsub.f32 %v221_v45, %v4647_v47  ;;  %v1756_v5 = vand.u32 2147483647, %v1500_v50  ;;  %v741_v47 = vmul.f32 -2.0, %v4679_v58 }
 0x156   :  { %v3747_v44 = vpop.eup %3746  ;;  %3756 = vpow2.f32 %v1151_v57  ;;  %v2011_v53 = vmul.f32 %v3745_v35, %v1755_v60  ;;  %v1157_v21 = vmul.f32 1.442695, %v740_v37  ;;  %v229_v57 = vld [vmem:[#allocation3 + $0x510] sm:$0xff]  ;;  %v4707_v60 = vld [vmem:[#allocation6 + $0x548] sm:$0xff] }
 0x157   :  { %v3285_v24 = vadd.f32 %v3284_v14, %v2003_v4  ;;  %v1502_v4 = vsub.f32 %v222_v55, %v4651_v56  ;;  %v1757_v14 = vand.u32 2147483647, %v1501_v59  ;;  %v742_v56 = vmul.f32 -2.0, %v4683_v3 }
 0x158   :  { %v3749_v54 = vpop.eup %3748  ;;  %3758 = vpow2.f32 %v1153_v2  ;;  %v2012_v62 = vmul.f32 %v3747_v44, %v1756_v5  ;;  %v1159_v31 = vmul.f32 1.442695, %v741_v47  ;;  %v230_v2 = vld [vmem:[#allocation3 + $0x518] sm:$0xff]  ;;  %v4711_v5 = vld [vmem:[#allocation6 + $0x550] sm:$0xff] }
 0x159   :  { %v3286_v34 = vadd.f32 %v3285_v24, %v2004_v13  ;;  %v1503_v13 = vsub.f32 %v223_v0, %v4655_v1  ;;  %v1758_v24 = vand.u32 2147483647, %v1502_v4  ;;  %v743_v1 = vmul.f32 -2.0, %v4687_v12 }
 0x15a   :  { %v3751_v63 = vpop.eup %3750  ;;  %3760 = vpow2.f32 %v1155_v11  ;;  %v2013_v6 = vmul.f32 %v3749_v54, %v1757_v14  ;;  %v1161_v41 = vmul.f32 1.442695, %v742_v56  ;;  %v231_v11 = vld [vmem:[#allocation3 + $0x520] sm:$0xff]  ;;  %v4715_v14 = vld [vmem:[#allocation6 + $0x558] sm:$0xff] }
 0x15b   :  { %v3287_v43 = vadd.f32 %v3286_v34, %v2005_v17  ;;  %v1504_v17 = vsub.f32 %v224_v9, %v4659_v10  ;;  %v1759_v34 = vand.u32 2147483647, %v1503_v13  ;;  %v744_v10 = vmul.f32 -2.0, %v4691_v23 }
 0x15c   :  { %v3753_v8 = vpop.eup %3752  ;;  %3762 = vpow2.f32 %v1157_v21  ;;  %v2014_v15 = vmul.f32 %v3751_v63, %v1758_v24  ;;  %v1163_v50 = vmul.f32 1.442695, %v743_v1  ;;  %v232_v21 = vld [vmem:[#allocation3 + $0x528] sm:$0xff]  ;;  %v4719_v24 = vld [vmem:[#allocation6 + $0x560] sm:$0xff] }
 0x15d   :  { %v3288_v52 = vadd.f32 %v3287_v43, %v2006_v22  ;;  %v1505_v22 = vsub.f32 %v225_v19, %v4663_v20  ;;  %v1760_v43 = vand.u32 2147483647, %v1504_v17  ;;  %v745_v20 = vmul.f32 -2.0, %v4695_v33 }
 0x15e   :  { %v3755_v18 = vpop.eup %3754  ;;  %3764 = vpow2.f32 %v1159_v31  ;;  %v2015_v25 = vmul.f32 %v3753_v8, %v1759_v34  ;;  %v1165_v59 = vmul.f32 1.442695, %v744_v10  ;;  %v233_v31 = vld [vmem:[#allocation3 + $0x530] sm:$0xff]  ;;  %v4723_v34 = vld [vmem:[#allocation6 + $0x568] sm:$0xff] }
 0x15f   :  { %v3289_v61 = vadd.f32 %v3288_v52, %v2007_v26  ;;  %v1506_v26 = vsub.f32 %v226_v29, %v4667_v30  ;;  %v1761_v52 = vand.u32 2147483647, %v1505_v22  ;;  %v746_v30 = vmul.f32 -2.0, %v4699_v42 }
 0x160   :  { %v3757_v28 = vpop.eup %3756  ;;  %3766 = vpow2.f32 %v1161_v41  ;;  %v2016_v35 = vmul.f32 %v3755_v18, %v1760_v43  ;;  %v1167_v4 = vmul.f32 1.442695, %v745_v20  ;;  %v234_v41 = vld [vmem:[#allocation3 + $0x538] sm:$0xff]  ;;  %v4727_v43 = vld [vmem:[#allocation6 + $0x570] sm:$0xff] }
 0x161   :  { %v3290_v7 = vadd.f32 %v3289_v61, %v2008_v32  ;;  %v1507_v32 = vsub.f32 %v227_v39, %v4671_v40  ;;  %v1762_v61 = vand.u32 2147483647, %v1506_v26  ;;  %v747_v40 = vmul.f32 -2.0, %v4703_v51 }
 0x162   :  { %v3759_v37 = vpop.eup %3758  ;;  %3768 = vpow2.f32 %v1163_v50  ;;  %v2017_v44 = vmul.f32 %v3757_v28, %v1761_v52  ;;  %v1169_v13 = vmul.f32 1.442695, %v746_v30  ;;  %v235_v50 = vld [vmem:[#allocation3 + $0x540] sm:$0xff]  ;;  %v4731_v52 = vld [vmem:[#allocation6 + $0x578] sm:$0xff] }
 0x163   :  { %v3291_v16 = vadd.f32 %v3290_v7, %v2009_v38  ;;  %v1508_v38 = vsub.f32 %v228_v48, %v4675_v49  ;;  %v1763_v7 = vand.u32 2147483647, %v1507_v32  ;;  %v748_v49 = vmul.f32 -2.0, %v4707_v60 }
 0x164   :  { %v3761_v47 = vpop.eup %3760  ;;  %3770 = vpow2.f32 %v1165_v59  ;;  %v2018_v54 = vmul.f32 %v3759_v37, %v1762_v61  ;;  %v1171_v17 = vmul.f32 1.442695, %v747_v40  ;;  %v236_v59 = vld [vmem:[#allocation3 + $0x548] sm:$0xff]  ;;  %v4735_v61 = vld [vmem:[#allocation6 + $0x580] sm:$0xff] }
 0x165   :  { %v3292_v27 = vadd.f32 %v3291_v16, %v2010_v46  ;;  %v1509_v46 = vsub.f32 %v229_v57, %v4679_v58  ;;  %v1764_v16 = vand.u32 2147483647, %v1508_v38  ;;  %v749_v58 = vmul.f32 -2.0, %v4711_v5 }
 0x166   :  { %v3763_v56 = vpop.eup %3762  ;;  %3772 = vpow2.f32 %v1167_v4  ;;  %v2019_v63 = vmul.f32 %v3761_v47, %v1763_v7  ;;  %v1173_v22 = vmul.f32 1.442695, %v748_v49  ;;  %v237_v4 = vld [vmem:[#allocation3 + $0x550] sm:$0xff]  ;;  %v4739_v7 = vld [vmem:[#allocation6 + $0x588] sm:$0xff] }
 0x167   :  { %v3293_v36 = vadd.f32 %v3292_v27, %v2011_v53  ;;  %v1510_v53 = vsub.f32 %v230_v2, %v4683_v3  ;;  %v1765_v27 = vand.u32 2147483647, %v1509_v46  ;;  %v750_v3 = vmul.f32 -2.0, %v4715_v14 }
 0x168   :  { %v3765_v1 = vpop.eup %3764  ;;  %3774 = vpow2.f32 %v1169_v13  ;;  %v2020_v8 = vmul.f32 %v3763_v56, %v1764_v16  ;;  %v1175_v26 = vmul.f32 1.442695, %v749_v58  ;;  %v238_v13 = vld [vmem:[#allocation3 + $0x558] sm:$0xff]  ;;  %v4743_v16 = vld [vmem:[#allocation6 + $0x590] sm:$0xff] }
 0x169   :  { %v3294_v45 = vadd.f32 %v3293_v36, %v2012_v62  ;;  %v1511_v62 = vsub.f32 %v231_v11, %v4687_v12  ;;  %v1766_v36 = vand.u32 2147483647, %v1510_v53  ;;  %v751_v12 = vmul.f32 -2.0, %v4719_v24 }
 0x16a   :  { %v3767_v10 = vpop.eup %3766  ;;  %3776 = vpow2.f32 %v1171_v17  ;;  %v2021_v18 = vmul.f32 %v3765_v1, %v1765_v27  ;;  %v1177_v32 = vmul.f32 1.442695, %v750_v3  ;;  %v239_v17 = vld [vmem:[#allocation3 + $0x560] sm:$0xff]  ;;  %v4747_v27 = vld [vmem:[#allocation6 + $0x598] sm:$0xff] }
 0x16b   :  { %v3295_v55 = vadd.f32 %v3294_v45, %v2013_v6  ;;  %v1512_v6 = vsub.f32 %v232_v21, %v4691_v23  ;;  %v1767_v45 = vand.u32 2147483647, %v1511_v62  ;;  %v752_v23 = vmul.f32 -2.0, %v4723_v34 }
 0x16c   :  { %v3769_v20 = vpop.eup %3768  ;;  %3778 = vpow2.f32 %v1173_v22  ;;  %v2022_v28 = vmul.f32 %v3767_v10, %v1766_v36  ;;  %v1179_v38 = vmul.f32 1.442695, %v751_v12  ;;  %v240_v22 = vld [vmem:[#allocation3 + $0x568] sm:$0xff]  ;;  %v4751_v36 = vld [vmem:[#allocation6 + $0x5a0] sm:$0xff] }
 0x16d   :  { %v3296_v0 = vadd.f32 %v3295_v55, %v2014_v15  ;;  %v1513_v15 = vsub.f32 %v233_v31, %v4695_v33  ;;  %v1768_v55 = vand.u32 2147483647, %v1512_v6  ;;  %v753_v33 = vmul.f32 -2.0, %v4727_v43 }
 0x16e   :  { %v3771_v30 = vpop.eup %3770  ;;  %3780 = vpow2.f32 %v1175_v26  ;;  %v2023_v37 = vmul.f32 %v3769_v20, %v1767_v45  ;;  %v1181_v46 = vmul.f32 1.442695, %v752_v23  ;;  %v241_v26 = vld [vmem:[#allocation3 + $0x570] sm:$0xff]  ;;  %v4755_v45 = vld [vmem:[#allocation6 + $0x5a8] sm:$0xff] }
 0x16f   :  { %v3297_v9 = vadd.f32 %v3296_v0, %v2015_v25  ;;  %v1514_v25 = vsub.f32 %v234_v41, %v4699_v42  ;;  %v1769_v0 = vand.u32 2147483647, %v1513_v15  ;;  %v754_v42 = vmul.f32 -2.0, %v4731_v52 }
 0x170   :  { %v3773_v40 = vpop.eup %3772  ;;  %3782 = vpow2.f32 %v1177_v32  ;;  %v2024_v47 = vmul.f32 %v3771_v30, %v1768_v55  ;;  %v1183_v53 = vmul.f32 1.442695, %v753_v33  ;;  %v242_v32 = vld [vmem:[#allocation3 + $0x578] sm:$0xff]  ;;  %v4759_v55 = vld [vmem:[#allocation6 + $0x5b0] sm:$0xff] }
 0x171   :  { %v3298_v19 = vadd.f32 %v3297_v9, %v2016_v35  ;;  %v1515_v35 = vsub.f32 %v235_v50, %v4703_v51  ;;  %v1770_v9 = vand.u32 2147483647, %v1514_v25  ;;  %v755_v51 = vmul.f32 -2.0, %v4735_v61 }
 0x172   :  { %v3775_v49 = vpop.eup %3774  ;;  %3784 = vpow2.f32 %v1179_v38  ;;  %v2025_v56 = vmul.f32 %v3773_v40, %v1769_v0  ;;  %v1185_v62 = vmul.f32 1.442695, %v754_v42  ;;  %v243_v38 = vld [vmem:[#allocation3 + $0x580] sm:$0xff]  ;;  %v4763_v0 = vld [vmem:[#allocation6 + $0x5b8] sm:$0xff] }
 0x173   :  { %v3299_v29 = vadd.f32 %v3298_v19, %v2017_v44  ;;  %v1516_v44 = vsub.f32 %v236_v59, %v4707_v60  ;;  %v1771_v19 = vand.u32 2147483647, %v1515_v35  ;;  %v756_v60 = vmul.f32 -2.0, %v4739_v7 }
 0x174   :  { %v3777_v58 = vpop.eup %3776  ;;  %3786 = vpow2.f32 %v1181_v46  ;;  %v2026_v1 = vmul.f32 %v3775_v49, %v1770_v9  ;;  %v1187_v6 = vmul.f32 1.442695, %v755_v51  ;;  %v244_v46 = vld [vmem:[#allocation3 + $0x588] sm:$0xff]  ;;  %v4767_v9 = vld [vmem:[#allocation6 + $0x5c0] sm:$0xff] }
 0x175   :  { %v3300_v39 = vadd.f32 %v3299_v29, %v2018_v54  ;;  %v1517_v54 = vsub.f32 %v237_v4, %v4711_v5  ;;  %v1772_v29 = vand.u32 2147483647, %v1516_v44  ;;  %v757_v5 = vmul.f32 -2.0, %v4743_v16 }
 0x176   :  { %v3779_v3 = vpop.eup %3778  ;;  %3788 = vpow2.f32 %v1183_v53  ;;  %v2027_v10 = vmul.f32 %v3777_v58, %v1771_v19  ;;  %v1189_v15 = vmul.f32 1.442695, %v756_v60  ;;  %v245_v53 = vld [vmem:[#allocation3 + $0x590] sm:$0xff]  ;;  %v4771_v19 = vld [vmem:[#allocation6 + $0x5c8] sm:$0xff] }
 0x177   :  { %v3301_v48 = vadd.f32 %v3300_v39, %v2019_v63  ;;  %v1518_v63 = vsub.f32 %v238_v13, %v4715_v14  ;;  %v1773_v39 = vand.u32 2147483647, %v1517_v54  ;;  %v758_v14 = vmul.f32 -2.0, %v4747_v27 }
 0x178   :  { %v3781_v12 = vpop.eup %3780  ;;  %3790 = vpow2.f32 %v1185_v62  ;;  %v2028_v20 = vmul.f32 %v3779_v3, %v1772_v29  ;;  %v1191_v25 = vmul.f32 1.442695, %v757_v5  ;;  %v246_v62 = vld [vmem:[#allocation3 + $0x598] sm:$0xff]  ;;  %v4775_v29 = vld [vmem:[#allocation6 + $0x5d0] sm:$0xff] }
 0x179   :  { %v3302_v57 = vadd.f32 %v3301_v48, %v2020_v8  ;;  %v1519_v8 = vsub.f32 %v239_v17, %v4719_v24  ;;  %v1774_v48 = vand.u32 2147483647, %v1518_v63  ;;  %v759_v24 = vmul.f32 -2.0, %v4751_v36 }
 0x17a   :  { %v3783_v23 = vpop.eup %3782  ;;  %3792 = vpow2.f32 %v1187_v6  ;;  %v2029_v30 = vmul.f32 %v3781_v12, %v1773_v39  ;;  %v1193_v35 = vmul.f32 1.442695, %v758_v14  ;;  %v247_v6 = vld [vmem:[#allocation3 + $0x5a0] sm:$0xff]  ;;  %v4779_v39 = vld [vmem:[#allocation6 + $0x5d8] sm:$0xff] }
 0x17b   :  { %v3303_v2 = vadd.f32 %v3302_v57, %v2021_v18  ;;  %v1520_v18 = vsub.f32 %v240_v22, %v4723_v34  ;;  %v1775_v57 = vand.u32 2147483647, %v1519_v8  ;;  %v760_v34 = vmul.f32 -2.0, %v4755_v45 }
 0x17c   :  { %v3785_v33 = vpop.eup %3784  ;;  %3794 = vpow2.f32 %v1189_v15  ;;  %v2030_v40 = vmul.f32 %v3783_v23, %v1774_v48  ;;  %v1195_v44 = vmul.f32 1.442695, %v759_v24  ;;  %v248_v15 = vld [vmem:[#allocation3 + $0x5a8] sm:$0xff]  ;;  %v4783_v48 = vld [vmem:[#allocation6 + $0x5e0] sm:$0xff] }
 0x17d   :  { %v3304_v11 = vadd.f32 %v3303_v2, %v2022_v28  ;;  %v1521_v28 = vsub.f32 %v241_v26, %v4727_v43  ;;  %v1776_v2 = vand.u32 2147483647, %v1520_v18  ;;  %v761_v43 = vmul.f32 -2.0, %v4759_v55 }
 0x17e   :  { %v3787_v42 = vpop.eup %3786  ;;  %3796 = vpow2.f32 %v1191_v25  ;;  %v2031_v49 = vmul.f32 %v3785_v33, %v1775_v57  ;;  %v1197_v54 = vmul.f32 1.442695, %v760_v34  ;;  %v249_v25 = vld [vmem:[#allocation3 + $0x5b0] sm:$0xff]  ;;  %v4787_v57 = vld [vmem:[#allocation6 + $0x5e8] sm:$0xff] }
 0x17f   :  { %v3305_v21 = vadd.f32 %v3304_v11, %v2023_v37  ;;  %v1522_v37 = vsub.f32 %v242_v32, %v4731_v52  ;;  %v1777_v11 = vand.u32 2147483647, %v1521_v28  ;;  %v762_v52 = vmul.f32 -2.0, %v4763_v0 }
 0x180   :  { %v3789_v51 = vpop.eup %3788  ;;  %3798 = vpow2.f32 %v1193_v35  ;;  %v2032_v58 = vmul.f32 %v3787_v42, %v1776_v2  ;;  %v1199_v63 = vmul.f32 1.442695, %v761_v43  ;;  %v250_v35 = vld [vmem:[#allocation3 + $0x5b8] sm:$0xff]  ;;  %v4791_v2 = vld [vmem:[#allocation6 + $0x5f0] sm:$0xff] }
 0x181   :  { %v3306_v31 = vadd.f32 %v3305_v21, %v2024_v47  ;;  %v1523_v47 = vsub.f32 %v243_v38, %v4735_v61  ;;  %v1778_v21 = vand.u32 2147483647, %v1522_v37  ;;  %v763_v61 = vmul.f32 -2.0, %v4767_v9 }
 0x182   :  { %v3791_v60 = vpop.eup %3790  ;;  %3800 = vpow2.f32 %v1195_v44  ;;  %v2033_v3 = vmul.f32 %v3789_v51, %v1777_v11  ;;  %v1201_v8 = vmul.f32 1.442695, %v762_v52  ;;  %v251_v44 = vld [vmem:[#allocation3 + $0x5c0] sm:$0xff]  ;;  %v4795_v11 = vld [vmem:[#allocation6 + $0x5f8] sm:$0xff] }
 0x183   :  { %v3307_v41 = vadd.f32 %v3306_v31, %v2025_v56  ;;  %v1524_v56 = vsub.f32 %v244_v46, %v4739_v7  ;;  %v1779_v31 = vand.u32 2147483647, %v1523_v47  ;;  %v764_v7 = vmul.f32 -2.0, %v4771_v19 }
 0x184   :  { %v3793_v5 = vpop.eup %3792  ;;  %3802 = vpow2.f32 %v1197_v54  ;;  %v2034_v12 = vmul.f32 %v3791_v60, %v1778_v21  ;;  %v1203_v18 = vmul.f32 1.442695, %v763_v61  ;;  %v252_v54 = vld [vmem:[#allocation3 + $0x5c8] sm:$0xff]  ;;  %v4799_v21 = vld [vmem:[#allocation6 + $0x600] sm:$0xff] }
 0x185   :  { %v3308_v50 = vadd.f32 %v3307_v41, %v2026_v1  ;;  %v1525_v1 = vsub.f32 %v245_v53, %v4743_v16  ;;  %v1780_v41 = vand.u32 2147483647, %v1524_v56  ;;  %v765_v16 = vmul.f32 -2.0, %v4775_v29 }
 0x186   :  { %v3795_v14 = vpop.eup %3794  ;;  %3804 = vpow2.f32 %v1199_v63  ;;  %v2035_v23 = vmul.f32 %v3793_v5, %v1779_v31  ;;  %v1205_v28 = vmul.f32 1.442695, %v764_v7  ;;  %v253_v63 = vld [vmem:[#allocation3 + $0x5d0] sm:$0xff]  ;;  %v4803_v31 = vld [vmem:[#allocation6 + $0x608] sm:$0xff] }
 0x187   :  { %v3309_v59 = vadd.f32 %v3308_v50, %v2027_v10  ;;  %v1526_v10 = vsub.f32 %v246_v62, %v4747_v27  ;;  %v1781_v50 = vand.u32 2147483647, %v1525_v1  ;;  %v766_v27 = vmul.f32 -2.0, %v4779_v39 }
 0x188   :  { %v3797_v24 = vpop.eup %3796  ;;  %3806 = vpow2.f32 %v1201_v8  ;;  %v2036_v33 = vmul.f32 %v3795_v14, %v1780_v41  ;;  %v1207_v37 = vmul.f32 1.442695, %v765_v16  ;;  %v254_v8 = vld [vmem:[#allocation3 + $0x5d8] sm:$0xff]  ;;  %v4807_v41 = vld [vmem:[#allocation6 + $0x610] sm:$0xff] }
 0x189   :  { %v3310_v4 = vadd.f32 %v3309_v59, %v2028_v20  ;;  %v1527_v20 = vsub.f32 %v247_v6, %v4751_v36  ;;  %v1782_v59 = vand.u32 2147483647, %v1526_v10  ;;  %v767_v36 = vmul.f32 -2.0, %v4783_v48 }
 0x18a   :  { %v3799_v34 = vpop.eup %3798  ;;  %3808 = vpow2.f32 %v1203_v18  ;;  %v2037_v42 = vmul.f32 %v3797_v24, %v1781_v50  ;;  %v1209_v47 = vmul.f32 1.442695, %v766_v27  ;;  %v255_v18 = vld [vmem:[#allocation3 + $0x5e0] sm:$0xff]  ;;  %v4811_v50 = vld [vmem:[#allocation6 + $0x618] sm:$0xff] }
 0x18b   :  { %v3311_v13 = vadd.f32 %v3310_v4, %v2029_v30  ;;  %v1528_v30 = vsub.f32 %v248_v15, %v4755_v45  ;;  %v1783_v4 = vand.u32 2147483647, %v1527_v20  ;;  %v768_v45 = vmul.f32 -2.0, %v4787_v57 }
 0x18c   :  { %v3801_v43 = vpop.eup %3800  ;;  %3810 = vpow2.f32 %v1205_v28  ;;  %v2038_v51 = vmul.f32 %v3799_v34, %v1782_v59  ;;  %v1211_v56 = vmul.f32 1.442695, %v767_v36  ;;  %v256_v28 = vld [vmem:[#allocation3 + $0x5e8] sm:$0xff]  ;;  %v4815_v59 = vld [vmem:[#allocation6 + $0x620] sm:$0xff] }
 0x18d   :  { %v3312_v17 = vadd.f32 %v3311_v13, %v2030_v40  ;;  %v1529_v40 = vsub.f32 %v249_v25, %v4759_v55  ;;  %v1784_v13 = vand.u32 2147483647, %v1528_v30  ;;  %v769_v55 = vmul.f32 -2.0, %v4791_v2 }
 0x18e   :  { %v3803_v52 = vpop.eup %3802  ;;  %3812 = vpow2.f32 %v1207_v37  ;;  %v2039_v60 = vmul.f32 %v3801_v43, %v1783_v4  ;;  %v1213_v1 = vmul.f32 1.442695, %v768_v45  ;;  %v257_v37 = vld [vmem:[#allocation3 + $0x5f0] sm:$0xff]  ;;  %v4819_v4 = vld [vmem:[#allocation6 + $0x628] sm:$0xff] }
 0x18f   :  { %v3313_v22 = vadd.f32 %v3312_v17, %v2031_v49  ;;  %v1530_v49 = vsub.f32 %v250_v35, %v4763_v0  ;;  %v1785_v17 = vand.u32 2147483647, %v1529_v40  ;;  %v770_v0 = vmul.f32 -2.0, %v4795_v11 }
 0x190   :  { %v3805_v61 = vpop.eup %3804  ;;  %3814 = vpow2.f32 %v1209_v47  ;;  %v2040_v5 = vmul.f32 %v3803_v52, %v1784_v13  ;;  %v1215_v10 = vmul.f32 1.442695, %v769_v55  ;;  %v258_v47 = vld [vmem:[#allocation3 + $0x5f8] sm:$0xff]  ;;  %v4823_v13 = vld [vmem:[#allocation6 + $0x630] sm:$0xff] }
 0x191   :  { %v3314_v26 = vadd.f32 %v3313_v22, %v2032_v58  ;;  %v1531_v58 = vsub.f32 %v251_v44, %v4767_v9  ;;  %v1786_v22 = vand.u32 2147483647, %v1530_v49  ;;  %v771_v9 = vmul.f32 -2.0, %v4799_v21 }
 0x192   :  { %v3807_v7 = vpop.eup %3806  ;;  %3816 = vpow2.f32 %v1211_v56  ;;  %v2041_v14 = vmul.f32 %v3805_v61, %v1785_v17  ;;  %v1217_v20 = vmul.f32 1.442695, %v770_v0  ;;  %v259_v56 = vld [vmem:[#allocation3 + $0x600] sm:$0xff]  ;;  %v4827_v17 = vld [vmem:[#allocation6 + $0x638] sm:$0xff] }
 0x193   :  { %v3315_v32 = vadd.f32 %v3314_v26, %v2033_v3  ;;  %v1532_v3 = vsub.f32 %v252_v54, %v4771_v19  ;;  %v1787_v26 = vand.u32 2147483647, %v1531_v58  ;;  %v772_v19 = vmul.f32 -2.0, %v4803_v31 }
 0x194   :  { %v3809_v16 = vpop.eup %3808  ;;  %3818 = vpow2.f32 %v1213_v1  ;;  %v2042_v24 = vmul.f32 %v3807_v7, %v1786_v22  ;;  %v1219_v30 = vmul.f32 1.442695, %v771_v9  ;;  %v260_v1 = vld [vmem:[#allocation3 + $0x608] sm:$0xff]  ;;  %v4831_v22 = vld [vmem:[#allocation6 + $0x640] sm:$0xff] }
 0x195   :  { %v3316_v38 = vadd.f32 %v3315_v32, %v2034_v12  ;;  %v1533_v12 = vsub.f32 %v253_v63, %v4775_v29  ;;  %v1788_v32 = vand.u32 2147483647, %v1532_v3  ;;  %v773_v29 = vmul.f32 -2.0, %v4807_v41 }
 0x196   :  { %v3811_v27 = vpop.eup %3810  ;;  %3820 = vpow2.f32 %v1215_v10  ;;  %v2043_v34 = vmul.f32 %v3809_v16, %v1787_v26  ;;  %v1221_v40 = vmul.f32 1.442695, %v772_v19  ;;  %v261_v10 = vld [vmem:[#allocation3 + $0x610] sm:$0xff]  ;;  %v4835_v26 = vld [vmem:[#allocation6 + $0x648] sm:$0xff] }
 0x197   :  { %v3317_v46 = vadd.f32 %v3316_v38, %v2035_v23  ;;  %v1534_v23 = vsub.f32 %v254_v8, %v4779_v39  ;;  %v1789_v38 = vand.u32 2147483647, %v1533_v12  ;;  %v774_v39 = vmul.f32 -2.0, %v4811_v50 }
 0x198   :  { %v3813_v36 = vpop.eup %3812  ;;  %3822 = vpow2.f32 %v1217_v20  ;;  %v2044_v43 = vmul.f32 %v3811_v27, %v1788_v32  ;;  %v1223_v49 = vmul.f32 1.442695, %v773_v29  ;;  %v262_v20 = vld [vmem:[#allocation3 + $0x618] sm:$0xff]  ;;  %v4839_v32 = vld [vmem:[#allocation6 + $0x650] sm:$0xff] }
 0x199   :  { %v3318_v53 = vadd.f32 %v3317_v46, %v2036_v33  ;;  %v1535_v33 = vsub.f32 %v255_v18, %v4783_v48  ;;  %v1790_v46 = vand.u32 2147483647, %v1534_v23  ;;  %v775_v48 = vmul.f32 -2.0, %v4815_v59 }
 0x19a   :  { %v3815_v45 = vpop.eup %3814  ;;  %3824 = vpow2.f32 %v1219_v30  ;;  %v2045_v52 = vmul.f32 %v3813_v36, %v1789_v38  ;;  %v1225_v58 = vmul.f32 1.442695, %v774_v39  ;;  %v263_v30 = vld [vmem:[#allocation3 + $0x620] sm:$0xff]  ;;  %v4843_v38 = vld [vmem:[#allocation6 + $0x658] sm:$0xff] }
 0x19b   :  { %v3319_v62 = vadd.f32 %v3318_v53, %v2037_v42  ;;  %v1536_v42 = vsub.f32 %v256_v28, %v4787_v57  ;;  %v1791_v53 = vand.u32 2147483647, %v1535_v33  ;;  %v776_v57 = vmul.f32 -2.0, %v4819_v4 }
 0x19c   :  { %v3817_v55 = vpop.eup %3816  ;;  %3826 = vpow2.f32 %v1221_v40  ;;  %v2046_v61 = vmul.f32 %v3815_v45, %v1790_v46  ;;  %v1227_v3 = vmul.f32 1.442695, %v775_v48  ;;  %v264_v40 = vld [vmem:[#allocation3 + $0x628] sm:$0xff]  ;;  %v4847_v46 = vld [vmem:[#allocation6 + $0x660] sm:$0xff] }
 0x19d   :  { %v3320_v6 = vadd.f32 %v3319_v62, %v2038_v51  ;;  %v1537_v51 = vsub.f32 %v257_v37, %v4791_v2  ;;  %v1792_v62 = vand.u32 2147483647, %v1536_v42  ;;  %v777_v2 = vmul.f32 -2.0, %v4823_v13 }
 0x19e   :  { %v3819_v0 = vpop.eup %3818  ;;  %3828 = vpow2.f32 %v1223_v49  ;;  %v2047_v7 = vmul.f32 %v3817_v55, %v1791_v53  ;;  %v1229_v12 = vmul.f32 1.442695, %v776_v57  ;;  %v265_v49 = vld [vmem:[#allocation3 + $0x630] sm:$0xff]  ;;  %v4851_v53 = vld [vmem:[#allocation6 + $0x668] sm:$0xff] }
 0x19f   :  { %v3321_v15 = vadd.f32 %v3320_v6, %v2039_v60  ;;  %v1538_v60 = vsub.f32 %v258_v47, %v4795_v11  ;;  %v1793_v6 = vand.u32 2147483647, %v1537_v51  ;;  %v778_v11 = vmul.f32 -2.0, %v4827_v17 }
 0x1a0   :  { %v3821_v9 = vpop.eup %3820  ;;  %3830 = vpow2.f32 %v1225_v58  ;;  %v2048_v16 = vmul.f32 %v3819_v0, %v1792_v62  ;;  %v1231_v23 = vmul.f32 1.442695, %v777_v2  ;;  %v266_v58 = vld [vmem:[#allocation3 + $0x638] sm:$0xff]  ;;  %v4855_v62 = vld [vmem:[#allocation6 + $0x670] sm:$0xff] }
 0x1a1   :  { %v3322_v25 = vadd.f32 %v3321_v15, %v2040_v5  ;;  %v1539_v5 = vsub.f32 %v259_v56, %v4799_v21  ;;  %v1794_v15 = vand.u32 2147483647, %v1538_v60  ;;  %v779_v21 = vmul.f32 -2.0, %v4831_v22 }
 0x1a2   :  { %v3823_v19 = vpop.eup %3822  ;;  %3832 = vpow2.f32 %v1227_v3  ;;  %v2049_v27 = vmul.f32 %v3821_v9, %v1793_v6  ;;  %v1233_v33 = vmul.f32 1.442695, %v778_v11  ;;  %v267_v3 = vld [vmem:[#allocation3 + $0x640] sm:$0xff]  ;;  %v4859_v6 = vld [vmem:[#allocation6 + $0x678] sm:$0xff] }
 0x1a3   :  { %v3323_v35 = vadd.f32 %v3322_v25, %v2041_v14  ;;  %v1540_v14 = vsub.f32 %v260_v1, %v4803_v31  ;;  %v1795_v25 = vand.u32 2147483647, %v1539_v5  ;;  %v780_v31 = vmul.f32 -2.0, %v4835_v26 }
 0x1a4   :  { %v3825_v29 = vpop.eup %3824  ;;  %3834 = vpow2.f32 %v1229_v12  ;;  %v2050_v36 = vmul.f32 %v3823_v19, %v1794_v15  ;;  %v1235_v42 = vmul.f32 1.442695, %v779_v21  ;;  %v268_v12 = vld [vmem:[#allocation3 + $0x648] sm:$0xff]  ;;  %v4863_v15 = vld [vmem:[#allocation6 + $0x680] sm:$0xff] }
 0x1a5   :  { %v3324_v44 = vadd.f32 %v3323_v35, %v2042_v24  ;;  %v1541_v24 = vsub.f32 %v261_v10, %v4807_v41  ;;  %v1796_v35 = vand.u32 2147483647, %v1540_v14  ;;  %v781_v41 = vmul.f32 -2.0, %v4839_v32 }
 0x1a6   :  { %v3827_v39 = vpop.eup %3826  ;;  %3836 = vpow2.f32 %v1231_v23  ;;  %v2051_v45 = vmul.f32 %v3825_v29, %v1795_v25  ;;  %v1237_v51 = vmul.f32 1.442695, %v780_v31  ;;  %v269_v23 = vld [vmem:[#allocation3 + $0x650] sm:$0xff]  ;;  %v4867_v25 = vld [vmem:[#allocation6 + $0x688] sm:$0xff] }
 0x1a7   :  { %v3325_v54 = vadd.f32 %v3324_v44, %v2043_v34  ;;  %v1542_v34 = vsub.f32 %v262_v20, %v4811_v50  ;;  %v1797_v44 = vand.u32 2147483647, %v1541_v24  ;;  %v782_v50 = vmul.f32 -2.0, %v4843_v38 }
 0x1a8   :  { %v3829_v48 = vpop.eup %3828  ;;  %3838 = vpow2.f32 %v1233_v33  ;;  %v2052_v55 = vmul.f32 %v3827_v39, %v1796_v35  ;;  %v1239_v60 = vmul.f32 1.442695, %v781_v41  ;;  %v270_v33 = vld [vmem:[#allocation3 + $0x658] sm:$0xff]  ;;  %v4871_v35 = vld [vmem:[#allocation6 + $0x690] sm:$0xff] }
 0x1a9   :  { %v3326_v63 = vadd.f32 %v3325_v54, %v2044_v43  ;;  %v1543_v43 = vsub.f32 %v263_v30, %v4815_v59  ;;  %v1798_v54 = vand.u32 2147483647, %v1542_v34  ;;  %v783_v59 = vmul.f32 -2.0, %v4847_v46 }
 0x1aa   :  { %v3831_v57 = vpop.eup %3830  ;;  %3840 = vpow2.f32 %v1235_v42  ;;  %v2053_v0 = vmul.f32 %v3829_v48, %v1797_v44  ;;  %v1241_v5 = vmul.f32 1.442695, %v782_v50  ;;  %v271_v42 = vld [vmem:[#allocation3 + $0x660] sm:$0xff]  ;;  %v4875_v44 = vld [vmem:[#allocation6 + $0x698] sm:$0xff] }
 0x1ab   :  { %v3327_v8 = vadd.f32 %v3326_v63, %v2045_v52  ;;  %v1544_v52 = vsub.f32 %v264_v40, %v4819_v4  ;;  %v1799_v63 = vand.u32 2147483647, %v1543_v43  ;;  %v784_v4 = vmul.f32 -2.0, %v4851_v53 }
 0x1ac   :  { %v3833_v2 = vpop.eup %3832  ;;  %3842 = vpow2.f32 %v1237_v51  ;;  %v2054_v9 = vmul.f32 %v3831_v57, %v1798_v54  ;;  %v1243_v14 = vmul.f32 1.442695, %v783_v59  ;;  %v272_v51 = vld [vmem:[#allocation3 + $0x668] sm:$0xff]  ;;  %v4879_v54 = vld [vmem:[#allocation6 + $0x6a0] sm:$0xff] }
 0x1ad   :  { %v3328_v18 = vadd.f32 %v3327_v8, %v2046_v61  ;;  %v1545_v61 = vsub.f32 %v265_v49, %v4823_v13  ;;  %v1800_v8 = vand.u32 2147483647, %v1544_v52  ;;  %v785_v13 = vmul.f32 -2.0, %v4855_v62 }
 0x1ae   :  { %v3835_v11 = vpop.eup %3834  ;;  %3844 = vpow2.f32 %v1239_v60  ;;  %v2055_v19 = vmul.f32 %v3833_v2, %v1799_v63  ;;  %v1245_v24 = vmul.f32 1.442695, %v784_v4  ;;  %v273_v60 = vld [vmem:[#allocation3 + $0x670] sm:$0xff]  ;;  %v4883_v63 = vld [vmem:[#allocation6 + $0x6a8] sm:$0xff] }
 0x1af   :  { %v3329_v28 = vadd.f32 %v3328_v18, %v2047_v7  ;;  %v1546_v7 = vsub.f32 %v266_v58, %v4827_v17  ;;  %v1801_v18 = vand.u32 2147483647, %v1545_v61  ;;  %v786_v17 = vmul.f32 -2.0, %v4859_v6 }
 0x1b0   :  { %v3837_v21 = vpop.eup %3836  ;;  %3846 = vpow2.f32 %v1241_v5  ;;  %v2056_v29 = vmul.f32 %v3835_v11, %v1800_v8  ;;  %v1247_v34 = vmul.f32 1.442695, %v785_v13  ;;  %v274_v5 = vld [vmem:[#allocation3 + $0x678] sm:$0xff]  ;;  %v4887_v8 = vld [vmem:[#allocation6 + $0x6b0] sm:$0xff] }
 0x1b1   :  { %v3330_v37 = vadd.f32 %v3329_v28, %v2048_v16  ;;  %v1547_v16 = vsub.f32 %v267_v3, %v4831_v22  ;;  %v1802_v28 = vand.u32 2147483647, %v1546_v7  ;;  %v787_v22 = vmul.f32 -2.0, %v4863_v15 }
 0x1b2   :  { %v3839_v31 = vpop.eup %3838  ;;  %3848 = vpow2.f32 %v1243_v14  ;;  %v2057_v39 = vmul.f32 %v3837_v21, %v1801_v18  ;;  %v1249_v43 = vmul.f32 1.442695, %v786_v17  ;;  %v275_v14 = vld [vmem:[#allocation3 + $0x680] sm:$0xff]  ;;  %v4891_v18 = vld [vmem:[#allocation6 + $0x6b8] sm:$0xff] }
 0x1b3   :  { %v3331_v47 = vadd.f32 %v3330_v37, %v2049_v27  ;;  %v1548_v27 = vsub.f32 %v268_v12, %v4835_v26  ;;  %v1803_v37 = vand.u32 2147483647, %v1547_v16  ;;  %v788_v26 = vmul.f32 -2.0, %v4867_v25 }
 0x1b4   :  { %v3841_v41 = vpop.eup %3840  ;;  %3850 = vpow2.f32 %v1245_v24  ;;  %v2058_v48 = vmul.f32 %v3839_v31, %v1802_v28  ;;  %v1251_v52 = vmul.f32 1.442695, %v787_v22  ;;  %v276_v24 = vld [vmem:[#allocation3 + $0x688] sm:$0xff]  ;;  %v4895_v28 = vld [vmem:[#allocation6 + $0x6c0] sm:$0xff] }
 0x1b5   :  { %v3332_v56 = vadd.f32 %v3331_v47, %v2050_v36  ;;  %v1549_v36 = vsub.f32 %v269_v23, %v4839_v32  ;;  %v1804_v47 = vand.u32 2147483647, %v1548_v27  ;;  %v789_v32 = vmul.f32 -2.0, %v4871_v35 }
 0x1b6   :  { %v3843_v50 = vpop.eup %3842  ;;  %3852 = vpow2.f32 %v1247_v34  ;;  %v2059_v57 = vmul.f32 %v3841_v41, %v1803_v37  ;;  %v1253_v61 = vmul.f32 1.442695, %v788_v26  ;;  %v277_v34 = vld [vmem:[#allocation3 + $0x690] sm:$0xff]  ;;  %v4899_v37 = vld [vmem:[#allocation6 + $0x6c8] sm:$0xff] }
 0x1b7   :  { %v3333_v1 = vadd.f32 %v3332_v56, %v2051_v45  ;;  %v1550_v45 = vsub.f32 %v270_v33, %v4843_v38  ;;  %v1805_v56 = vand.u32 2147483647, %v1549_v36  ;;  %v790_v38 = vmul.f32 -2.0, %v4875_v44 }
 0x1b8   :  { %v3845_v59 = vpop.eup %3844  ;;  %3854 = vpow2.f32 %v1249_v43  ;;  %v2060_v2 = vmul.f32 %v3843_v50, %v1804_v47  ;;  %v1255_v7 = vmul.f32 1.442695, %v789_v32  ;;  %v278_v43 = vld [vmem:[#allocation3 + $0x698] sm:$0xff]  ;;  %v4903_v47 = vld [vmem:[#allocation6 + $0x6d0] sm:$0xff] }
 0x1b9   :  { %v3334_v10 = vadd.f32 %v3333_v1, %v2052_v55  ;;  %v1551_v55 = vsub.f32 %v271_v42, %v4847_v46  ;;  %v1806_v1 = vand.u32 2147483647, %v1550_v45  ;;  %v791_v46 = vmul.f32 -2.0, %v4879_v54 }
 0x1ba   :  { %v3847_v4 = vpop.eup %3846  ;;  %3856 = vpow2.f32 %v1251_v52  ;;  %v2061_v11 = vmul.f32 %v3845_v59, %v1805_v56  ;;  %v1257_v16 = vmul.f32 1.442695, %v790_v38  ;;  %v279_v52 = vld [vmem:[#allocation3 + $0x6a0] sm:$0xff]  ;;  %v4907_v56 = vld [vmem:[#allocation6 + $0x6d8] sm:$0xff] }
 0x1bb   :  { %v3335_v20 = vadd.f32 %v3334_v10, %v2053_v0  ;;  %v1552_v0 = vsub.f32 %v272_v51, %v4851_v53  ;;  %v1807_v10 = vand.u32 2147483647, %v1551_v55  ;;  %v792_v53 = vmul.f32 -2.0, %v4883_v63 }
 0x1bc   :  { %v3849_v13 = vpop.eup %3848  ;;  %3858 = vpow2.f32 %v1253_v61  ;;  %v2062_v21 = vmul.f32 %v3847_v4, %v1806_v1  ;;  %v1259_v27 = vmul.f32 1.442695, %v791_v46  ;;  %v280_v61 = vld [vmem:[#allocation3 + $0x6a8] sm:$0xff]  ;;  %v4911_v1 = vld [vmem:[#allocation6 + $0x6e0] sm:$0xff] }
 0x1bd   :  { %v3336_v30 = vadd.f32 %v3335_v20, %v2054_v9  ;;  %v1553_v9 = vsub.f32 %v273_v60, %v4855_v62  ;;  %v1808_v20 = vand.u32 2147483647, %v1552_v0  ;;  %v793_v62 = vmul.f32 -2.0, %v4887_v8 }
 0x1be   :  { %v3851_v17 = vpop.eup %3850  ;;  %3860 = vpow2.f32 %v1255_v7  ;;  %v2063_v31 = vmul.f32 %v3849_v13, %v1807_v10  ;;  %v1261_v36 = vmul.f32 1.442695, %v792_v53  ;;  %v281_v7 = vld [vmem:[#allocation3 + $0x6b0] sm:$0xff]  ;;  %v4915_v10 = vld [vmem:[#allocation6 + $0x6e8] sm:$0xff] }
 0x1bf   :  { %v3337_v40 = vadd.f32 %v3336_v30, %v2055_v19  ;;  %v1554_v19 = vsub.f32 %v274_v5, %v4859_v6  ;;  %v1809_v30 = vand.u32 2147483647, %v1553_v9  ;;  %v794_v6 = vmul.f32 -2.0, %v4891_v18 }
 0x1c0   :  { %v3853_v22 = vpop.eup %3852  ;;  %3862 = vpow2.f32 %v1257_v16  ;;  %v2064_v41 = vmul.f32 %v3851_v17, %v1808_v20  ;;  %v1263_v45 = vmul.f32 1.442695, %v793_v62  ;;  %v282_v16 = vld [vmem:[#allocation3 + $0x6b8] sm:$0xff]  ;;  %v4919_v20 = vld [vmem:[#allocation6 + $0x6f0] sm:$0xff] }
 0x1c1   :  { %v3338_v49 = vadd.f32 %v3337_v40, %v2056_v29  ;;  %v1555_v29 = vsub.f32 %v275_v14, %v4863_v15  ;;  %v1810_v40 = vand.u32 2147483647, %v1554_v19  ;;  %v795_v15 = vmul.f32 -2.0, %v4895_v28 }
 0x1c2   :  { %v3855_v26 = vpop.eup %3854  ;;  %3864 = vpow2.f32 %v1259_v27  ;;  %v2065_v50 = vmul.f32 %v3853_v22, %v1809_v30  ;;  %v1265_v55 = vmul.f32 1.442695, %v794_v6  ;;  %v283_v27 = vld [vmem:[#allocation3 + $0x6c0] sm:$0xff]  ;;  %v4923_v30 = vld [vmem:[#allocation6 + $0x6f8] sm:$0xff] }
 0x1c3   :  { %v3339_v58 = vadd.f32 %v3338_v49, %v2057_v39  ;;  %v1556_v39 = vsub.f32 %v276_v24, %v4867_v25  ;;  %v1811_v49 = vand.u32 2147483647, %v1555_v29  ;;  %v796_v25 = vmul.f32 -2.0, %v4899_v37 }
 0x1c4   :  { %v3857_v32 = vpop.eup %3856  ;;  %3866 = vpow2.f32 %v1261_v36  ;;  %v2066_v59 = vmul.f32 %v3855_v26, %v1810_v40  ;;  %v1267_v0 = vmul.f32 1.442695, %v795_v15  ;;  %v284_v36 = vld [vmem:[#allocation3 + $0x6c8] sm:$0xff]  ;;  %v4927_v40 = vld [vmem:[#allocation6 + $0x700] sm:$0xff] }
 0x1c5   :  { %v3340_v3 = vadd.f32 %v3339_v58, %v2058_v48  ;;  %v1557_v48 = vsub.f32 %v277_v34, %v4871_v35  ;;  %v1812_v58 = vand.u32 2147483647, %v1556_v39  ;;  %v797_v35 = vmul.f32 -2.0, %v4903_v47 }
 0x1c6   :  { %v3859_v38 = vpop.eup %3858  ;;  %3868 = vpow2.f32 %v1263_v45  ;;  %v2067_v4 = vmul.f32 %v3857_v32, %v1811_v49  ;;  %v1269_v9 = vmul.f32 1.442695, %v796_v25  ;;  %v285_v45 = vld [vmem:[#allocation3 + $0x6d0] sm:$0xff]  ;;  %v4931_v49 = vld [vmem:[#allocation6 + $0x708] sm:$0xff] }
 0x1c7   :  { %v3341_v12 = vadd.f32 %v3340_v3, %v2059_v57  ;;  %v1558_v57 = vsub.f32 %v278_v43, %v4875_v44  ;;  %v1813_v3 = vand.u32 2147483647, %v1557_v48  ;;  %v798_v44 = vmul.f32 -2.0, %v4907_v56 }
 0x1c8   :  { %v3861_v46 = vpop.eup %3860  ;;  %3870 = vpow2.f32 %v1265_v55  ;;  %v2068_v13 = vmul.f32 %v3859_v38, %v1812_v58  ;;  %v1271_v19 = vmul.f32 1.442695, %v797_v35  ;;  %v286_v55 = vld [vmem:[#allocation3 + $0x6d8] sm:$0xff]  ;;  %v4935_v58 = vld [vmem:[#allocation6 + $0x710] sm:$0xff] }
 0x1c9   :  { %v3342_v23 = vadd.f32 %v3341_v12, %v2060_v2  ;;  %v1559_v2 = vsub.f32 %v279_v52, %v4879_v54  ;;  %v1814_v12 = vand.u32 2147483647, %v1558_v57  ;;  %v799_v54 = vmul.f32 -2.0, %v4911_v1 }
 0x1ca   :  { %v3863_v53 = vpop.eup %3862  ;;  %3872 = vpow2.f32 %v1267_v0  ;;  %v2069_v17 = vmul.f32 %v3861_v46, %v1813_v3  ;;  %v1273_v29 = vmul.f32 1.442695, %v798_v44  ;;  %v287_v0 = vld [vmem:[#allocation3 + $0x6e0] sm:$0xff]  ;;  %v4939_v3 = vld [vmem:[#allocation6 + $0x718] sm:$0xff] }
 0x1cb   :  { %v3343_v33 = vadd.f32 %v3342_v23, %v2061_v11  ;;  %v1560_v11 = vsub.f32 %v280_v61, %v4883_v63  ;;  %v1815_v23 = vand.u32 2147483647, %v1559_v2  ;;  %v800_v63 = vmul.f32 -2.0, %v4915_v10 }
 0x1cc   :  { %v3865_v62 = vpop.eup %3864  ;;  %3874 = vpow2.f32 %v1269_v9  ;;  %v2070_v22 = vmul.f32 %v3863_v53, %v1814_v12  ;;  %v1275_v39 = vmul.f32 1.442695, %v799_v54  ;;  %v288_v9 = vld [vmem:[#allocation3 + $0x6e8] sm:$0xff]  ;;  %v4943_v12 = vld [vmem:[#allocation6 + $0x720] sm:$0xff] }
 0x1cd   :  { %v3344_v42 = vadd.f32 %v3343_v33, %v2062_v21  ;;  %v1561_v21 = vsub.f32 %v281_v7, %v4887_v8  ;;  %v1816_v33 = vand.u32 2147483647, %v1560_v11  ;;  %v801_v8 = vmul.f32 -2.0, %v4919_v20 }
 0x1ce   :  { %v3867_v6 = vpop.eup %3866  ;;  %3876 = vpow2.f32 %v1271_v19  ;;  %v2071_v26 = vmul.f32 %v3865_v62, %v1815_v23  ;;  %v1277_v48 = vmul.f32 1.442695, %v800_v63  ;;  %v289_v19 = vld [vmem:[#allocation3 + $0x6f0] sm:$0xff]  ;;  %v4947_v23 = vld [vmem:[#allocation6 + $0x728] sm:$0xff] }
 0x1cf   :  { %v3345_v51 = vadd.f32 %v3344_v42, %v2063_v31  ;;  %v1562_v31 = vsub.f32 %v282_v16, %v4891_v18  ;;  %v1817_v42 = vand.u32 2147483647, %v1561_v21  ;;  %v802_v18 = vmul.f32 -2.0, %v4923_v30 }
 0x1d0   :  { %v3869_v15 = vpop.eup %3868  ;;  %3878 = vpow2.f32 %v1273_v29  ;;  %v2072_v32 = vmul.f32 %v3867_v6, %v1816_v33  ;;  %v1279_v57 = vmul.f32 1.442695, %v801_v8  ;;  %v290_v29 = vld [vmem:[#allocation3 + $0x6f8] sm:$0xff]  ;;  %v4951_v33 = vld [vmem:[#allocation6 + $0x730] sm:$0xff] }
 0x1d1   :  { %v3346_v60 = vadd.f32 %v3345_v51, %v2064_v41  ;;  %v1563_v41 = vsub.f32 %v283_v27, %v4895_v28  ;;  %v1818_v51 = vand.u32 2147483647, %v1562_v31  ;;  %v803_v28 = vmul.f32 -2.0, %v4927_v40 }
 0x1d2   :  { %v3871_v25 = vpop.eup %3870  ;;  %3880 = vpow2.f32 %v1275_v39  ;;  %v2073_v38 = vmul.f32 %v3869_v15, %v1817_v42  ;;  %v1281_v2 = vmul.f32 1.442695, %v802_v18  ;;  %v291_v39 = vld [vmem:[#allocation3 + $0x700] sm:$0xff]  ;;  %v4955_v42 = vld [vmem:[#allocation6 + $0x738] sm:$0xff] }
 0x1d3   :  { %v3347_v5 = vadd.f32 %v3346_v60, %v2065_v50  ;;  %v1564_v50 = vsub.f32 %v284_v36, %v4899_v37  ;;  %v1819_v60 = vand.u32 2147483647, %v1563_v41  ;;  %v804_v37 = vmul.f32 -2.0, %v4931_v49 }
 0x1d4   :  { %v3873_v35 = vpop.eup %3872  ;;  %3882 = vpow2.f32 %v1277_v48  ;;  %v2074_v46 = vmul.f32 %v3871_v25, %v1818_v51  ;;  %v1283_v11 = vmul.f32 1.442695, %v803_v28  ;;  %v292_v48 = vld [vmem:[#allocation3 + $0x708] sm:$0xff]  ;;  %v4959_v51 = vld [vmem:[#allocation6 + $0x740] sm:$0xff] }
 0x1d5   :  { %v3348_v14 = vadd.f32 %v3347_v5, %v2066_v59  ;;  %v1565_v59 = vsub.f32 %v285_v45, %v4903_v47  ;;  %v1820_v5 = vand.u32 2147483647, %v1564_v50  ;;  %v805_v47 = vmul.f32 -2.0, %v4935_v58 }
 0x1d6   :  { %v3875_v44 = vpop.eup %3874  ;;  %3884 = vpow2.f32 %v1279_v57  ;;  %v2075_v53 = vmul.f32 %v3873_v35, %v1819_v60  ;;  %v1285_v21 = vmul.f32 1.442695, %v804_v37  ;;  %v293_v57 = vld [vmem:[#allocation3 + $0x710] sm:$0xff]  ;;  %v4963_v60 = vld [vmem:[#allocation6 + $0x748] sm:$0xff] }
 0x1d7   :  { %v3349_v24 = vadd.f32 %v3348_v14, %v2067_v4  ;;  %v1566_v4 = vsub.f32 %v286_v55, %v4907_v56  ;;  %v1821_v14 = vand.u32 2147483647, %v1565_v59  ;;  %v806_v56 = vmul.f32 -2.0, %v4939_v3 }
 0x1d8   :  { %v3877_v54 = vpop.eup %3876  ;;  %3886 = vpow2.f32 %v1281_v2  ;;  %v2076_v62 = vmul.f32 %v3875_v44, %v1820_v5  ;;  %v1287_v31 = vmul.f32 1.442695, %v805_v47  ;;  %v294_v2 = vld [vmem:[#allocation3 + $0x718] sm:$0xff]  ;;  %v4967_v5 = vld [vmem:[#allocation6 + $0x750] sm:$0xff] }
 0x1d9   :  { %v3350_v34 = vadd.f32 %v3349_v24, %v2068_v13  ;;  %v1567_v13 = vsub.f32 %v287_v0, %v4911_v1  ;;  %v1822_v24 = vand.u32 2147483647, %v1566_v4  ;;  %v807_v1 = vmul.f32 -2.0, %v4943_v12 }
 0x1da   :  { %v3879_v63 = vpop.eup %3878  ;;  %3888 = vpow2.f32 %v1283_v11  ;;  %v2077_v6 = vmul.f32 %v3877_v54, %v1821_v14  ;;  %v1289_v41 = vmul.f32 1.442695, %v806_v56  ;;  %v295_v11 = vld [vmem:[#allocation3 + $0x720] sm:$0xff]  ;;  %v4971_v14 = vld [vmem:[#allocation6 + $0x758] sm:$0xff] }
 0x1db   :  { %v3351_v43 = vadd.f32 %v3350_v34, %v2069_v17  ;;  %v1568_v17 = vsub.f32 %v288_v9, %v4915_v10  ;;  %v1823_v34 = vand.u32 2147483647, %v1567_v13  ;;  %v808_v10 = vmul.f32 -2.0, %v4947_v23 }
 0x1dc   :  { %v3881_v8 = vpop.eup %3880  ;;  %3890 = vpow2.f32 %v1285_v21  ;;  %v2078_v15 = vmul.f32 %v3879_v63, %v1822_v24  ;;  %v1291_v50 = vmul.f32 1.442695, %v807_v1  ;;  %v296_v21 = vld [vmem:[#allocation3 + $0x728] sm:$0xff]  ;;  %v4975_v24 = vld [vmem:[#allocation6 + $0x760] sm:$0xff] }
 0x1dd   :  { %v3352_v52 = vadd.f32 %v3351_v43, %v2070_v22  ;;  %v1569_v22 = vsub.f32 %v289_v19, %v4919_v20  ;;  %v1824_v43 = vand.u32 2147483647, %v1568_v17  ;;  %v809_v20 = vmul.f32 -2.0, %v4951_v33 }
 0x1de   :  { %v3883_v18 = vpop.eup %3882  ;;  %3892 = vpow2.f32 %v1287_v31  ;;  %v2079_v25 = vmul.f32 %v3881_v8, %v1823_v34  ;;  %v1293_v59 = vmul.f32 1.442695, %v808_v10  ;;  %v297_v31 = vld [vmem:[#allocation3 + $0x730] sm:$0xff]  ;;  %v4979_v34 = vld [vmem:[#allocation6 + $0x768] sm:$0xff] }
 0x1df   :  { %v3353_v61 = vadd.f32 %v3352_v52, %v2071_v26  ;;  %v1570_v26 = vsub.f32 %v290_v29, %v4923_v30  ;;  %v1825_v52 = vand.u32 2147483647, %v1569_v22  ;;  %v810_v30 = vmul.f32 -2.0, %v4955_v42 }
 0x1e0   :  { %v3885_v28 = vpop.eup %3884  ;;  %3894 = vpow2.f32 %v1289_v41  ;;  %v2080_v35 = vmul.f32 %v3883_v18, %v1824_v43  ;;  %v1295_v4 = vmul.f32 1.442695, %v809_v20  ;;  %v298_v41 = vld [vmem:[#allocation3 + $0x738] sm:$0xff]  ;;  %v4983_v43 = vld [vmem:[#allocation6 + $0x770] sm:$0xff] }
 0x1e1   :  { %v3354_v7 = vadd.f32 %v3353_v61, %v2072_v32  ;;  %v1571_v32 = vsub.f32 %v291_v39, %v4927_v40  ;;  %v1826_v61 = vand.u32 2147483647, %v1570_v26  ;;  %v811_v40 = vmul.f32 -2.0, %v4959_v51 }
 0x1e2   :  { %v3887_v37 = vpop.eup %3886  ;;  %3896 = vpow2.f32 %v1291_v50  ;;  %v2081_v44 = vmul.f32 %v3885_v28, %v1825_v52  ;;  %v1297_v13 = vmul.f32 1.442695, %v810_v30  ;;  %v299_v50 = vld [vmem:[#allocation3 + $0x740] sm:$0xff]  ;;  %v4987_v52 = vld [vmem:[#allocation6 + $0x778] sm:$0xff] }
 0x1e3   :  { %v3355_v16 = vadd.f32 %v3354_v7, %v2073_v38  ;;  %v1572_v38 = vsub.f32 %v292_v48, %v4931_v49  ;;  %v1827_v7 = vand.u32 2147483647, %v1571_v32  ;;  %v812_v49 = vmul.f32 -2.0, %v4963_v60 }
 0x1e4   :  { %v3889_v47 = vpop.eup %3888  ;;  %3898 = vpow2.f32 %v1293_v59  ;;  %v2082_v54 = vmul.f32 %v3887_v37, %v1826_v61  ;;  %v1299_v17 = vmul.f32 1.442695, %v811_v40  ;;  %v300_v59 = vld [vmem:[#allocation3 + $0x748] sm:$0xff]  ;;  %v4991_v61 = vld [vmem:[#allocation6 + $0x780] sm:$0xff] }
 0x1e5   :  { %v3356_v27 = vadd.f32 %v3355_v16, %v2074_v46  ;;  %v1573_v46 = vsub.f32 %v293_v57, %v4935_v58  ;;  %v1828_v16 = vand.u32 2147483647, %v1572_v38  ;;  %v813_v58 = vmul.f32 -2.0, %v4967_v5 }
 0x1e6   :  { %v3891_v56 = vpop.eup %3890  ;;  %3900 = vpow2.f32 %v1295_v4  ;;  %v2083_v63 = vmul.f32 %v3889_v47, %v1827_v7  ;;  %v1301_v22 = vmul.f32 1.442695, %v812_v49  ;;  %v301_v4 = vld [vmem:[#allocation3 + $0x750] sm:$0xff]  ;;  %v4995_v7 = vld [vmem:[#allocation6 + $0x788] sm:$0xff] }
 0x1e7   :  { %v3357_v36 = vadd.f32 %v3356_v27, %v2075_v53  ;;  %v1574_v53 = vsub.f32 %v294_v2, %v4939_v3  ;;  %v1829_v27 = vand.u32 2147483647, %v1573_v46  ;;  %v814_v3 = vmul.f32 -2.0, %v4971_v14 }
 0x1e8   :  { %v3893_v1 = vpop.eup %3892  ;;  %3902 = vpow2.f32 %v1297_v13  ;;  %v2084_v8 = vmul.f32 %v3891_v56, %v1828_v16  ;;  %v1303_v26 = vmul.f32 1.442695, %v813_v58  ;;  %v302_v13 = vld [vmem:[#allocation3 + $0x758] sm:$0xff]  ;;  %v4999_v16 = vld [vmem:[#allocation6 + $0x790] sm:$0xff] }
 0x1e9   :  { %v3358_v45 = vadd.f32 %v3357_v36, %v2076_v62  ;;  %v1575_v62 = vsub.f32 %v295_v11, %v4943_v12  ;;  %v1830_v36 = vand.u32 2147483647, %v1574_v53  ;;  %v815_v12 = vmul.f32 -2.0, %v4975_v24 }
 0x1ea   :  { %v3895_v10 = vpop.eup %3894  ;;  %3904 = vpow2.f32 %v1299_v17  ;;  %v2085_v18 = vmul.f32 %v3893_v1, %v1829_v27  ;;  %v1305_v32 = vmul.f32 1.442695, %v814_v3  ;;  %v303_v17 = vld [vmem:[#allocation3 + $0x760] sm:$0xff]  ;;  %v5003_v27 = vld [vmem:[#allocation6 + $0x798] sm:$0xff] }
 0x1eb   :  { %v3359_v55 = vadd.f32 %v3358_v45, %v2077_v6  ;;  %v1576_v6 = vsub.f32 %v296_v21, %v4947_v23  ;;  %v1831_v45 = vand.u32 2147483647, %v1575_v62  ;;  %v816_v23 = vmul.f32 -2.0, %v4979_v34 }
 0x1ec   :  { %v3897_v20 = vpop.eup %3896  ;;  %3906 = vpow2.f32 %v1301_v22  ;;  %v2086_v28 = vmul.f32 %v3895_v10, %v1830_v36  ;;  %v1307_v38 = vmul.f32 1.442695, %v815_v12  ;;  %v304_v22 = vld [vmem:[#allocation3 + $0x768] sm:$0xff]  ;;  %v5007_v36 = vld [vmem:[#allocation6 + $0x7a0] sm:$0xff] }
 0x1ed   :  { %v3360_v0 = vadd.f32 %v3359_v55, %v2078_v15  ;;  %v1577_v15 = vsub.f32 %v297_v31, %v4951_v33  ;;  %v1832_v55 = vand.u32 2147483647, %v1576_v6  ;;  %v817_v33 = vmul.f32 -2.0, %v4983_v43 }
 0x1ee   :  { %v3899_v30 = vpop.eup %3898  ;;  %3908 = vpow2.f32 %v1303_v26  ;;  %v2087_v37 = vmul.f32 %v3897_v20, %v1831_v45  ;;  %v1309_v46 = vmul.f32 1.442695, %v816_v23  ;;  %v305_v26 = vld [vmem:[#allocation3 + $0x770] sm:$0xff]  ;;  %v5011_v45 = vld [vmem:[#allocation6 + $0x7a8] sm:$0xff] }
 0x1ef   :  { %v3361_v9 = vadd.f32 %v3360_v0, %v2079_v25  ;;  %v1578_v25 = vsub.f32 %v298_v41, %v4955_v42  ;;  %v1833_v0 = vand.u32 2147483647, %v1577_v15  ;;  %v818_v42 = vmul.f32 -2.0, %v4987_v52 }
 0x1f0   :  { %v3901_v40 = vpop.eup %3900  ;;  %3910 = vpow2.f32 %v1305_v32  ;;  %v2088_v47 = vmul.f32 %v3899_v30, %v1832_v55  ;;  %v1311_v53 = vmul.f32 1.442695, %v817_v33  ;;  %v306_v32 = vld [vmem:[#allocation3 + $0x778] sm:$0xff]  ;;  %v5015_v55 = vld [vmem:[#allocation6 + $0x7b0] sm:$0xff] }
 0x1f1   :  { %v3362_v19 = vadd.f32 %v3361_v9, %v2080_v35  ;;  %v1579_v35 = vsub.f32 %v299_v50, %v4959_v51  ;;  %v1834_v9 = vand.u32 2147483647, %v1578_v25  ;;  %v819_v51 = vmul.f32 -2.0, %v4991_v61 }
 0x1f2   :  { %v3903_v49 = vpop.eup %3902  ;;  %3912 = vpow2.f32 %v1307_v38  ;;  %v2089_v56 = vmul.f32 %v3901_v40, %v1833_v0  ;;  %v1313_v62 = vmul.f32 1.442695, %v818_v42  ;;  %v307_v38 = vld [vmem:[#allocation3 + $0x780] sm:$0xff]  ;;  %v5019_v0 = vld [vmem:[#allocation6 + $0x7b8] sm:$0xff] }
 0x1f3   :  { %v3363_v29 = vadd.f32 %v3362_v19, %v2081_v44  ;;  %v1580_v44 = vsub.f32 %v300_v59, %v4963_v60  ;;  %v1835_v19 = vand.u32 2147483647, %v1579_v35  ;;  %v820_v60 = vmul.f32 -2.0, %v4995_v7 }
 0x1f4   :  { %v3905_v58 = vpop.eup %3904  ;;  %3914 = vpow2.f32 %v1309_v46  ;;  %v2090_v1 = vmul.f32 %v3903_v49, %v1834_v9  ;;  %v1315_v6 = vmul.f32 1.442695, %v819_v51  ;;  %v308_v46 = vld [vmem:[#allocation3 + $0x788] sm:$0xff]  ;;  %v5023_v9 = vld [vmem:[#allocation6 + $0x7c0] sm:$0xff] }
 0x1f5   :  { %v3364_v39 = vadd.f32 %v3363_v29, %v2082_v54  ;;  %v1581_v54 = vsub.f32 %v301_v4, %v4967_v5  ;;  %v1836_v29 = vand.u32 2147483647, %v1580_v44  ;;  %v821_v5 = vmul.f32 -2.0, %v4999_v16 }
 0x1f6   :  { %v3907_v3 = vpop.eup %3906  ;;  %3916 = vpow2.f32 %v1311_v53  ;;  %v2091_v10 = vmul.f32 %v3905_v58, %v1835_v19  ;;  %v1317_v15 = vmul.f32 1.442695, %v820_v60  ;;  %v309_v53 = vld [vmem:[#allocation3 + $0x790] sm:$0xff]  ;;  %v5027_v19 = vld [vmem:[#allocation6 + $0x7c8] sm:$0xff] }
 0x1f7   :  { %v3365_v48 = vadd.f32 %v3364_v39, %v2083_v63  ;;  %v1582_v63 = vsub.f32 %v302_v13, %v4971_v14  ;;  %v1837_v39 = vand.u32 2147483647, %v1581_v54  ;;  %v822_v14 = vmul.f32 -2.0, %v5003_v27 }
 0x1f8   :  { %v3909_v12 = vpop.eup %3908  ;;  %3918 = vpow2.f32 %v1313_v62  ;;  %v2092_v20 = vmul.f32 %v3907_v3, %v1836_v29  ;;  %v1319_v25 = vmul.f32 1.442695, %v821_v5  ;;  %v310_v62 = vld [vmem:[#allocation3 + $0x798] sm:$0xff]  ;;  %v5031_v29 = vld [vmem:[#allocation6 + $0x7d0] sm:$0xff] }
 0x1f9   :  { %v3366_v57 = vadd.f32 %v3365_v48, %v2084_v8  ;;  %v1583_v8 = vsub.f32 %v303_v17, %v4975_v24  ;;  %v1838_v48 = vand.u32 2147483647, %v1582_v63  ;;  %v823_v24 = vmul.f32 -2.0, %v5007_v36 }
 0x1fa   :  { %v3911_v23 = vpop.eup %3910  ;;  %3920 = vpow2.f32 %v1315_v6  ;;  %v2093_v30 = vmul.f32 %v3909_v12, %v1837_v39  ;;  %v1321_v35 = vmul.f32 1.442695, %v822_v14  ;;  %v311_v6 = vld [vmem:[#allocation3 + $0x7a0] sm:$0xff]  ;;  %v5035_v39 = vld [vmem:[#allocation6 + $0x7d8] sm:$0xff] }
 0x1fb   :  { %v3367_v2 = vadd.f32 %v3366_v57, %v2085_v18  ;;  %v1584_v18 = vsub.f32 %v304_v22, %v4979_v34  ;;  %v1839_v57 = vand.u32 2147483647, %v1583_v8  ;;  %v824_v34 = vmul.f32 -2.0, %v5011_v45 }
 0x1fc   :  { %v3913_v33 = vpop.eup %3912  ;;  %3922 = vpow2.f32 %v1317_v15  ;;  %v2094_v40 = vmul.f32 %v3911_v23, %v1838_v48  ;;  %v1323_v44 = vmul.f32 1.442695, %v823_v24  ;;  %v312_v15 = vld [vmem:[#allocation3 + $0x7a8] sm:$0xff]  ;;  %v5039_v48 = vld [vmem:[#allocation6 + $0x7e0] sm:$0xff] }
 0x1fd   :  { %v3368_v11 = vadd.f32 %v3367_v2, %v2086_v28  ;;  %v1585_v28 = vsub.f32 %v305_v26, %v4983_v43  ;;  %v1840_v2 = vand.u32 2147483647, %v1584_v18  ;;  %v825_v43 = vmul.f32 -2.0, %v5015_v55 }
 0x1fe   :  { %v3915_v42 = vpop.eup %3914  ;;  %3924 = vpow2.f32 %v1319_v25  ;;  %v2095_v49 = vmul.f32 %v3913_v33, %v1839_v57  ;;  %v1325_v54 = vmul.f32 1.442695, %v824_v34  ;;  %v313_v25 = vld [vmem:[#allocation3 + $0x7b0] sm:$0xff]  ;;  %v5043_v57 = vld [vmem:[#allocation6 + $0x7e8] sm:$0xff] }
 0x1ff   :  { %v3369_v21 = vadd.f32 %v3368_v11, %v2087_v37  ;;  %v1586_v37 = vsub.f32 %v306_v32, %v4987_v52  ;;  %v1841_v11 = vand.u32 2147483647, %v1585_v28  ;;  %v826_v52 = vmul.f32 -2.0, %v5019_v0 }
 0x200   :  { %v3917_v51 = vpop.eup %3916  ;;  %3926 = vpow2.f32 %v1321_v35  ;;  %v2096_v58 = vmul.f32 %v3915_v42, %v1840_v2  ;;  %v1327_v63 = vmul.f32 1.442695, %v825_v43  ;;  %v314_v35 = vld [vmem:[#allocation3 + $0x7b8] sm:$0xff]  ;;  %v5047_v2 = vld [vmem:[#allocation6 + $0x7f0] sm:$0xff] }
 0x201   :  { %v3370_v31 = vadd.f32 %v3369_v21, %v2088_v47  ;;  %v1587_v47 = vsub.f32 %v307_v38, %v4991_v61  ;;  %v1842_v21 = vand.u32 2147483647, %v1586_v37  ;;  %v827_v61 = vmul.f32 -2.0, %v5023_v9 }
 0x202   :  { %v3919_v60 = vpop.eup %3918  ;;  %3928 = vpow2.f32 %v1323_v44  ;;  %v2097_v3 = vmul.f32 %v3917_v51, %v1841_v11  ;;  %v1329_v8 = vmul.f32 1.442695, %v826_v52  ;;  %v315_v44 = vld [vmem:[#allocation3 + $0x7c0] sm:$0xff]  ;;  %v5051_v11 = vld [vmem:[#allocation6 + $0x7f8] sm:$0xff] }
 0x203   :  { %v3371_v41 = vadd.f32 %v3370_v31, %v2089_v56  ;;  %v1588_v56 = vsub.f32 %v308_v46, %v4995_v7  ;;  %v1843_v31 = vand.u32 2147483647, %v1587_v47  ;;  %v828_v7 = vmul.f32 -2.0, %v5027_v19 }
 0x204   :  { %v3921_v5 = vpop.eup %3920  ;;  %3930 = vpow2.f32 %v1325_v54  ;;  %v2098_v12 = vmul.f32 %v3919_v60, %v1842_v21  ;;  %v1331_v18 = vmul.f32 1.442695, %v827_v61  ;;  %v316_v54 = vld [vmem:[#allocation3 + $0x7c8] sm:$0xff]  ;;  %v1595_v21 = vsub.f32 %v315_v44, %v5023_v9  ;;  %v317_v61 = vld [vmem:[#allocation3 + $0x7d0] sm:$0xff] }
 0x205   :  { %v3372_v50 = vadd.f32 %v3371_v41, %v2090_v1  ;;  %v1589_v1 = vsub.f32 %v309_v53, %v4999_v16  ;;  %v1844_v41 = vand.u32 2147483647, %v1588_v56  ;;  %v829_v16 = vmul.f32 -2.0, %v5031_v29 }
 0x206   :  { %v3923_v14 = vpop.eup %3922  ;;  %3932 = vpow2.f32 %v1327_v63  ;;  %v2099_v23 = vmul.f32 %v3921_v5, %v1843_v31  ;;  %v1333_v28 = vmul.f32 1.442695, %v828_v7  ;;  %v834_v63 = vmul.f32 -2.0, %v5051_v11 }
 0x207   :  { %v3373_v59 = vadd.f32 %v3372_v50, %v2091_v10  ;;  %v1590_v10 = vsub.f32 %v310_v62, %v5003_v27  ;;  %v1845_v50 = vand.u32 2147483647, %v1589_v1  ;;  %v830_v27 = vmul.f32 -2.0, %v5035_v39 }
 0x208   :  { %v3925_v24 = vpop.eup %3924  ;;  %3934 = vpow2.f32 %v1329_v8  ;;  %v2100_v33 = vmul.f32 %v3923_v14, %v1844_v41  ;;  %v1335_v37 = vmul.f32 1.442695, %v829_v16  ;;  %v1596_v1 = vsub.f32 %v316_v54, %v5027_v19 }
 0x209   :  { %v3374_v4 = vadd.f32 %v3373_v59, %v2092_v20  ;;  %v1591_v20 = vsub.f32 %v311_v6, %v5007_v36  ;;  %v1846_v59 = vand.u32 2147483647, %v1590_v10  ;;  %v831_v36 = vmul.f32 -2.0, %v5039_v48  ;;  %v318_v6 = vld [vmem:[#allocation3 + $0x7d8] sm:$0xff] }
 0x20a   :  { %v3927_v34 = vpop.eup %3926  ;;  %3936 = vpow2.f32 %v1331_v18  ;;  %v2101_v42 = vmul.f32 %v3925_v24, %v1845_v50  ;;  %v1337_v47 = vmul.f32 1.442695, %v830_v27  ;;  %v1597_v9 = vsub.f32 %v317_v61, %v5031_v29  ;;  %v320_v50 = vld [vmem:[#allocation3 + $0x7e8] sm:$0xff]  ;;  %v321_v27 = vld [vmem:[#allocation3 + $0x7f0] sm:$0xff] }
 0x20b   :  { %v3375_v13 = vadd.f32 %v3374_v4, %v2093_v30  ;;  %v1592_v30 = vsub.f32 %v312_v15, %v5011_v45  ;;  %v1847_v4 = vand.u32 2147483647, %v1591_v20  ;;  %v832_v45 = vmul.f32 -2.0, %v5043_v57 }
 0x20c   :  { %v3929_v43 = vpop.eup %3928  ;;  %3938 = vpow2.f32 %v1333_v28  ;;  %v2102_v51 = vmul.f32 %v3927_v34, %v1846_v59  ;;  %v1339_v56 = vmul.f32 1.442695, %v831_v36  ;;  %v1851_v8 = vand.u32 2147483647, %v1595_v21 }
 0x20d   :  { %v3376_v17 = vadd.f32 %v3375_v13, %v2094_v40  ;;  %v1593_v40 = vsub.f32 %v313_v25, %v5015_v55  ;;  %v1848_v13 = vand.u32 2147483647, %v1592_v30  ;;  %v833_v55 = vmul.f32 -2.0, %v5047_v2 }
 0x20e   :  { %v3931_v52 = vpop.eup %3930  ;;  %3940 = vpow2.f32 %v1335_v37  ;;  %v1345_v14 = vmul.f32 1.442695, %v834_v63  ;;  %v1598_v15 = vsub.f32 %v318_v6, %v5035_v39  ;;  %v1852_v16 = vand.u32 2147483647, %v1596_v1 }
 0x20f   :  { %v3377_v22 = vadd.f32 %v3376_v17, %v2095_v49  ;;  %v1594_v49 = vsub.f32 %v314_v35, %v5019_v0  ;;  %v2103_v17 = vmul.f32 %v3929_v43, %v1847_v4  ;;  %3942 = vpow2.f32 %v1337_v47 }
 0x210   :  { %v3933_v62 = vpop.eup %3932  ;;  %v1341_v0 = vmul.f32 1.442695, %v832_v45  ;;  %3944 = vpow2.f32 %v1339_v56  ;;  %v1343_v7 = vmul.f32 1.442695, %v833_v55  ;;  %v1600_v28 = vsub.f32 %v320_v50, %v5043_v57 }
 0x211   :  { %v3378_v26 = vadd.f32 %v3377_v22, %v2096_v58  ;;  %v1849_v58 = vand.u32 2147483647, %v1593_v40  ;;  %v1850_v31 = vand.u32 2147483647, %v1594_v49  ;;  %v1854_v30 = vand.u32 2147483647, %v1598_v15 }
 0x212   :  { %v3935_v5 = vpop.eup %3934  ;;  %3946 = vpow2.f32 %v1341_v0  ;;  %v1601_v34 = vsub.f32 %v321_v27, %v5047_v2  ;;  %v1856_v4 = vand.u32 2147483647, %v1600_v28 }
 0x213   :  { %v3379_v32 = vadd.f32 %v3378_v26, %v2097_v3  ;;  %v2104_v3 = vmul.f32 %v3931_v52, %v1848_v13  ;;  %v2105_v10 = vmul.f32 %v3933_v62, %v1849_v58  ;;  %v319_v26 = vld [vmem:[#allocation3 + $0x7e0] sm:$0xff]  ;;  %v2106_v19 = vmul.f32 %v3935_v5, %v1850_v31 }
 0x214   :  { %3948 = vpow2.f32 %v1343_v7  ;;  %v1857_v44 = vand.u32 2147483647, %v1601_v34 }
 0x215   :  { %v3380_v38 = vadd.f32 %v3379_v32, %v2098_v12  ;;  %v3937_v12 = vpop.eup %3936  ;;  %v1853_v32 = vand.u32 2147483647, %v1597_v9  ;;  %3950 = vpow2.f32 %v1345_v14 }
 0x216   :  { %v3939_v20 = vpop.eup %3938  ;;  %v2107_v24 = vmul.f32 %v3937_v12, %v1851_v8 }
 0x217   :  { %v3381_v46 = vadd.f32 %v3380_v38, %v2099_v23  ;;  %v1599_v23 = vsub.f32 %v319_v26, %v5039_v48  ;;  %v2108_v59 = vmul.f32 %v3939_v20, %v1852_v16  ;;  %v322_v38 = vld [vmem:[#allocation3 + $0x7f8] sm:$0xff] }
 0x218   :  { %v3941_v25 = vpop.eup %3940  ;;  %v1602_v48 = vsub.f32 %v322_v38, %v5051_v11 }
 0x219   :  { %v3382_v53 = vadd.f32 %v3381_v46, %v2100_v33  ;;  %v3943_v39 = vpop.eup %3942  ;;  %v1855_v35 = vand.u32 2147483647, %v1599_v23  ;;  %v2109_v36 = vmul.f32 %v3941_v25, %v1853_v32 }
 0x21a   :  { %v3945_v40 = vpop.eup %3944  ;;  %v1858_v49 = vand.u32 2147483647, %v1602_v48 }
 0x21b   :  { %v3383_v60 = vadd.f32 %v3382_v53, %v2101_v42  ;;  %v2110_v42 = vmul.f32 %v3943_v39, %v1854_v30  ;;  %v2111_v45 = vmul.f32 %v3945_v40, %v1855_v35 }
 0x21c   :  { %v3947_v43 = vpop.eup %3946 }
 0x21d   :  { %v3384_v22 = vadd.f32 %v3383_v60, %v2102_v51  ;;  %v2112_v13 = vmul.f32 %v3947_v43, %v1856_v4 }
 0x21e   :  { %v3949_v47 = vpop.eup %3948 }
 0x21f   :  { %v3385_v41 = vadd.f32 %v3384_v22, %v2103_v17  ;;  %v3951_v53 = vpop.eup %3950  ;;  %v2113_v52 = vmul.f32 %v3949_v47, %v1857_v44 }
 0x220   :  { %v2114_v54 = vmul.f32 %v3951_v53, %v1858_v49 }
 0x221   :  { %v3386_v18 = vadd.f32 %v3385_v41, %v2104_v3 }
 0x223   :  { %v3387_v29 = vadd.f32 %v3386_v18, %v2105_v10 }
 0x225   :  { %v3388_v33 = vadd.f32 %v3387_v29, %v2106_v19 }
 0x227   :  { %v3389_v37 = vadd.f32 %v3388_v33, %v2107_v24 }
 0x229   :  { %v3390_v46 = vadd.f32 %v3389_v37, %v2108_v59 }
 0x22b   :  { %v3391_v57 = vadd.f32 %v3390_v46, %v2109_v36 }
 0x22d   :  { %v3392_v51 = vadd.f32 %v3391_v57, %v2110_v42 }
 0x22f   :  { %v3393_v2 = vadd.f32 %v3392_v51, %v2111_v45 }
 0x231   :  { %v3394_v55 = vadd.f32 %v3393_v2, %v2112_v13 }
 0x233   :  { %v3395_v56 = vadd.f32 %v3394_v55, %v2113_v52 }
 0x235   :  { %v3396_v21 = vadd.f32 %v3395_v56, %v2114_v54 }
 0x237   :  { %3403 = vadd.xlane.f32.xlu0 %v3396_v21 }
 0x2c4   :  { %v3404_v11 = vpop.xlane.xlu0 %3403 }
 0x2c5   :  { %v3405_v58 = vrot.slane %v3404_v11, 4 }
 0x2c7   :  { %v3406_v17 = vadd.f32 %v3405_v58, %v3404_v11 }
 0x2c9   :  { %v3407_v60 = vrot.slane %v3406_v17, 2 }
 0x2cb   :  { %v3408_v62 = vadd.f32 %v3407_v60, %v3406_v17 }
 0x2cd   :  { %v3409_v61 = vrot.slane %v3408_v62, 1 }
 0x2cf   :  { %v3410_v63 = vadd.f32 %v3409_v61, %v3408_v62 }
 0x2d1   :  { %3433 = vpush %v3410_v63 }
 0x302   :  { %s3434_s1 = spop %3433 }
 0x303   :  { %3413 = sst [smem:[#allocation8]] %s3434_s1 }
 0x304   :  { %4005 = shalt.err (!%p4002_p4)
}
 0x305   :  { %s4016_s13 = smov [#allocation8]  }
 0x306   :  { %3421 = dma.smem_to_hbm %s4016_s13, 16, %s5078_s2, [#allocation5]  }
 0x307   :  { %4010 = dma.done.wait [#allocation5], 16  }
 0x308   :  { %4011 = vsyncadd [#allocation5], 4294967280 }
 0x309   :  { %3425 = sfence }
 0x30a   :  { %3426 = vsyncpa [#allocation4], 1 }
 0x30b   :  { %3427 = vsyncpa [#allocation7], 1 }
 0x30c   :  { %3428 = vsyncpa [#allocation5], 1 }

</bundles_post_ra>
